<compile_context>
chip_gen: v5e
topology: v5e:2x2
jax: 0.10.0
libtpu: 0.0.40
codegen_flags: <defaults>
</compile_context>

<pallas_src>
import functools

import jax
import jax.numpy as jnp
from jax.experimental import pallas as pl
from jax.experimental.pallas import tpu as pltpu


# ----------------------------------------------------------------------------
# helpers
# ----------------------------------------------------------------------------
def _round_up(x, m):
    return ((x + m - 1) // m) * m


def _layernorm(x, g, b, eps=1e-12):
    mu = jnp.mean(x, axis=-1, keepdims=True)
    var = jnp.mean((x - mu) ** 2, axis=-1, keepdims=True)
    return (x - mu) * jax.lax.rsqrt(var + eps) * g + b


def _softmax(x):
    m = jnp.max(x, axis=-1, keepdims=True)
    e = jnp.exp(x - m)
    return e * pl.reciprocal(jnp.sum(e, axis=-1, keepdims=True), approx=True)


# ----------------------------------------------------------------------------
# Fused kernel.  grid = (batch_blocks, layers); the layer axis MUST stay the
# innermost ("arbitrary") grid axis so the hidden state carried in x_sc is
# valid (it is fully re-initialized at l == 0 for every new batch block).
# ----------------------------------------------------------------------------
def encoder_stack_kernel(x_ref, mask_ref, cbias_ref,
                         wqkv_ref, wo_ref, w1_ref, w2_ref, lbias_ref,
                         poolw_ref, h1w_ref, h2w_ref,
                         emb_ref, logits_ref,
                         x_sc,
                         *, num_heads, num_layers, batch_tile, seq_len):
    l = pl.program_id(1)
    nh, Bt, S = num_heads, batch_tile, seq_len
    T, D = x_sc.shape                       # T = Bt * S
    dh = D // nh
    F = w1_ref.shape[2]
    PAD = h2w_ref.shape[1]
    f32, bf16 = jnp.float32, jnp.bfloat16
    scale = float(dh) ** -0.5

    cbias = cbias_ref[...]                  # (8, CW) f32 constant-bias slab
    emb_g, emb_b = cbias[0:1, :D], cbias[1:2, :D]

    # New batch block: (re)initialize the VMEM-resident hidden state with the
    # fused embedding LayerNorm.
    @pl.when(l == 0)
    def _():
        x_sc[...] = _layernorm(x_ref[...].astype(f32), emb_g, emb_b)

    # Packed per-layer bias / LN slab: rows = bqkv, bo, ln1g, ln1b, b1, b2,
    # ln2g, ln2b (one DMA instead of eight).
    lb = lbias_ref[0]                       # (8, BW) f32
    bqkv = lb[0:1, :3 * D]
    bo = lb[1:2, :D]
    ln1g, ln1b = lb[2:3, :D], lb[3:4, :D]
    b1 = lb[4:5, :F]
    b2 = lb[5:6, :D]
    ln2g, ln2b = lb[6:7, :D], lb[7:8, :D]

    x = x_sc[...]                           # (T, D) f32, resident in VMEM
    xb = x.astype(bf16)

    # Fused QKV projection: one MXU call with 3*D output lanes.  The weight
    # columns are head-interleaved [h0:(q|k|v) | h1:(q|k|v) | ...], so the head
    # split below needs only ONE lane slice per head (was 3 per head before).
    qkv = (jnp.dot(xb, wqkv_ref[0], preferred_element_type=f32) + bqkv
           ).astype(bf16)                   # (T, 3D); single live copy
    qkv_h = jnp.stack([qkv[:, h * 3 * dh:(h + 1) * 3 * dh]
                       for h in range(nh)], axis=0)          # (nh, T, 3*dh)
    q = qkv_h[:, :, 0:dh]
    k = qkv_h[:, :, dh:2 * dh]
    v = qkv_h[:, :, 2 * dh:3 * dh]
    # TODO(synk): at production shapes compare the stack-of-slices against a
    #             reshape(T, nh, 3*dh) + swapaxes(0, 1) relayout.

    # Additive attention-mask bias, one row per batch row of the block.
    neg = (1.0 - mask_ref[0]) * (-1e9)      # (Bt, S) f32: 0 keep, -1e9 pad

    # Attention per batch row (rows of the block must never attend across each
    # other); all matmuls are batched over heads -- no per-head dot loop.
    ctx_rows = []
    for b in range(Bt):                     # Bt is small & static
        r0 = b * S
        qb = q[:, r0:r0 + S, :]
        kb = k[:, r0:r0 + S, :]
        vb = v[:, r0:r0 + S, :]
        s = jnp.einsum('hqd,hkd->hqk', qb, kb,
                       preferred_element_type=f32) * scale
        s = s + neg[b:b + 1, :][None, :, :]                  # (nh,S,S)+(1,1,S)
        a = _softmax(s)
        ctx_rows.append(jnp.einsum('hqk,hkd->hqd', a.astype(bf16), vb,
                                   preferred_element_type=f32))
    ctx = jnp.concatenate(ctx_rows, axis=1)                  # (nh, T, dh) f32

    # Output projection with the head merge folded into Wo (stored head-major
    # as (nh, dh, D)): one batched MXU call + a cheap leading-axis reduce; the
    # explicit lane concat of heads is gone.
    attn_out = jnp.einsum('htd,hdD->htD', ctx.astype(bf16), wo_ref[0],
                          preferred_element_type=f32).sum(axis=0) + bo

    h1 = _layernorm(x + attn_out, ln1g, ln1b)
    ffn = jnp.dot(h1.astype(bf16), w1_ref[0], preferred_element_type=f32) + b1
    ffn = jax.nn.gelu(ffn, approximate=True)    # tanh-GELU (see header TODO)
    ffn = jnp.dot(ffn.astype(bf16), w2_ref[0], preferred_element_type=f32) + b2
    x_new = _layernorm(h1 + ffn, ln2g, ln2b)
    x_sc[...] = x_new

    # Last layer: CLS pooling (Linear+Tanh) and the fused block-diagonal task
    # heads (Dropout=identity in eval -> Linear -> ReLU -> Linear), written as
    # one lane-dense PAD-wide logits slab (split back in the wrapper).
    @pl.when(l == num_layers - 1)
    def _():
        pool_b = cbias[2:3, :D]
        h1_b = cbias[3:4, :D]               # 2*(D//2) == D
        h2_b = cbias[4:5, :PAD]
        cls = jnp.concatenate([x_new[b * S:b * S + 1, :] for b in range(Bt)],
                              axis=0)       # (Bt, D)
        emb = jnp.tanh(jnp.dot(cls.astype(bf16), poolw_ref[...],
                               preferred_element_type=f32) + pool_b)
        emb_ref[0] = emb
        hid = jnp.maximum(jnp.dot(emb.astype(bf16), h1w_ref[...],
                                  preferred_element_type=f32) + h1_b, 0.0)
        logits_ref[0] = (jnp.dot(hid.astype(bf16), h2w_ref[...],
                                 preferred_element_type=f32) + h2_b)


# ----------------------------------------------------------------------------
# Parameter init (deterministic, synthetic stand-in for pretrained weights)
# ----------------------------------------------------------------------------
def init_params(key, *, vocab, max_seq, D, F, num_layers, num_heads,
                num_classes_a, num_classes_b):
    assert D % num_heads == 0 and D % 2 == 0
    H = D // 2
    dh = D // num_heads
    PAD = max(128, _round_up(num_classes_a + num_classes_b, 128))
    BW = max(3 * D, F, D)
    CW = max(D, PAD)

    keys = jax.random.split(key, 6 * num_layers + 8)
    it = iter(range(len(keys)))

    def w(shape):
        return jax.random.normal(keys[next(it)], shape, jnp.float32) * 0.02

    tok_emb = w((vocab, D))
    pos_emb = w((max_seq, D))

    wqkv_l, wo_l, w1_l, w2_l, lbias_l = [], [], [], [], []
    for _ in range(num_layers):
        wq, wk, wv = w((D, D)), w((D, D)), w((D, D))
        # Head-interleaved columns: [h0:(q|k|v) | h1:(q|k|v) | ...]
        wqkv_l.append(jnp.concatenate(
            [wq.reshape(D, num_heads, dh), wk.reshape(D, num_heads, dh),
             wv.reshape(D, num_heads, dh)], axis=2).reshape(D, 3 * D))
        wo_l.append(w((D, D)).reshape(num_heads, dh, D))   # head-major Wo
        w1_l.append(w((D, F)))
        w2_l.append(w((F, D)))
        lb = jnp.zeros((8, BW), jnp.float32)
        lb = lb.at[2, :D].set(1.0)          # attn-LN gamma
        lb = lb.at[6, :D].set(1.0)          # ffn-LN gamma
        lbias_l.append(lb)                  # rows: bqkv,bo,ln1g,ln1b,b1,b2,ln2g,ln2b

    cbias = jnp.zeros((8, CW), jnp.float32)
    cbias = cbias.at[0, :D].set(1.0)        # embedding-LN gamma
    # rows: emb_ln_g, emb_ln_b, pool_b, head1_b, head2_b, <unused>

    pool_w = w((D, D))
    head1_w = jnp.concatenate([w((D, H)), w((D, H))], axis=1)      # (D, 2H)
    a2_w, b2h_w = w((H, num_classes_a)), w((H, num_classes_b))
    head2_w = jnp.zeros((2 * H, PAD), jnp.float32)
    head2_w = head2_w.at[:H, :num_classes_a].set(a2_w)
    head2_w = head2_w.at[H:, num_classes_a:num_classes_a + num_classes_b].set(b2h_w)

    bf = lambda a: a.astype(jnp.bfloat16)   # bf16 matmul weights, f32 vectors
    return {
        "tok_emb": tok_emb, "pos_emb": pos_emb,
        "cbias": cbias,
        "wqkv": bf(jnp.stack(wqkv_l)), "wo": bf(jnp.stack(wo_l)),
        "w1": bf(jnp.stack(w1_l)), "w2": bf(jnp.stack(w2_l)),
        "lbias": jnp.stack(lbias_l),
        "pool_w": bf(pool_w), "head1_w": bf(head1_w), "head2_w": bf(head2_w),
    }


# ----------------------------------------------------------------------------
# Full forward (mirrors MultiTaskSentenceTransformer.forward with task=None)
# ----------------------------------------------------------------------------
def multi_task_forward(params, input_ids, attention_mask, *, num_heads,
                       num_classes_a, num_classes_b, batch_tile=2):
    B, S = input_ids.shape
    L, D, _ = params["wqkv"].shape
    F = params["w1"].shape[2]
    PAD = params["head2_w"].shape[1]
    CW = params["cbias"].shape[1]
    BW = params["lbias"].shape[2]
    nh = num_heads
    Bt = min(batch_tile, B)
    assert B % Bt == 0, "batch must be divisible by the batch tile"
    assert S % 8 == 0, "sequence length must be a multiple of 8 (sublane tile)"
    assert D % nh == 0
    nb = B // Bt
    T = Bt * S

    # Embedding gather + positions stay in plain JAX (glue around the kernel).
    x = (jnp.take(params["tok_emb"], input_ids, axis=0)
         + params["pos_emb"][None, :S, :]).astype(jnp.float32)
    x = x.reshape(B * S, D)                                    # (B*S, D)
    mask3 = attention_mask.astype(jnp.float32).reshape(nb, Bt, S)

    # Scoped-VMEM budget: ~75% of physical VMEM, capped (v5e/v6e 128 MiB -> 96,
    # v7x 64 MiB -> 48); conservative fallback if the query is unavailable.
    try:
        vmem_cap = pltpu.get_tpu_info().vmem_capacity_bytes
        vmem_limit = min(int(vmem_cap * 3 // 4), 112 * 1024 * 1024)
    except Exception:
        vmem_limit = 32 * 1024 * 1024

    # Advisory cost estimate; layer weights are re-streamed once per BATCH
    # BLOCK (nb grid steps), not once total.
    flops = int(nb * L * T * (8 * D * D + 4 * S * D + 4 * D * F)
                + B * (4 * D * D + 2 * D * PAD))
    transc = int(nb * L * (Bt * nh * S * S + T * F) + B * D)
    layer_w_bytes = 2 * (4 * D * D + 2 * D * F) + 4 * 8 * BW
    const_bytes = 2 * (2 * D * D + D * PAD) + 4 * 8 * CW
    bytes_acc = int(nb * L * layer_w_bytes + const_bytes
                    + 4 * (B * S * D + B * S + B * (D + PAD)))

    kernel = functools.partial(encoder_stack_kernel, num_heads=nh,
                               num_layers=L, batch_tile=Bt, seq_len=S)
    out_shape = (jax.ShapeDtypeStruct((nb, Bt, D), jnp.float32),
                 jax.ShapeDtypeStruct((nb, Bt, PAD), jnp.float32))
    out_specs = (pl.BlockSpec((1, Bt, D), lambda i, l: (i, 0, 0)),
                 pl.BlockSpec((1, Bt, PAD), lambda i, l: (i, 0, 0)))

    def build(buffered):
        def const_spec(shape):
            idx = lambda i, l: tuple(0 for _ in shape)
            if buffered:
                # Constant-index inputs: single-buffered -- double buffering is
                # pure VMEM waste when the block index never changes.
                return pl.BlockSpec(shape, idx, pipeline_mode=pl.Buffered(1))
            return pl.BlockSpec(shape, idx)

        def layer_spec(shape):              # leading L axis indexed by layer step
            nrest = len(shape) - 1
            return pl.BlockSpec((1,) + tuple(shape[1:]),
                                lambda i, l: (l,) + (0,) * nrest)

        in_specs = [
            pl.BlockSpec((T, D), lambda i, l: (i, 0)),         # embedded tokens
            pl.BlockSpec((1, Bt, S), lambda i, l: (i, 0, 0)),  # attention mask
            const_spec((8, CW)),                               # const bias slab
            layer_spec(params["wqkv"].shape),
            layer_spec(params["wo"].shape),
            layer_spec(params["w1"].shape),
            layer_spec(params["w2"].shape),
            layer_spec(params["lbias"].shape),
            const_spec((D, D)),                                # pooling W
            const_spec((D, D)),                                # fused head L1 W
            const_spec((D, PAD)),                              # fused head L2 W
        ]
        return pl.pallas_call(
            kernel,
            out_shape=out_shape,
            grid=(nb, L),        # layer axis stays innermost (x_sc carry)
            in_specs=in_specs,
            out_specs=out_specs,
            scratch_shapes=[pltpu.VMEM((T, D), jnp.float32)],  # resident hidden
            compiler_params=pltpu.CompilerParams(
                dimension_semantics=("parallel", "arbitrary"),  # batch | layers
                vmem_limit_bytes=vmem_limit),
            cost_estimate=pl.CostEstimate(flops=flops, transcendentals=transc,
                                          bytes_accessed=bytes_acc),
        )

    operands = (x, mask3, params["cbias"],
                params["wqkv"], params["wo"], params["w1"], params["w2"],
                params["lbias"],
                params["pool_w"], params["head1_w"], params["head2_w"])
    try:
        emb3, logits3 = build(True)(*operands)
    except Exception:
        # Fall back if pipeline_mode=pl.Buffered(1) is rejected by this
        # jax / Mosaic version; everything else is identical.
        emb3, logits3 = build(False)(*operands)

    emb = emb3.reshape(B, D)
    logits = logits3.reshape(B, PAD)
    return {"embeddings": emb,
            "task_a_logits": logits[:, :num_classes_a],
            "task_b_logits": logits[:, num_classes_a:num_classes_a + num_classes_b]}


# ----------------------------------------------------------------------------
if __name__ == "__main__":
    # NOTE: toy shapes are for correctness only; performance must be validated
    # at production shapes (D multiple of 128, S >= 128) -- see header.
    B, S, D, F = 4, 8, 32, 64
    NUM_HEADS, NUM_LAYERS = 4, 2
    NUM_A, NUM_B = 3, 2
    VOCAB = 100
    BT = 2          # 2 batch grid steps -> both v7x TensorCores stay busy

    key = jax.random.PRNGKey(0)
    k_params, k_ids = jax.random.split(key)
    params = init_params(k_params, vocab=VOCAB, max_seq=S, D=D, F=F,
                         num_layers=NUM_LAYERS, num_heads=NUM_HEADS,
                         num_classes_a=NUM_A, num_classes_b=NUM_B)

    input_ids = jax.random.randint(k_ids, (B, S), 0, VOCAB, dtype=jnp.int32)
    attention_mask = jnp.array([[1, 1, 1, 1, 1, 1, 1, 1],
                                [1, 1, 1, 1, 1, 0, 0, 0],
                                [1, 1, 1, 0, 0, 0, 0, 0],
                                [1, 1, 1, 1, 1, 1, 1, 0]], dtype=jnp.int32)

    out = multi_task_forward(params, input_ids, attention_mask,
                             num_heads=NUM_HEADS, num_classes_a=NUM_A,
                             num_classes_b=NUM_B, batch_tile=BT)
    jax.block_until_ready(out)

    assert out["embeddings"].shape == (B, D)
    assert out["task_a_logits"].shape == (B, NUM_A)
    assert out["task_b_logits"].shape == (B, NUM_B)
    assert bool(jnp.all(jnp.isfinite(out["embeddings"])))
    assert bool(jnp.all(jnp.isfinite(out["task_a_logits"])))
    assert bool(jnp.all(jnp.isfinite(out["task_b_logits"])))
    print("KERNEL_OK")
</pallas_src>

<mosaic_0001>
module attributes {stable_mosaic.version = 11 : i64} {
  func.func @encoder_stack_kernel(%arg0: i32, %arg1: i32, %arg2: memref<16x32xf32, #tpu.memory_space<vmem>>, %arg3: memref<1x2x8xf32, #tpu.memory_space<vmem>>, %arg4: memref<8x128xf32, #tpu.memory_space<vmem>>, %arg5: memref<1x32x96xbf16, #tpu.memory_space<vmem>>, %arg6: memref<1x4x8x32xbf16, #tpu.memory_space<vmem>>, %arg7: memref<1x32x64xbf16, #tpu.memory_space<vmem>>, %arg8: memref<1x64x32xbf16, #tpu.memory_space<vmem>>, %arg9: memref<1x8x96xf32, #tpu.memory_space<vmem>>, %arg10: memref<32x32xbf16, #tpu.memory_space<vmem>>, %arg11: memref<32x32xbf16, #tpu.memory_space<vmem>>, %arg12: memref<32x128xbf16, #tpu.memory_space<vmem>>, %arg13: memref<1x2x32xf32, #tpu.memory_space<vmem>>, %arg14: memref<1x2x128xf32, #tpu.memory_space<vmem>>, %arg15: memref<16x32xf32, #tpu.memory_space<vmem>>) attributes {dimension_semantics = [#tpu.dimension_semantics<parallel>, #tpu.dimension_semantics<arbitrary>], iteration_bounds = array<i64: 2, 2>, scalar_prefetch = 0 : i64, scratch_operands = 1 : i64, tpu.core_type = #tpu.core_type<tc>, window_params = [{transform_indices = @transform_0, window_bounds = array<i64: 16, 32>}, {transform_indices = @transform_1, window_bounds = array<i64: 1, 2, 8>}, {pipeline_mode = #tpu.pipeline_mode<synchronous>, transform_indices = @transform_2, window_bounds = array<i64: 8, 128>}, {transform_indices = @transform_3, window_bounds = array<i64: 1, 32, 96>}, {transform_indices = @transform_4, window_bounds = array<i64: 1, 4, 8, 32>}, {transform_indices = @transform_5, window_bounds = array<i64: 1, 32, 64>}, {transform_indices = @transform_6, window_bounds = array<i64: 1, 64, 32>}, {transform_indices = @transform_7, window_bounds = array<i64: 1, 8, 96>}, {pipeline_mode = #tpu.pipeline_mode<synchronous>, transform_indices = @transform_8, window_bounds = array<i64: 32, 32>}, {pipeline_mode = #tpu.pipeline_mode<synchronous>, transform_indices = @transform_9, window_bounds = array<i64: 32, 32>}, {pipeline_mode = #tpu.pipeline_mode<synchronous>, transform_indices = @transform_10, window_bounds = array<i64: 32, 128>}, {transform_indices = @transform_11, window_bounds = array<i64: 1, 2, 32>}, {transform_indices = @transform_12, window_bounds = array<i64: 1, 2, 128>}]} {
    %c0 = arith.constant 0 : index
    %c0_0 = arith.constant 0 : index
    %0 = vector.load %arg4[%c0, %c0_0] : memref<8x128xf32, #tpu.memory_space<vmem>>, vector<8x128xf32>
    %1 = vector.extract_strided_slice %0 {offsets = [0, 0], sizes = [1, 32], strides = [1, 1]} : vector<8x128xf32> to vector<1x32xf32>
    %2 = vector.extract_strided_slice %0 {offsets = [1, 0], sizes = [1, 32], strides = [1, 1]} : vector<8x128xf32> to vector<1x32xf32>
    %c0_i32 = arith.constant 0 : i32
    %3 = arith.cmpi eq, %arg1, %c0_i32 : i32
    %4 = arith.extui %3 : i1 to i32
    %c0_i32_1 = arith.constant 0 : i32
    %5 = arith.cmpi ne, %4, %c0_i32_1 : i32
    scf.if %5 {
      %c0_56 = arith.constant 0 : index
      %c0_57 = arith.constant 0 : index
      %169 = vector.load %arg2[%c0_56, %c0_57] : memref<16x32xf32, #tpu.memory_space<vmem>>, vector<16x32xf32>
      %cst_58 = arith.constant dense<0.000000e+00> : vector<16xf32>
      %170 = vector.multi_reduction <add>, %169, %cst_58 [1] : vector<16x32xf32> to vector<16xf32>
      %171 = vector.shape_cast %170 : vector<16xf32> to vector<16x1xf32>
      %cst_59 = arith.constant 3.200000e+01 : f32
      %172 = vector.broadcast %cst_59 : f32 to vector<16x1xf32>
      %173 = arith.divf %171, %172 : vector<16x1xf32>
      %174 = vector.broadcast %173 : vector<16x1xf32> to vector<16x32xf32>
      %175 = arith.subf %169, %174 : vector<16x32xf32>
      %176 = arith.mulf %175, %175 : vector<16x32xf32>
      %cst_60 = arith.constant dense<0.000000e+00> : vector<16xf32>
      %177 = vector.multi_reduction <add>, %176, %cst_60 [1] : vector<16x32xf32> to vector<16xf32>
      %178 = vector.shape_cast %177 : vector<16xf32> to vector<16x1xf32>
      %cst_61 = arith.constant 3.200000e+01 : f32
      %179 = vector.broadcast %cst_61 : f32 to vector<16x1xf32>
      %180 = arith.divf %178, %179 : vector<16x1xf32>
      %181 = vector.broadcast %173 : vector<16x1xf32> to vector<16x32xf32>
      %182 = arith.subf %169, %181 : vector<16x32xf32>
      %cst_62 = arith.constant 9.99999996E-13 : f32
      %183 = vector.broadcast %cst_62 : f32 to vector<16x1xf32>
      %184 = arith.addf %180, %183 : vector<16x1xf32>
      %185 = math.rsqrt %184 : vector<16x1xf32>
      %186 = vector.broadcast %185 : vector<16x1xf32> to vector<16x32xf32>
      %187 = arith.mulf %182, %186 : vector<16x32xf32>
      %188 = vector.broadcast %1 : vector<1x32xf32> to vector<16x32xf32>
      %189 = arith.mulf %187, %188 : vector<16x32xf32>
      %190 = vector.broadcast %2 : vector<1x32xf32> to vector<16x32xf32>
      %191 = arith.addf %189, %190 : vector<16x32xf32>
      %c0_63 = arith.constant 0 : index
      %c0_64 = arith.constant 0 : index
      %192 = vector.load %arg15[%c0_63, %c0_64] : memref<16x32xf32, #tpu.memory_space<vmem>>, vector<16x32xf32>
      tpu.vector_store %arg15[%c0_63, %c0_64], %191 {strides = array<i32>} : memref<16x32xf32, #tpu.memory_space<vmem>>, vector<16x32xf32>,
    } else {
    }
    %c0_2 = arith.constant 0 : index
    %c0_3 = arith.constant 0 : index
    %c0_4 = arith.constant 0 : index
    %6 = vector.load %arg9[%c0_2, %c0_3, %c0_4] : memref<1x8x96xf32, #tpu.memory_space<vmem>>, vector<1x8x96xf32>
    %7 = vector.shape_cast %6 : vector<1x8x96xf32> to vector<8x96xf32>
    %8 = vector.extract_strided_slice %7 {offsets = [0, 0], sizes = [1, 96], strides = [1, 1]} : vector<8x96xf32> to vector<1x96xf32>
    %9 = vector.extract_strided_slice %7 {offsets = [1, 0], sizes = [1, 32], strides = [1, 1]} : vector<8x96xf32> to vector<1x32xf32>
    %10 = vector.extract_strided_slice %7 {offsets = [2, 0], sizes = [1, 32], strides = [1, 1]} : vector<8x96xf32> to vector<1x32xf32>
    %11 = vector.extract_strided_slice %7 {offsets = [3, 0], sizes = [1, 32], strides = [1, 1]} : vector<8x96xf32> to vector<1x32xf32>
    %12 = vector.extract_strided_slice %7 {offsets = [4, 0], sizes = [1, 64], strides = [1, 1]} : vector<8x96xf32> to vector<1x64xf32>
    %13 = vector.extract_strided_slice %7 {offsets = [5, 0], sizes = [1, 32], strides = [1, 1]} : vector<8x96xf32> to vector<1x32xf32>
    %14 = vector.extract_strided_slice %7 {offsets = [6, 0], sizes = [1, 32], strides = [1, 1]} : vector<8x96xf32> to vector<1x32xf32>
    %15 = vector.extract_strided_slice %7 {offsets = [7, 0], sizes = [1, 32], strides = [1, 1]} : vector<8x96xf32> to vector<1x32xf32>
    %c0_5 = arith.constant 0 : index
    %c0_6 = arith.constant 0 : index
    %16 = vector.load %arg15[%c0_5, %c0_6] : memref<16x32xf32, #tpu.memory_space<vmem>>, vector<16x32xf32>
    %17 = arith.truncf %16 : vector<16x32xf32> to vector<16x32xbf16>
    %c0_7 = arith.constant 0 : index
    %c0_8 = arith.constant 0 : index
    %c0_9 = arith.constant 0 : index
    %18 = vector.load %arg5[%c0_7, %c0_8, %c0_9] : memref<1x32x96xbf16, #tpu.memory_space<vmem>>, vector<1x32x96xbf16>
    %19 = vector.shape_cast %18 : vector<1x32x96xbf16> to vector<32x96xbf16>
    %cst = arith.constant dense<0.000000e+00> : vector<16x96xf32>
    %20 = tpu.matmul %17, %19, %cst {dimension_numbers = #tpu.dot_dimension_numbers<[1], [0], [0], [1], [0, 0, 1, 1], [], []>} : vector<16x32xbf16>, vector<32x96xbf16>, vector<16x96xf32> -> vector<16x96xf32>
    %21 = vector.broadcast %8 : vector<1x96xf32> to vector<16x96xf32>
    %22 = arith.addf %20, %21 : vector<16x96xf32>
    %23 = arith.truncf %22 : vector<16x96xf32> to vector<16x96xbf16>
    %24 = vector.extract_strided_slice %23 {offsets = [0, 0], sizes = [16, 24], strides = [1, 1]} : vector<16x96xbf16> to vector<16x24xbf16>
    %25 = vector.extract_strided_slice %23 {offsets = [0, 24], sizes = [16, 24], strides = [1, 1]} : vector<16x96xbf16> to vector<16x24xbf16>
    %26 = vector.extract_strided_slice %23 {offsets = [0, 48], sizes = [16, 24], strides = [1, 1]} : vector<16x96xbf16> to vector<16x24xbf16>
    %27 = vector.extract_strided_slice %23 {offsets = [0, 72], sizes = [16, 24], strides = [1, 1]} : vector<16x96xbf16> to vector<16x24xbf16>
    %28 = vector.shape_cast %24 : vector<16x24xbf16> to vector<1x16x24xbf16>
    %29 = vector.shape_cast %25 : vector<16x24xbf16> to vector<1x16x24xbf16>
    %30 = vector.shape_cast %26 : vector<16x24xbf16> to vector<1x16x24xbf16>
    %31 = vector.shape_cast %27 : vector<16x24xbf16> to vector<1x16x24xbf16>
    %32 = tpu.concatenate %28, %29, %30, %31 in 0 : vector<1x16x24xbf16>, vector<1x16x24xbf16>, vector<1x16x24xbf16>, vector<1x16x24xbf16> -> vector<4x16x24xbf16>
    %33 = vector.extract_strided_slice %32 {offsets = [0, 0, 0], sizes = [4, 16, 8], strides = [1, 1, 1]} : vector<4x16x24xbf16> to vector<4x16x8xbf16>
    %34 = vector.extract_strided_slice %32 {offsets = [0, 0, 8], sizes = [4, 16, 8], strides = [1, 1, 1]} : vector<4x16x24xbf16> to vector<4x16x8xbf16>
    %35 = vector.extract_strided_slice %32 {offsets = [0, 0, 16], sizes = [4, 16, 8], strides = [1, 1, 1]} : vector<4x16x24xbf16> to vector<4x16x8xbf16>
    %c0_10 = arith.constant 0 : index
    %c0_11 = arith.constant 0 : index
    %c0_12 = arith.constant 0 : index
    %36 = vector.load %arg3[%c0_10, %c0_11, %c0_12] : memref<1x2x8xf32, #tpu.memory_space<vmem>>, vector<1x2x8xf32>
    %37 = vector.shape_cast %36 : vector<1x2x8xf32> to vector<2x8xf32>
    %cst_13 = arith.constant 1.000000e+00 : f32
    %38 = vector.broadcast %cst_13 : f32 to vector<2x8xf32>
    %39 = arith.subf %38, %37 : vector<2x8xf32>
    %cst_14 = arith.constant -1.000000e+09 : f32
    %40 = vector.broadcast %cst_14 : f32 to vector<2x8xf32>
    %41 = arith.mulf %39, %40 : vector<2x8xf32>
    %42 = vector.extract_strided_slice %33 {offsets = [0, 0, 0], sizes = [4, 8, 8], strides = [1, 1, 1]} : vector<4x16x8xbf16> to vector<4x8x8xbf16>
    %43 = vector.extract_strided_slice %34 {offsets = [0, 0, 0], sizes = [4, 8, 8], strides = [1, 1, 1]} : vector<4x16x8xbf16> to vector<4x8x8xbf16>
    %44 = vector.extract_strided_slice %35 {offsets = [0, 0, 0], sizes = [4, 8, 8], strides = [1, 1, 1]} : vector<4x16x8xbf16> to vector<4x8x8xbf16>
    "tpu.trace_start"() <{level = 10 : i32, message = "hqd,hkd->hqk"}> : () -> ()
    %cst_15 = arith.constant dense<0.000000e+00> : vector<4x8x8xf32>
    %45 = tpu.matmul %42, %43, %cst_15 {dimension_numbers = #tpu.dot_dimension_numbers<[2], [2], [1], [1], [0, 0, 0, 1, 1, 1], [0], [0]>} : vector<4x8x8xbf16>, vector<4x8x8xbf16>, vector<4x8x8xf32> -> vector<4x8x8xf32>
    "tpu.trace_stop"() : () -> ()
    %cst_16 = arith.constant 0.353553385 : f32
    %46 = vector.broadcast %cst_16 : f32 to vector<4x8x8xf32>
    %47 = arith.mulf %45, %46 : vector<4x8x8xf32>
    %48 = vector.extract_strided_slice %41 {offsets = [0, 0], sizes = [1, 8], strides = [1, 1]} : vector<2x8xf32> to vector<1x8xf32>
    %49 = vector.shape_cast %48 : vector<1x8xf32> to vector<1x1x8xf32>
    %50 = vector.broadcast %49 : vector<1x1x8xf32> to vector<4x8x8xf32>
    %51 = arith.addf %47, %50 : vector<4x8x8xf32>
    %cst_17 = arith.constant dense<0xFF800000> : vector<4x8xf32>
    %52 = vector.multi_reduction <maximumf>, %51, %cst_17 [2] : vector<4x8x8xf32> to vector<4x8xf32>
    %53 = vector.shape_cast %52 : vector<4x8xf32> to vector<4x8x1xf32>
    %54 = vector.broadcast %53 : vector<4x8x1xf32> to vector<4x8x8xf32>
    %55 = arith.subf %51, %54 : vector<4x8x8xf32>
    %56 = math.exp %55 : vector<4x8x8xf32>
    %cst_18 = arith.constant dense<0.000000e+00> : vector<4x8xf32>
    %57 = vector.multi_reduction <add>, %56, %cst_18 [2] : vector<4x8x8xf32> to vector<4x8xf32>
    %58 = vector.shape_cast %57 : vector<4x8xf32> to vector<4x8x1xf32>
    %59 = tpu.reciprocal %58 {approx = true} : vector<4x8x1xf32> -> vector<4x8x1xf32>
    %60 = vector.broadcast %59 : vector<4x8x1xf32> to vector<4x8x8xf32>
    %61 = arith.mulf %56, %60 : vector<4x8x8xf32>
    %62 = arith.truncf %61 : vector<4x8x8xf32> to vector<4x8x8xbf16>
    "tpu.trace_start"() <{level = 10 : i32, message = "hqk,hkd->hqd"}> : () -> ()
    %cst_19 = arith.constant dense<0.000000e+00> : vector<4x8x8xf32>
    %63 = tpu.matmul %62, %44, %cst_19 {dimension_numbers = #tpu.dot_dimension_numbers<[2], [1], [1], [2], [0, 0, 0, 1, 1, 2], [0], [0]>} : vector<4x8x8xbf16>, vector<4x8x8xbf16>, vector<4x8x8xf32> -> vector<4x8x8xf32>
    "tpu.trace_stop"() : () -> ()
    %64 = vector.extract_strided_slice %33 {offsets = [0, 8, 0], sizes = [4, 8, 8], strides = [1, 1, 1]} : vector<4x16x8xbf16> to vector<4x8x8xbf16>
    %65 = vector.extract_strided_slice %34 {offsets = [0, 8, 0], sizes = [4, 8, 8], strides = [1, 1, 1]} : vector<4x16x8xbf16> to vector<4x8x8xbf16>
    %66 = vector.extract_strided_slice %35 {offsets = [0, 8, 0], sizes = [4, 8, 8], strides = [1, 1, 1]} : vector<4x16x8xbf16> to vector<4x8x8xbf16>
    "tpu.trace_start"() <{level = 10 : i32, message = "hqd,hkd->hqk"}> : () -> ()
    %cst_20 = arith.constant dense<0.000000e+00> : vector<4x8x8xf32>
    %67 = tpu.matmul %64, %65, %cst_20 {dimension_numbers = #tpu.dot_dimension_numbers<[2], [2], [1], [1], [0, 0, 0, 1, 1, 1], [0], [0]>} : vector<4x8x8xbf16>, vector<4x8x8xbf16>, vector<4x8x8xf32> -> vector<4x8x8xf32>
    "tpu.trace_stop"() : () -> ()
    %cst_21 = arith.constant 0.353553385 : f32
    %68 = vector.broadcast %cst_21 : f32 to vector<4x8x8xf32>
    %69 = arith.mulf %67, %68 : vector<4x8x8xf32>
    %70 = vector.extract_strided_slice %41 {offsets = [1, 0], sizes = [1, 8], strides = [1, 1]} : vector<2x8xf32> to vector<1x8xf32>
    %71 = vector.shape_cast %70 : vector<1x8xf32> to vector<1x1x8xf32>
    %72 = vector.broadcast %71 : vector<1x1x8xf32> to vector<4x8x8xf32>
    %73 = arith.addf %69, %72 : vector<4x8x8xf32>
    %cst_22 = arith.constant dense<0xFF800000> : vector<4x8xf32>
    %74 = vector.multi_reduction <maximumf>, %73, %cst_22 [2] : vector<4x8x8xf32> to vector<4x8xf32>
    %75 = vector.shape_cast %74 : vector<4x8xf32> to vector<4x8x1xf32>
    %76 = vector.broadcast %75 : vector<4x8x1xf32> to vector<4x8x8xf32>
    %77 = arith.subf %73, %76 : vector<4x8x8xf32>
    %78 = math.exp %77 : vector<4x8x8xf32>
    %cst_23 = arith.constant dense<0.000000e+00> : vector<4x8xf32>
    %79 = vector.multi_reduction <add>, %78, %cst_23 [2] : vector<4x8x8xf32> to vector<4x8xf32>
    %80 = vector.shape_cast %79 : vector<4x8xf32> to vector<4x8x1xf32>
    %81 = tpu.reciprocal %80 {approx = true} : vector<4x8x1xf32> -> vector<4x8x1xf32>
    %82 = vector.broadcast %81 : vector<4x8x1xf32> to vector<4x8x8xf32>
    %83 = arith.mulf %78, %82 : vector<4x8x8xf32>
    %84 = arith.truncf %83 : vector<4x8x8xf32> to vector<4x8x8xbf16>
    "tpu.trace_start"() <{level = 10 : i32, message = "hqk,hkd->hqd"}> : () -> ()
    %cst_24 = arith.constant dense<0.000000e+00> : vector<4x8x8xf32>
    %85 = tpu.matmul %84, %66, %cst_24 {dimension_numbers = #tpu.dot_dimension_numbers<[2], [1], [1], [2], [0, 0, 0, 1, 1, 2], [0], [0]>} : vector<4x8x8xbf16>, vector<4x8x8xbf16>, vector<4x8x8xf32> -> vector<4x8x8xf32>
    "tpu.trace_stop"() : () -> ()
    %86 = tpu.concatenate %63, %85 in 1 : vector<4x8x8xf32>, vector<4x8x8xf32> -> vector<4x16x8xf32>
    %87 = arith.truncf %86 : vector<4x16x8xf32> to vector<4x16x8xbf16>
    %c0_25 = arith.constant 0 : index
    %c0_26 = arith.constant 0 : index
    %c0_27 = arith.constant 0 : index
    %c0_28 = arith.constant 0 : index
    %88 = vector.load %arg6[%c0_25, %c0_26, %c0_27, %c0_28] : memref<1x4x8x32xbf16, #tpu.memory_space<vmem>>, vector<1x4x8x32xbf16>
    %89 = vector.shape_cast %88 : vector<1x4x8x32xbf16> to vector<4x8x32xbf16>
    "tpu.trace_start"() <{level = 10 : i32, message = "htd,hdD->htD"}> : () -> ()
    %cst_29 = arith.constant dense<0.000000e+00> : vector<4x16x32xf32>
    %90 = tpu.matmul %87, %89, %cst_29 {dimension_numbers = #tpu.dot_dimension_numbers<[2], [1], [1], [2], [0, 0, 0, 1, 1, 2], [0], [0]>} : vector<4x16x8xbf16>, vector<4x8x32xbf16>, vector<4x16x32xf32> -> vector<4x16x32xf32>
    "tpu.trace_stop"() : () -> ()
    %cst_30 = arith.constant dense<0.000000e+00> : vector<16x32xf32>
    %91 = vector.multi_reduction <add>, %90, %cst_30 [0] : vector<4x16x32xf32> to vector<16x32xf32>
    %92 = vector.broadcast %9 : vector<1x32xf32> to vector<16x32xf32>
    %93 = arith.addf %91, %92 : vector<16x32xf32>
    %94 = arith.addf %16, %93 : vector<16x32xf32>
    %cst_31 = arith.constant dense<0.000000e+00> : vector<16xf32>
    %95 = vector.multi_reduction <add>, %94, %cst_31 [1] : vector<16x32xf32> to vector<16xf32>
    %96 = vector.shape_cast %95 : vector<16xf32> to vector<16x1xf32>
    %cst_32 = arith.constant 3.200000e+01 : f32
    %97 = vector.broadcast %cst_32 : f32 to vector<16x1xf32>
    %98 = arith.divf %96, %97 : vector<16x1xf32>
    %99 = vector.broadcast %98 : vector<16x1xf32> to vector<16x32xf32>
    %100 = arith.subf %94, %99 : vector<16x32xf32>
    %101 = arith.mulf %100, %100 : vector<16x32xf32>
    %cst_33 = arith.constant dense<0.000000e+00> : vector<16xf32>
    %102 = vector.multi_reduction <add>, %101, %cst_33 [1] : vector<16x32xf32> to vector<16xf32>
    %103 = vector.shape_cast %102 : vector<16xf32> to vector<16x1xf32>
    %cst_34 = arith.constant 3.200000e+01 : f32
    %104 = vector.broadcast %cst_34 : f32 to vector<16x1xf32>
    %105 = arith.divf %103, %104 : vector<16x1xf32>
    %106 = vector.broadcast %98 : vector<16x1xf32> to vector<16x32xf32>
    %107 = arith.subf %94, %106 : vector<16x32xf32>
    %cst_35 = arith.constant 9.99999996E-13 : f32
    %108 = vector.broadcast %cst_35 : f32 to vector<16x1xf32>
    %109 = arith.addf %105, %108 : vector<16x1xf32>
    %110 = math.rsqrt %109 : vector<16x1xf32>
    %111 = vector.broadcast %110 : vector<16x1xf32> to vector<16x32xf32>
    %112 = arith.mulf %107, %111 : vector<16x32xf32>
    %113 = vector.broadcast %10 : vector<1x32xf32> to vector<16x32xf32>
    %114 = arith.mulf %112, %113 : vector<16x32xf32>
    %115 = vector.broadcast %11 : vector<1x32xf32> to vector<16x32xf32>
    %116 = arith.addf %114, %115 : vector<16x32xf32>
    %117 = arith.truncf %116 : vector<16x32xf32> to vector<16x32xbf16>
    %c0_36 = arith.constant 0 : index
    %c0_37 = arith.constant 0 : index
    %c0_38 = arith.constant 0 : index
    %118 = vector.load %arg7[%c0_36, %c0_37, %c0_38] : memref<1x32x64xbf16, #tpu.memory_space<vmem>>, vector<1x32x64xbf16>
    %119 = vector.shape_cast %118 : vector<1x32x64xbf16> to vector<32x64xbf16>
    %cst_39 = arith.constant dense<0.000000e+00> : vector<16x64xf32>
    %120 = tpu.matmul %117, %119, %cst_39 {dimension_numbers = #tpu.dot_dimension_numbers<[1], [0], [0], [1], [0, 0, 1, 1], [], []>} : vector<16x32xbf16>, vector<32x64xbf16>, vector<16x64xf32> -> vector<16x64xf32>
    %121 = vector.broadcast %12 : vector<1x64xf32> to vector<16x64xf32>
    %122 = arith.addf %120, %121 : vector<16x64xf32>
    %123 = arith.mulf %122, %122 : vector<16x64xf32>
    %124 = arith.mulf %122, %123 : vector<16x64xf32>
    %cst_40 = arith.constant 4.471500e-02 : f32
    %125 = vector.broadcast %cst_40 : f32 to vector<16x64xf32>
    %126 = arith.mulf %125, %124 : vector<16x64xf32>
    %127 = arith.addf %122, %126 : vector<16x64xf32>
    %cst_41 = arith.constant 0.797884583 : f32
    %128 = vector.broadcast %cst_41 : f32 to vector<16x64xf32>
    %129 = arith.mulf %128, %127 : vector<16x64xf32>
    %130 = math.tanh %129 : vector<16x64xf32>
    %cst_42 = arith.constant 1.000000e+00 : f32
    %131 = vector.broadcast %cst_42 : f32 to vector<16x64xf32>
    %132 = arith.addf %131, %130 : vector<16x64xf32>
    %cst_43 = arith.constant 5.000000e-01 : f32
    %133 = vector.broadcast %cst_43 : f32 to vector<16x64xf32>
    %134 = arith.mulf %133, %132 : vector<16x64xf32>
    %135 = arith.mulf %122, %134 : vector<16x64xf32>
    %136 = arith.truncf %135 : vector<16x64xf32> to vector<16x64xbf16>
    %c0_44 = arith.constant 0 : index
    %c0_45 = arith.constant 0 : index
    %c0_46 = arith.constant 0 : index
    %137 = vector.load %arg8[%c0_44, %c0_45, %c0_46] : memref<1x64x32xbf16, #tpu.memory_space<vmem>>, vector<1x64x32xbf16>
    %138 = vector.shape_cast %137 : vector<1x64x32xbf16> to vector<64x32xbf16>
    %cst_47 = arith.constant dense<0.000000e+00> : vector<16x32xf32>
    %139 = tpu.matmul %136, %138, %cst_47 {dimension_numbers = #tpu.dot_dimension_numbers<[1], [0], [0], [1], [0, 0, 1, 1], [], []>} : vector<16x64xbf16>, vector<64x32xbf16>, vector<16x32xf32> -> vector<16x32xf32>
    %140 = vector.broadcast %13 : vector<1x32xf32> to vector<16x32xf32>
    %141 = arith.addf %139, %140 : vector<16x32xf32>
    %142 = arith.addf %116, %141 : vector<16x32xf32>
    %cst_48 = arith.constant dense<0.000000e+00> : vector<16xf32>
    %143 = vector.multi_reduction <add>, %142, %cst_48 [1] : vector<16x32xf32> to vector<16xf32>
    %144 = vector.shape_cast %143 : vector<16xf32> to vector<16x1xf32>
    %cst_49 = arith.constant 3.200000e+01 : f32
    %145 = vector.broadcast %cst_49 : f32 to vector<16x1xf32>
    %146 = arith.divf %144, %145 : vector<16x1xf32>
    %147 = vector.broadcast %146 : vector<16x1xf32> to vector<16x32xf32>
    %148 = arith.subf %142, %147 : vector<16x32xf32>
    %149 = arith.mulf %148, %148 : vector<16x32xf32>
    %cst_50 = arith.constant dense<0.000000e+00> : vector<16xf32>
    %150 = vector.multi_reduction <add>, %149, %cst_50 [1] : vector<16x32xf32> to vector<16xf32>
    %151 = vector.shape_cast %150 : vector<16xf32> to vector<16x1xf32>
    %cst_51 = arith.constant 3.200000e+01 : f32
    %152 = vector.broadcast %cst_51 : f32 to vector<16x1xf32>
    %153 = arith.divf %151, %152 : vector<16x1xf32>
    %154 = vector.broadcast %146 : vector<16x1xf32> to vector<16x32xf32>
    %155 = arith.subf %142, %154 : vector<16x32xf32>
    %cst_52 = arith.constant 9.99999996E-13 : f32
    %156 = vector.broadcast %cst_52 : f32 to vector<16x1xf32>
    %157 = arith.addf %153, %156 : vector<16x1xf32>
    %158 = math.rsqrt %157 : vector<16x1xf32>
    %159 = vector.broadcast %158 : vector<16x1xf32> to vector<16x32xf32>
    %160 = arith.mulf %155, %159 : vector<16x32xf32>
    %161 = vector.broadcast %14 : vector<1x32xf32> to vector<16x32xf32>
    %162 = arith.mulf %160, %161 : vector<16x32xf32>
    %163 = vector.broadcast %15 : vector<1x32xf32> to vector<16x32xf32>
    %164 = arith.addf %162, %163 : vector<16x32xf32>
    %c0_53 = arith.constant 0 : index
    %c0_54 = arith.constant 0 : index
    %165 = vector.load %arg15[%c0_53, %c0_54] : memref<16x32xf32, #tpu.memory_space<vmem>>, vector<16x32xf32>
    tpu.vector_store %arg15[%c0_53, %c0_54], %164 {strides = array<i32>} : memref<16x32xf32, #tpu.memory_space<vmem>>, vector<16x32xf32>,
    %c1_i32 = arith.constant 1 : i32
    %166 = arith.cmpi eq, %arg1, %c1_i32 : i32
    %167 = arith.extui %166 : i1 to i32
    %c0_i32_55 = arith.constant 0 : i32
    %168 = arith.cmpi ne, %167, %c0_i32_55 : i32
    scf.if %168 {
      %169 = vector.extract_strided_slice %0 {offsets = [2, 0], sizes = [1, 32], strides = [1, 1]} : vector<8x128xf32> to vector<1x32xf32>
      %170 = vector.extract_strided_slice %0 {offsets = [3, 0], sizes = [1, 32], strides = [1, 1]} : vector<8x128xf32> to vector<1x32xf32>
      %171 = vector.extract_strided_slice %0 {offsets = [4, 0], sizes = [1, 128], strides = [1, 1]} : vector<8x128xf32> to vector<1x128xf32>
      %172 = vector.extract_strided_slice %164 {offsets = [0, 0], sizes = [1, 32], strides = [1, 1]} : vector<16x32xf32> to vector<1x32xf32>
      %173 = vector.extract_strided_slice %164 {offsets = [8, 0], sizes = [1, 32], strides = [1, 1]} : vector<16x32xf32> to vector<1x32xf32>
      %174 = tpu.concatenate %172, %173 in 0 : vector<1x32xf32>, vector<1x32xf32> -> vector<2x32xf32>
      %175 = arith.truncf %174 : vector<2x32xf32> to vector<2x32xbf16>
      %c0_56 = arith.constant 0 : index
      %c0_57 = arith.constant 0 : index
      %176 = vector.load %arg10[%c0_56, %c0_57] : memref<32x32xbf16, #tpu.memory_space<vmem>>, vector<32x32xbf16>
      %cst_58 = arith.constant dense<0.000000e+00> : vector<2x32xf32>
      %177 = tpu.matmul %175, %176, %cst_58 {dimension_numbers = #tpu.dot_dimension_numbers<[1], [0], [0], [1], [0, 0, 1, 1], [], []>} : vector<2x32xbf16>, vector<32x32xbf16>, vector<2x32xf32> -> vector<2x32xf32>
      %178 = vector.broadcast %169 : vector<1x32xf32> to vector<2x32xf32>
      %179 = arith.addf %177, %178 : vector<2x32xf32>
      %180 = math.tanh %179 : vector<2x32xf32>
      %c0_59 = arith.constant 0 : index
      %c0_60 = arith.constant 0 : index
      %c0_61 = arith.constant 0 : index
      %181 = vector.load %arg13[%c0_59, %c0_60, %c0_61] : memref<1x2x32xf32, #tpu.memory_space<vmem>>, vector<1x2x32xf32>
      %182 = vector.shape_cast %181 : vector<1x2x32xf32> to vector<2x32xf32>
      %183 = vector.shape_cast %180 : vector<2x32xf32> to vector<1x2x32xf32>
      tpu.vector_store %arg13[%c0_59, %c0_60, %c0_61], %183 {strides = array<i32>} : memref<1x2x32xf32, #tpu.memory_space<vmem>>, vector<1x2x32xf32>,
      %184 = arith.truncf %180 : vector<2x32xf32> to vector<2x32xbf16>
      %c0_62 = arith.constant 0 : index
      %c0_63 = arith.constant 0 : index
      %185 = vector.load %arg11[%c0_62, %c0_63] : memref<32x32xbf16, #tpu.memory_space<vmem>>, vector<32x32xbf16>
      %cst_64 = arith.constant dense<0.000000e+00> : vector<2x32xf32>
      %186 = tpu.matmul %184, %185, %cst_64 {dimension_numbers = #tpu.dot_dimension_numbers<[1], [0], [0], [1], [0, 0, 1, 1], [], []>} : vector<2x32xbf16>, vector<32x32xbf16>, vector<2x32xf32> -> vector<2x32xf32>
      %187 = vector.broadcast %170 : vector<1x32xf32> to vector<2x32xf32>
      %188 = arith.addf %186, %187 : vector<2x32xf32>
      %cst_65 = arith.constant 0.000000e+00 : f32
      %189 = vector.broadcast %cst_65 : f32 to vector<2x32xf32>
      %190 = arith.maximumf %188, %189 : vector<2x32xf32>
      %191 = arith.truncf %190 : vector<2x32xf32> to vector<2x32xbf16>
      %c0_66 = arith.constant 0 : index
      %c0_67 = arith.constant 0 : index
      %192 = vector.load %arg12[%c0_66, %c0_67] : memref<32x128xbf16, #tpu.memory_space<vmem>>, vector<32x128xbf16>
      %cst_68 = arith.constant dense<0.000000e+00> : vector<2x128xf32>
      %193 = tpu.matmul %191, %192, %cst_68 {dimension_numbers = #tpu.dot_dimension_numbers<[1], [0], [0], [1], [0, 0, 1, 1], [], []>} : vector<2x32xbf16>, vector<32x128xbf16>, vector<2x128xf32> -> vector<2x128xf32>
      %194 = vector.broadcast %171 : vector<1x128xf32> to vector<2x128xf32>
      %195 = arith.addf %193, %194 : vector<2x128xf32>
      %c0_69 = arith.constant 0 : index
      %c0_70 = arith.constant 0 : index
      %c0_71 = arith.constant 0 : index
      %196 = vector.load %arg14[%c0_69, %c0_70, %c0_71] : memref<1x2x128xf32, #tpu.memory_space<vmem>>, vector<1x2x128xf32>
      %197 = vector.shape_cast %196 : vector<1x2x128xf32> to vector<2x128xf32>
      %198 = vector.shape_cast %195 : vector<2x128xf32> to vector<1x2x128xf32>
      tpu.vector_store %arg14[%c0_69, %c0_70, %c0_71], %198 {strides = array<i32>} : memref<1x2x128xf32, #tpu.memory_space<vmem>>, vector<1x2x128xf32>,
    } else {
    }
    return
  }
  func.func @transform_0(%arg0: i32, %arg1: i32) -> (i32, i32) {
    %c0_i32 = arith.constant 0 : i32
    %c0_i32_0 = arith.constant 0 : i32
    return %arg0, %c0_i32 : i32, i32
  }
  func.func @transform_1(%arg0: i32, %arg1: i32) -> (i32, i32, i32) {
    %c0_i32 = arith.constant 0 : i32
    %c0_i32_0 = arith.constant 0 : i32
    %c0_i32_1 = arith.constant 0 : i32
    return %arg0, %c0_i32, %c0_i32_0 : i32, i32, i32
  }
  func.func @transform_2(%arg0: i32, %arg1: i32) -> (i32, i32) {
    %c0_i32 = arith.constant 0 : i32
    %c0_i32_0 = arith.constant 0 : i32
    %c0_i32_1 = arith.constant 0 : i32
    return %c0_i32, %c0_i32_0 : i32, i32
  }
  func.func @transform_3(%arg0: i32, %arg1: i32) -> (i32, i32, i32) {
    %c0_i32 = arith.constant 0 : i32
    %c0_i32_0 = arith.constant 0 : i32
    %c0_i32_1 = arith.constant 0 : i32
    return %arg1, %c0_i32, %c0_i32_0 : i32, i32, i32
  }
  func.func @transform_4(%arg0: i32, %arg1: i32) -> (i32, i32, i32, i32) {
    %c0_i32 = arith.constant 0 : i32
    %c0_i32_0 = arith.constant 0 : i32
    %c0_i32_1 = arith.constant 0 : i32
    %c0_i32_2 = arith.constant 0 : i32
    return %arg1, %c0_i32, %c0_i32_0, %c0_i32_1 : i32, i32, i32, i32
  }
  func.func @transform_5(%arg0: i32, %arg1: i32) -> (i32, i32, i32) {
    %c0_i32 = arith.constant 0 : i32
    %c0_i32_0 = arith.constant 0 : i32
    %c0_i32_1 = arith.constant 0 : i32
    return %arg1, %c0_i32, %c0_i32_0 : i32, i32, i32
  }
  func.func @transform_6(%arg0: i32, %arg1: i32) -> (i32, i32, i32) {
    %c0_i32 = arith.constant 0 : i32
    %c0_i32_0 = arith.constant 0 : i32
    %c0_i32_1 = arith.constant 0 : i32
    return %arg1, %c0_i32, %c0_i32_0 : i32, i32, i32
  }
  func.func @transform_7(%arg0: i32, %arg1: i32) -> (i32, i32, i32) {
    %c0_i32 = arith.constant 0 : i32
    %c0_i32_0 = arith.constant 0 : i32
    %c0_i32_1 = arith.constant 0 : i32
    return %arg1, %c0_i32, %c0_i32_0 : i32, i32, i32
  }
  func.func @transform_8(%arg0: i32, %arg1: i32) -> (i32, i32) {
    %c0_i32 = arith.constant 0 : i32
    %c0_i32_0 = arith.constant 0 : i32
    %c0_i32_1 = arith.constant 0 : i32
    return %c0_i32, %c0_i32_0 : i32, i32
  }
  func.func @transform_9(%arg0: i32, %arg1: i32) -> (i32, i32) {
    %c0_i32 = arith.constant 0 : i32
    %c0_i32_0 = arith.constant 0 : i32
    %c0_i32_1 = arith.constant 0 : i32
    return %c0_i32, %c0_i32_0 : i32, i32
  }
  func.func @transform_10(%arg0: i32, %arg1: i32) -> (i32, i32) {
    %c0_i32 = arith.constant 0 : i32
    %c0_i32_0 = arith.constant 0 : i32
    %c0_i32_1 = arith.constant 0 : i32
    return %c0_i32, %c0_i32_0 : i32, i32
  }
  func.func @transform_11(%arg0: i32, %arg1: i32) -> (i32, i32, i32) {
    %c0_i32 = arith.constant 0 : i32
    %c0_i32_0 = arith.constant 0 : i32
    %c0_i32_1 = arith.constant 0 : i32
    return %arg0, %c0_i32, %c0_i32_0 : i32, i32, i32
  }
  func.func @transform_12(%arg0: i32, %arg1: i32) -> (i32, i32, i32) {
    %c0_i32 = arith.constant 0 : i32
    %c0_i32_0 = arith.constant 0 : i32
    %c0_i32_1 = arith.constant 0 : i32
    return %arg0, %c0_i32, %c0_i32_0 : i32, i32, i32
  }
}

module attributes {stable_mosaic.version = 11 : i64} {
  func.func @encoder_stack_kernel(%arg0: i32, %arg1: i32, %arg2: memref<16x32xf32, #tpu.memory_space<vmem>>, %arg3: memref<1x2x8xf32, #tpu.memory_space<vmem>>, %arg4: memref<8x128xf32, #tpu.memory_space<vmem>>, %arg5: memref<1x32x96xbf16, #tpu.memory_space<vmem>>, %arg6: memref<1x4x8x32xbf16, #tpu.memory_space<vmem>>, %arg7: memref<1x32x64xbf16, #tpu.memory_space<vmem>>, %arg8: memref<1x64x32xbf16, #tpu.memory_space<vmem>>, %arg9: memref<1x8x96xf32, #tpu.memory_space<vmem>>, %arg10: memref<32x32xbf16, #tpu.memory_space<vmem>>, %arg11: memref<32x32xbf16, #tpu.memory_space<vmem>>, %arg12: memref<32x128xbf16, #tpu.memory_space<vmem>>, %arg13: memref<1x2x32xf32, #tpu.memory_space<vmem>>, %arg14: memref<1x2x128xf32, #tpu.memory_space<vmem>>, %arg15: memref<16x32xf32, #tpu.memory_space<vmem>>) attributes {dimension_semantics = [#tpu.dimension_semantics<parallel>, #tpu.dimension_semantics<arbitrary>], iteration_bounds = array<i64: 2, 2>, scalar_prefetch = 0 : i64, scratch_operands = 1 : i64, tpu.core_type = #tpu.core_type<tc>, window_params = [{transform_indices = @transform_0, window_bounds = array<i64: 16, 32>}, {transform_indices = @transform_1, window_bounds = array<i64: 1, 2, 8>}, {pipeline_mode = #tpu.pipeline_mode<synchronous>, transform_indices = @transform_2, window_bounds = array<i64: 8, 128>}, {transform_indices = @transform_3, window_bounds = array<i64: 1, 32, 96>}, {transform_indices = @transform_4, window_bounds = array<i64: 1, 4, 8, 32>}, {transform_indices = @transform_5, window_bounds = array<i64: 1, 32, 64>}, {transform_indices = @transform_6, window_bounds = array<i64: 1, 64, 32>}, {transform_indices = @transform_7, window_bounds = array<i64: 1, 8, 96>}, {pipeline_mode = #tpu.pipeline_mode<synchronous>, transform_indices = @transform_8, window_bounds = array<i64: 32, 32>}, {pipeline_mode = #tpu.pipeline_mode<synchronous>, transform_indices = @transform_9, window_bounds = array<i64: 32, 32>}, {pipeline_mode = #tpu.pipeline_mode<synchronous>, transform_indices = @transform_10, window_bounds = array<i64: 32, 128>}, {transform_indices = @transform_11, window_bounds = array<i64: 1, 2, 32>}, {transform_indices = @transform_12, window_bounds = array<i64: 1, 2, 128>}]} {
    %c0 = arith.constant 0 : index
    %c0_0 = arith.constant 0 : index
    %0 = vector.load %arg4[%c0, %c0_0] : memref<8x128xf32, #tpu.memory_space<vmem>>, vector<8x128xf32>
    %1 = vector.extract_strided_slice %0 {offsets = [0, 0], sizes = [1, 32], strides = [1, 1]} : vector<8x128xf32> to vector<1x32xf32>
    %2 = vector.extract_strided_slice %0 {offsets = [1, 0], sizes = [1, 32], strides = [1, 1]} : vector<8x128xf32> to vector<1x32xf32>
    %c0_i32 = arith.constant 0 : i32
    %3 = arith.cmpi eq, %arg1, %c0_i32 : i32
    %4 = arith.extui %3 : i1 to i32
    %c0_i32_1 = arith.constant 0 : i32
    %5 = arith.cmpi ne, %4, %c0_i32_1 : i32
    scf.if %5 {
      %c0_56 = arith.constant 0 : index
      %c0_57 = arith.constant 0 : index
      %169 = vector.load %arg2[%c0_56, %c0_57] : memref<16x32xf32, #tpu.memory_space<vmem>>, vector<16x32xf32>
      %cst_58 = arith.constant dense<0.000000e+00> : vector<16xf32>
      %170 = vector.multi_reduction <add>, %169, %cst_58 [1] : vector<16x32xf32> to vector<16xf32>
      %171 = vector.shape_cast %170 : vector<16xf32> to vector<16x1xf32>
      %cst_59 = arith.constant 3.200000e+01 : f32
      %172 = vector.broadcast %cst_59 : f32 to vector<16x1xf32>
      %173 = arith.divf %171, %172 : vector<16x1xf32>
      %174 = vector.broadcast %173 : vector<16x1xf32> to vector<16x32xf32>
      %175 = arith.subf %169, %174 : vector<16x32xf32>
      %176 = arith.mulf %175, %175 : vector<16x32xf32>
      %cst_60 = arith.constant dense<0.000000e+00> : vector<16xf32>
      %177 = vector.multi_reduction <add>, %176, %cst_60 [1] : vector<16x32xf32> to vector<16xf32>
      %178 = vector.shape_cast %177 : vector<16xf32> to vector<16x1xf32>
      %cst_61 = arith.constant 3.200000e+01 : f32
      %179 = vector.broadcast %cst_61 : f32 to vector<16x1xf32>
      %180 = arith.divf %178, %179 : vector<16x1xf32>
      %181 = vector.broadcast %173 : vector<16x1xf32> to vector<16x32xf32>
      %182 = arith.subf %169, %181 : vector<16x32xf32>
      %cst_62 = arith.constant 9.99999996E-13 : f32
      %183 = vector.broadcast %cst_62 : f32 to vector<16x1xf32>
      %184 = arith.addf %180, %183 : vector<16x1xf32>
      %185 = math.rsqrt %184 : vector<16x1xf32>
      %186 = vector.broadcast %185 : vector<16x1xf32> to vector<16x32xf32>
      %187 = arith.mulf %182, %186 : vector<16x32xf32>
      %188 = vector.broadcast %1 : vector<1x32xf32> to vector<16x32xf32>
      %189 = arith.mulf %187, %188 : vector<16x32xf32>
      %190 = vector.broadcast %2 : vector<1x32xf32> to vector<16x32xf32>
      %191 = arith.addf %189, %190 : vector<16x32xf32>
      %c0_63 = arith.constant 0 : index
      %c0_64 = arith.constant 0 : index
      %192 = vector.load %arg15[%c0_63, %c0_64] : memref<16x32xf32, #tpu.memory_space<vmem>>, vector<16x32xf32>
      tpu.vector_store %arg15[%c0_63, %c0_64], %191 {strides = array<i32>} : memref<16x32xf32, #tpu.memory_space<vmem>>, vector<16x32xf32>,
    } else {
    }
    %c0_2 = arith.constant 0 : index
    %c0_3 = arith.constant 0 : index
    %c0_4 = arith.constant 0 : index
    %6 = vector.load %arg9[%c0_2, %c0_3, %c0_4] : memref<1x8x96xf32, #tpu.memory_space<vmem>>, vector<1x8x96xf32>
    %7 = vector.shape_cast %6 : vector<1x8x96xf32> to vector<8x96xf32>
    %8 = vector.extract_strided_slice %7 {offsets = [0, 0], sizes = [1, 96], strides = [1, 1]} : vector<8x96xf32> to vector<1x96xf32>
    %9 = vector.extract_strided_slice %7 {offsets = [1, 0], sizes = [1, 32], strides = [1, 1]} : vector<8x96xf32> to vector<1x32xf32>
    %10 = vector.extract_strided_slice %7 {offsets = [2, 0], sizes = [1, 32], strides = [1, 1]} : vector<8x96xf32> to vector<1x32xf32>
    %11 = vector.extract_strided_slice %7 {offsets = [3, 0], sizes = [1, 32], strides = [1, 1]} : vector<8x96xf32> to vector<1x32xf32>
    %12 = vector.extract_strided_slice %7 {offsets = [4, 0], sizes = [1, 64], strides = [1, 1]} : vector<8x96xf32> to vector<1x64xf32>
    %13 = vector.extract_strided_slice %7 {offsets = [5, 0], sizes = [1, 32], strides = [1, 1]} : vector<8x96xf32> to vector<1x32xf32>
    %14 = vector.extract_strided_slice %7 {offsets = [6, 0], sizes = [1, 32], strides = [1, 1]} : vector<8x96xf32> to vector<1x32xf32>
    %15 = vector.extract_strided_slice %7 {offsets = [7, 0], sizes = [1, 32], strides = [1, 1]} : vector<8x96xf32> to vector<1x32xf32>
    %c0_5 = arith.constant 0 : index
    %c0_6 = arith.constant 0 : index
    %16 = vector.load %arg15[%c0_5, %c0_6] : memref<16x32xf32, #tpu.memory_space<vmem>>, vector<16x32xf32>
    %17 = arith.truncf %16 : vector<16x32xf32> to vector<16x32xbf16>
    %c0_7 = arith.constant 0 : index
    %c0_8 = arith.constant 0 : index
    %c0_9 = arith.constant 0 : index
    %18 = vector.load %arg5[%c0_7, %c0_8, %c0_9] : memref<1x32x96xbf16, #tpu.memory_space<vmem>>, vector<1x32x96xbf16>
    %19 = vector.shape_cast %18 : vector<1x32x96xbf16> to vector<32x96xbf16>
    %cst = arith.constant dense<0.000000e+00> : vector<16x96xf32>
    %20 = tpu.matmul %17, %19, %cst {dimension_numbers = #tpu.dot_dimension_numbers<[1], [0], [0], [1], [0, 0, 1, 1], [], []>} : vector<16x32xbf16>, vector<32x96xbf16>, vector<16x96xf32> -> vector<16x96xf32>
    %21 = vector.broadcast %8 : vector<1x96xf32> to vector<16x96xf32>
    %22 = arith.addf %20, %21 : vector<16x96xf32>
    %23 = arith.truncf %22 : vector<16x96xf32> to vector<16x96xbf16>
    %24 = vector.extract_strided_slice %23 {offsets = [0, 0], sizes = [16, 24], strides = [1, 1]} : vector<16x96xbf16> to vector<16x24xbf16>
    %25 = vector.extract_strided_slice %23 {offsets = [0, 24], sizes = [16, 24], strides = [1, 1]} : vector<16x96xbf16> to vector<16x24xbf16>
    %26 = vector.extract_strided_slice %23 {offsets = [0, 48], sizes = [16, 24], strides = [1, 1]} : vector<16x96xbf16> to vector<16x24xbf16>
    %27 = vector.extract_strided_slice %23 {offsets = [0, 72], sizes = [16, 24], strides = [1, 1]} : vector<16x96xbf16> to vector<16x24xbf16>
    %28 = vector.shape_cast %24 : vector<16x24xbf16> to vector<1x16x24xbf16>
    %29 = vector.shape_cast %25 : vector<16x24xbf16> to vector<1x16x24xbf16>
    %30 = vector.shape_cast %26 : vector<16x24xbf16> to vector<1x16x24xbf16>
    %31 = vector.shape_cast %27 : vector<16x24xbf16> to vector<1x16x24xbf16>
    %32 = tpu.concatenate %28, %29, %30, %31 in 0 : vector<1x16x24xbf16>, vector<1x16x24xbf16>, vector<1x16x24xbf16>, vector<1x16x24xbf16> -> vector<4x16x24xbf16>
    %33 = vector.extract_strided_slice %32 {offsets = [0, 0, 0], sizes = [4, 16, 8], strides = [1, 1, 1]} : vector<4x16x24xbf16> to vector<4x16x8xbf16>
    %34 = vector.extract_strided_slice %32 {offsets = [0, 0, 8], sizes = [4, 16, 8], strides = [1, 1, 1]} : vector<4x16x24xbf16> to vector<4x16x8xbf16>
    %35 = vector.extract_strided_slice %32 {offsets = [0, 0, 16], sizes = [4, 16, 8], strides = [1, 1, 1]} : vector<4x16x24xbf16> to vector<4x16x8xbf16>
    %c0_10 = arith.constant 0 : index
    %c0_11 = arith.constant 0 : index
    %c0_12 = arith.constant 0 : index
    %36 = vector.load %arg3[%c0_10, %c0_11, %c0_12] : memref<1x2x8xf32, #tpu.memory_space<vmem>>, vector<1x2x8xf32>
    %37 = vector.shape_cast %36 : vector<1x2x8xf32> to vector<2x8xf32>
    %cst_13 = arith.constant 1.000000e+00 : f32
    %38 = vector.broadcast %cst_13 : f32 to vector<2x8xf32>
    %39 = arith.subf %38, %37 : vector<2x8xf32>
    %cst_14 = arith.constant -1.000000e+09 : f32
    %40 = vector.broadcast %cst_14 : f32 to vector<2x8xf32>
    %41 = arith.mulf %39, %40 : vector<2x8xf32>
    %42 = vector.extract_strided_slice %33 {offsets = [0, 0, 0], sizes = [4, 8, 8], strides = [1, 1, 1]} : vector<4x16x8xbf16> to vector<4x8x8xbf16>
    %43 = vector.extract_strided_slice %34 {offsets = [0, 0, 0], sizes = [4, 8, 8], strides = [1, 1, 1]} : vector<4x16x8xbf16> to vector<4x8x8xbf16>
    %44 = vector.extract_strided_slice %35 {offsets = [0, 0, 0], sizes = [4, 8, 8], strides = [1, 1, 1]} : vector<4x16x8xbf16> to vector<4x8x8xbf16>
    "tpu.trace_start"() <{level = 10 : i32, message = "hqd,hkd->hqk"}> : () -> ()
    %cst_15 = arith.constant dense<0.000000e+00> : vector<4x8x8xf32>
    %45 = tpu.matmul %42, %43, %cst_15 {dimension_numbers = #tpu.dot_dimension_numbers<[2], [2], [1], [1], [0, 0, 0, 1, 1, 1], [0], [0]>} : vector<4x8x8xbf16>, vector<4x8x8xbf16>, vector<4x8x8xf32> -> vector<4x8x8xf32>
    "tpu.trace_stop"() : () -> ()
    %cst_16 = arith.constant 0.353553385 : f32
    %46 = vector.broadcast %cst_16 : f32 to vector<4x8x8xf32>
    %47 = arith.mulf %45, %46 : vector<4x8x8xf32>
    %48 = vector.extract_strided_slice %41 {offsets = [0, 0], sizes = [1, 8], strides = [1, 1]} : vector<2x8xf32> to vector<1x8xf32>
    %49 = vector.shape_cast %48 : vector<1x8xf32> to vector<1x1x8xf32>
    %50 = vector.broadcast %49 : vector<1x1x8xf32> to vector<4x8x8xf32>
    %51 = arith.addf %47, %50 : vector<4x8x8xf32>
    %cst_17 = arith.constant dense<0xFF800000> : vector<4x8xf32>
    %52 = vector.multi_reduction <maximumf>, %51, %cst_17 [2] : vector<4x8x8xf32> to vector<4x8xf32>
    %53 = vector.shape_cast %52 : vector<4x8xf32> to vector<4x8x1xf32>
    %54 = vector.broadcast %53 : vector<4x8x1xf32> to vector<4x8x8xf32>
    %55 = arith.subf %51, %54 : vector<4x8x8xf32>
    %56 = math.exp %55 : vector<4x8x8xf32>
    %cst_18 = arith.constant dense<0.000000e+00> : vector<4x8xf32>
    %57 = vector.multi_reduction <add>, %56, %cst_18 [2] : vector<4x8x8xf32> to vector<4x8xf32>
    %58 = vector.shape_cast %57 : vector<4x8xf32> to vector<4x8x1xf32>
    %59 = tpu.reciprocal %58 {approx = true} : vector<4x8x1xf32> -> vector<4x8x1xf32>
    %60 = vector.broadcast %59 : vector<4x8x1xf32> to vector<4x8x8xf32>
    %61 = arith.mulf %56, %60 : vector<4x8x8xf32>
    %62 = arith.truncf %61 : vector<4x8x8xf32> to vector<4x8x8xbf16>
    "tpu.trace_start"() <{level = 10 : i32, message = "hqk,hkd->hqd"}> : () -> ()
    %cst_19 = arith.constant dense<0.000000e+00> : vector<4x8x8xf32>
    %63 = tpu.matmul %62, %44, %cst_19 {dimension_numbers = #tpu.dot_dimension_numbers<[2], [1], [1], [2], [0, 0, 0, 1, 1, 2], [0], [0]>} : vector<4x8x8xbf16>, vector<4x8x8xbf16>, vector<4x8x8xf32> -> vector<4x8x8xf32>
    "tpu.trace_stop"() : () -> ()
    %64 = vector.extract_strided_slice %33 {offsets = [0, 8, 0], sizes = [4, 8, 8], strides = [1, 1, 1]} : vector<4x16x8xbf16> to vector<4x8x8xbf16>
    %65 = vector.extract_strided_slice %34 {offsets = [0, 8, 0], sizes = [4, 8, 8], strides = [1, 1, 1]} : vector<4x16x8xbf16> to vector<4x8x8xbf16>
    %66 = vector.extract_strided_slice %35 {offsets = [0, 8, 0], sizes = [4, 8, 8], strides = [1, 1, 1]} : vector<4x16x8xbf16> to vector<4x8x8xbf16>
    "tpu.trace_start"() <{level = 10 : i32, message = "hqd,hkd->hqk"}> : () -> ()
    %cst_20 = arith.constant dense<0.000000e+00> : vector<4x8x8xf32>
    %67 = tpu.matmul %64, %65, %cst_20 {dimension_numbers = #tpu.dot_dimension_numbers<[2], [2], [1], [1], [0, 0, 0, 1, 1, 1], [0], [0]>} : vector<4x8x8xbf16>, vector<4x8x8xbf16>, vector<4x8x8xf32> -> vector<4x8x8xf32>
    "tpu.trace_stop"() : () -> ()
    %cst_21 = arith.constant 0.353553385 : f32
    %68 = vector.broadcast %cst_21 : f32 to vector<4x8x8xf32>
    %69 = arith.mulf %67, %68 : vector<4x8x8xf32>
    %70 = vector.extract_strided_slice %41 {offsets = [1, 0], sizes = [1, 8], strides = [1, 1]} : vector<2x8xf32> to vector<1x8xf32>
    %71 = vector.shape_cast %70 : vector<1x8xf32> to vector<1x1x8xf32>
    %72 = vector.broadcast %71 : vector<1x1x8xf32> to vector<4x8x8xf32>
    %73 = arith.addf %69, %72 : vector<4x8x8xf32>
    %cst_22 = arith.constant dense<0xFF800000> : vector<4x8xf32>
    %74 = vector.multi_reduction <maximumf>, %73, %cst_22 [2] : vector<4x8x8xf32> to vector<4x8xf32>
    %75 = vector.shape_cast %74 : vector<4x8xf32> to vector<4x8x1xf32>
    %76 = vector.broadcast %75 : vector<4x8x1xf32> to vector<4x8x8xf32>
    %77 = arith.subf %73, %76 : vector<4x8x8xf32>
    %78 = math.exp %77 : vector<4x8x8xf32>
    %cst_23 = arith.constant dense<0.000000e+00> : vector<4x8xf32>
    %79 = vector.multi_reduction <add>, %78, %cst_23 [2] : vector<4x8x8xf32> to vector<4x8xf32>
    %80 = vector.shape_cast %79 : vector<4x8xf32> to vector<4x8x1xf32>
    %81 = tpu.reciprocal %80 {approx = true} : vector<4x8x1xf32> -> vector<4x8x1xf32>
    %82 = vector.broadcast %81 : vector<4x8x1xf32> to vector<4x8x8xf32>
    %83 = arith.mulf %78, %82 : vector<4x8x8xf32>
    %84 = arith.truncf %83 : vector<4x8x8xf32> to vector<4x8x8xbf16>
    "tpu.trace_start"() <{level = 10 : i32, message = "hqk,hkd->hqd"}> : () -> ()
    %cst_24 = arith.constant dense<0.000000e+00> : vector<4x8x8xf32>
    %85 = tpu.matmul %84, %66, %cst_24 {dimension_numbers = #tpu.dot_dimension_numbers<[2], [1], [1], [2], [0, 0, 0, 1, 1, 2], [0], [0]>} : vector<4x8x8xbf16>, vector<4x8x8xbf16>, vector<4x8x8xf32> -> vector<4x8x8xf32>
    "tpu.trace_stop"() : () -> ()
    %86 = tpu.concatenate %63, %85 in 1 : vector<4x8x8xf32>, vector<4x8x8xf32> -> vector<4x16x8xf32>
    %87 = arith.truncf %86 : vector<4x16x8xf32> to vector<4x16x8xbf16>
    %c0_25 = arith.constant 0 : index
    %c0_26 = arith.constant 0 : index
    %c0_27 = arith.constant 0 : index
    %c0_28 = arith.constant 0 : index
    %88 = vector.load %arg6[%c0_25, %c0_26, %c0_27, %c0_28] : memref<1x4x8x32xbf16, #tpu.memory_space<vmem>>, vector<1x4x8x32xbf16>
    %89 = vector.shape_cast %88 : vector<1x4x8x32xbf16> to vector<4x8x32xbf16>
    "tpu.trace_start"() <{level = 10 : i32, message = "htd,hdD->htD"}> : () -> ()
    %cst_29 = arith.constant dense<0.000000e+00> : vector<4x16x32xf32>
    %90 = tpu.matmul %87, %89, %cst_29 {dimension_numbers = #tpu.dot_dimension_numbers<[2], [1], [1], [2], [0, 0, 0, 1, 1, 2], [0], [0]>} : vector<4x16x8xbf16>, vector<4x8x32xbf16>, vector<4x16x32xf32> -> vector<4x16x32xf32>
    "tpu.trace_stop"() : () -> ()
    %cst_30 = arith.constant dense<0.000000e+00> : vector<16x32xf32>
    %91 = vector.multi_reduction <add>, %90, %cst_30 [0] : vector<4x16x32xf32> to vector<16x32xf32>
    %92 = vector.broadcast %9 : vector<1x32xf32> to vector<16x32xf32>
    %93 = arith.addf %91, %92 : vector<16x32xf32>
    %94 = arith.addf %16, %93 : vector<16x32xf32>
    %cst_31 = arith.constant dense<0.000000e+00> : vector<16xf32>
    %95 = vector.multi_reduction <add>, %94, %cst_31 [1] : vector<16x32xf32> to vector<16xf32>
    %96 = vector.shape_cast %95 : vector<16xf32> to vector<16x1xf32>
    %cst_32 = arith.constant 3.200000e+01 : f32
    %97 = vector.broadcast %cst_32 : f32 to vector<16x1xf32>
    %98 = arith.divf %96, %97 : vector<16x1xf32>
    %99 = vector.broadcast %98 : vector<16x1xf32> to vector<16x32xf32>
    %100 = arith.subf %94, %99 : vector<16x32xf32>
    %101 = arith.mulf %100, %100 : vector<16x32xf32>
    %cst_33 = arith.constant dense<0.000000e+00> : vector<16xf32>
    %102 = vector.multi_reduction <add>, %101, %cst_33 [1] : vector<16x32xf32> to vector<16xf32>
    %103 = vector.shape_cast %102 : vector<16xf32> to vector<16x1xf32>
    %cst_34 = arith.constant 3.200000e+01 : f32
    %104 = vector.broadcast %cst_34 : f32 to vector<16x1xf32>
    %105 = arith.divf %103, %104 : vector<16x1xf32>
    %106 = vector.broadcast %98 : vector<16x1xf32> to vector<16x32xf32>
    %107 = arith.subf %94, %106 : vector<16x32xf32>
    %cst_35 = arith.constant 9.99999996E-13 : f32
    %108 = vector.broadcast %cst_35 : f32 to vector<16x1xf32>
    %109 = arith.addf %105, %108 : vector<16x1xf32>
    %110 = math.rsqrt %109 : vector<16x1xf32>
    %111 = vector.broadcast %110 : vector<16x1xf32> to vector<16x32xf32>
    %112 = arith.mulf %107, %111 : vector<16x32xf32>
    %113 = vector.broadcast %10 : vector<1x32xf32> to vector<16x32xf32>
    %114 = arith.mulf %112, %113 : vector<16x32xf32>
    %115 = vector.broadcast %11 : vector<1x32xf32> to vector<16x32xf32>
    %116 = arith.addf %114, %115 : vector<16x32xf32>
    %117 = arith.truncf %116 : vector<16x32xf32> to vector<16x32xbf16>
    %c0_36 = arith.constant 0 : index
    %c0_37 = arith.constant 0 : index
    %c0_38 = arith.constant 0 : index
    %118 = vector.load %arg7[%c0_36, %c0_37, %c0_38] : memref<1x32x64xbf16, #tpu.memory_space<vmem>>, vector<1x32x64xbf16>
    %119 = vector.shape_cast %118 : vector<1x32x64xbf16> to vector<32x64xbf16>
    %cst_39 = arith.constant dense<0.000000e+00> : vector<16x64xf32>
    %120 = tpu.matmul %117, %119, %cst_39 {dimension_numbers = #tpu.dot_dimension_numbers<[1], [0], [0], [1], [0, 0, 1, 1], [], []>} : vector<16x32xbf16>, vector<32x64xbf16>, vector<16x64xf32> -> vector<16x64xf32>
    %121 = vector.broadcast %12 : vector<1x64xf32> to vector<16x64xf32>
    %122 = arith.addf %120, %121 : vector<16x64xf32>
    %123 = arith.mulf %122, %122 : vector<16x64xf32>
    %124 = arith.mulf %122, %123 : vector<16x64xf32>
    %cst_40 = arith.constant 4.471500e-02 : f32
    %125 = vector.broadcast %cst_40 : f32 to vector<16x64xf32>
    %126 = arith.mulf %125, %124 : vector<16x64xf32>
    %127 = arith.addf %122, %126 : vector<16x64xf32>
    %cst_41 = arith.constant 0.797884583 : f32
    %128 = vector.broadcast %cst_41 : f32 to vector<16x64xf32>
    %129 = arith.mulf %128, %127 : vector<16x64xf32>
    %130 = math.tanh %129 : vector<16x64xf32>
    %cst_42 = arith.constant 1.000000e+00 : f32
    %131 = vector.broadcast %cst_42 : f32 to vector<16x64xf32>
    %132 = arith.addf %131, %130 : vector<16x64xf32>
    %cst_43 = arith.constant 5.000000e-01 : f32
    %133 = vector.broadcast %cst_43 : f32 to vector<16x64xf32>
    %134 = arith.mulf %133, %132 : vector<16x64xf32>
    %135 = arith.mulf %122, %134 : vector<16x64xf32>
    %136 = arith.truncf %135 : vector<16x64xf32> to vector<16x64xbf16>
    %c0_44 = arith.constant 0 : index
    %c0_45 = arith.constant 0 : index
    %c0_46 = arith.constant 0 : index
    %137 = vector.load %arg8[%c0_44, %c0_45, %c0_46] : memref<1x64x32xbf16, #tpu.memory_space<vmem>>, vector<1x64x32xbf16>
    %138 = vector.shape_cast %137 : vector<1x64x32xbf16> to vector<64x32xbf16>
    %cst_47 = arith.constant dense<0.000000e+00> : vector<16x32xf32>
    %139 = tpu.matmul %136, %138, %cst_47 {dimension_numbers = #tpu.dot_dimension_numbers<[1], [0], [0], [1], [0, 0, 1, 1], [], []>} : vector<16x64xbf16>, vector<64x32xbf16>, vector<16x32xf32> -> vector<16x32xf32>
    %140 = vector.broadcast %13 : vector<1x32xf32> to vector<16x32xf32>
    %141 = arith.addf %139, %140 : vector<16x32xf32>
    %142 = arith.addf %116, %141 : vector<16x32xf32>
    %cst_48 = arith.constant dense<0.000000e+00> : vector<16xf32>
    %143 = vector.multi_reduction <add>, %142, %cst_48 [1] : vector<16x32xf32> to vector<16xf32>
    %144 = vector.shape_cast %143 : vector<16xf32> to vector<16x1xf32>
    %cst_49 = arith.constant 3.200000e+01 : f32
    %145 = vector.broadcast %cst_49 : f32 to vector<16x1xf32>
    %146 = arith.divf %144, %145 : vector<16x1xf32>
    %147 = vector.broadcast %146 : vector<16x1xf32> to vector<16x32xf32>
    %148 = arith.subf %142, %147 : vector<16x32xf32>
    %149 = arith.mulf %148, %148 : vector<16x32xf32>
    %cst_50 = arith.constant dense<0.000000e+00> : vector<16xf32>
    %150 = vector.multi_reduction <add>, %149, %cst_50 [1] : vector<16x32xf32> to vector<16xf32>
    %151 = vector.shape_cast %150 : vector<16xf32> to vector<16x1xf32>
    %cst_51 = arith.constant 3.200000e+01 : f32
    %152 = vector.broadcast %cst_51 : f32 to vector<16x1xf32>
    %153 = arith.divf %151, %152 : vector<16x1xf32>
    %154 = vector.broadcast %146 : vector<16x1xf32> to vector<16x32xf32>
    %155 = arith.subf %142, %154 : vector<16x32xf32>
    %cst_52 = arith.constant 9.99999996E-13 : f32
    %156 = vector.broadcast %cst_52 : f32 to vector<16x1xf32>
    %157 = arith.addf %153, %156 : vector<16x1xf32>
    %158 = math.rsqrt %157 : vector<16x1xf32>
    %159 = vector.broadcast %158 : vector<16x1xf32> to vector<16x32xf32>
    %160 = arith.mulf %155, %159 : vector<16x32xf32>
    %161 = vector.broadcast %14 : vector<1x32xf32> to vector<16x32xf32>
    %162 = arith.mulf %160, %161 : vector<16x32xf32>
    %163 = vector.broadcast %15 : vector<1x32xf32> to vector<16x32xf32>
    %164 = arith.addf %162, %163 : vector<16x32xf32>
    %c0_53 = arith.constant 0 : index
    %c0_54 = arith.constant 0 : index
    %165 = vector.load %arg15[%c0_53, %c0_54] : memref<16x32xf32, #tpu.memory_space<vmem>>, vector<16x32xf32>
    tpu.vector_store %arg15[%c0_53, %c0_54], %164 {strides = array<i32>} : memref<16x32xf32, #tpu.memory_space<vmem>>, vector<16x32xf32>,
    %c1_i32 = arith.constant 1 : i32
    %166 = arith.cmpi eq, %arg1, %c1_i32 : i32
    %167 = arith.extui %166 : i1 to i32
    %c0_i32_55 = arith.constant 0 : i32
    %168 = arith.cmpi ne, %167, %c0_i32_55 : i32
    scf.if %168 {
      %169 = vector.extract_strided_slice %0 {offsets = [2, 0], sizes = [1, 32], strides = [1, 1]} : vector<8x128xf32> to vector<1x32xf32>
      %170 = vector.extract_strided_slice %0 {offsets = [3, 0], sizes = [1, 32], strides = [1, 1]} : vector<8x128xf32> to vector<1x32xf32>
      %171 = vector.extract_strided_slice %0 {offsets = [4, 0], sizes = [1, 128], strides = [1, 1]} : vector<8x128xf32> to vector<1x128xf32>
      %172 = vector.extract_strided_slice %164 {offsets = [0, 0], sizes = [1, 32], strides = [1, 1]} : vector<16x32xf32> to vector<1x32xf32>
      %173 = vector.extract_strided_slice %164 {offsets = [8, 0], sizes = [1, 32], strides = [1, 1]} : vector<16x32xf32> to vector<1x32xf32>
      %174 = tpu.concatenate %172, %173 in 0 : vector<1x32xf32>, vector<1x32xf32> -> vector<2x32xf32>
      %175 = arith.truncf %174 : vector<2x32xf32> to vector<2x32xbf16>
      %c0_56 = arith.constant 0 : index
      %c0_57 = arith.constant 0 : index
      %176 = vector.load %arg10[%c0_56, %c0_57] : memref<32x32xbf16, #tpu.memory_space<vmem>>, vector<32x32xbf16>
      %cst_58 = arith.constant dense<0.000000e+00> : vector<2x32xf32>
      %177 = tpu.matmul %175, %176, %cst_58 {dimension_numbers = #tpu.dot_dimension_numbers<[1], [0], [0], [1], [0, 0, 1, 1], [], []>} : vector<2x32xbf16>, vector<32x32xbf16>, vector<2x32xf32> -> vector<2x32xf32>
      %178 = vector.broadcast %169 : vector<1x32xf32> to vector<2x32xf32>
      %179 = arith.addf %177, %178 : vector<2x32xf32>
      %180 = math.tanh %179 : vector<2x32xf32>
      %c0_59 = arith.constant 0 : index
      %c0_60 = arith.constant 0 : index
      %c0_61 = arith.constant 0 : index
      %181 = vector.load %arg13[%c0_59, %c0_60, %c0_61] : memref<1x2x32xf32, #tpu.memory_space<vmem>>, vector<1x2x32xf32>
      %182 = vector.shape_cast %181 : vector<1x2x32xf32> to vector<2x32xf32>
      %183 = vector.shape_cast %180 : vector<2x32xf32> to vector<1x2x32xf32>
      tpu.vector_store %arg13[%c0_59, %c0_60, %c0_61], %183 {strides = array<i32>} : memref<1x2x32xf32, #tpu.memory_space<vmem>>, vector<1x2x32xf32>,
      %184 = arith.truncf %180 : vector<2x32xf32> to vector<2x32xbf16>
      %c0_62 = arith.constant 0 : index
      %c0_63 = arith.constant 0 : index
      %185 = vector.load %arg11[%c0_62, %c0_63] : memref<32x32xbf16, #tpu.memory_space<vmem>>, vector<32x32xbf16>
      %cst_64 = arith.constant dense<0.000000e+00> : vector<2x32xf32>
      %186 = tpu.matmul %184, %185, %cst_64 {dimension_numbers = #tpu.dot_dimension_numbers<[1], [0], [0], [1], [0, 0, 1, 1], [], []>} : vector<2x32xbf16>, vector<32x32xbf16>, vector<2x32xf32> -> vector<2x32xf32>
      %187 = vector.broadcast %170 : vector<1x32xf32> to vector<2x32xf32>
      %188 = arith.addf %186, %187 : vector<2x32xf32>
      %cst_65 = arith.constant 0.000000e+00 : f32
      %189 = vector.broadcast %cst_65 : f32 to vector<2x32xf32>
      %190 = arith.maximumf %188, %189 : vector<2x32xf32>
      %191 = arith.truncf %190 : vector<2x32xf32> to vector<2x32xbf16>
      %c0_66 = arith.constant 0 : index
      %c0_67 = arith.constant 0 : index
      %192 = vector.load %arg12[%c0_66, %c0_67] : memref<32x128xbf16, #tpu.memory_space<vmem>>, vector<32x128xbf16>
      %cst_68 = arith.constant dense<0.000000e+00> : vector<2x128xf32>
      %193 = tpu.matmul %191, %192, %cst_68 {dimension_numbers = #tpu.dot_dimension_numbers<[1], [0], [0], [1], [0, 0, 1, 1], [], []>} : vector<2x32xbf16>, vector<32x128xbf16>, vector<2x128xf32> -> vector<2x128xf32>
      %194 = vector.broadcast %171 : vector<1x128xf32> to vector<2x128xf32>
      %195 = arith.addf %193, %194 : vector<2x128xf32>
      %c0_69 = arith.constant 0 : index
      %c0_70 = arith.constant 0 : index
      %c0_71 = arith.constant 0 : index
      %196 = vector.load %arg14[%c0_69, %c0_70, %c0_71] : memref<1x2x128xf32, #tpu.memory_space<vmem>>, vector<1x2x128xf32>
      %197 = vector.shape_cast %196 : vector<1x2x128xf32> to vector<2x128xf32>
      %198 = vector.shape_cast %195 : vector<2x128xf32> to vector<1x2x128xf32>
      tpu.vector_store %arg14[%c0_69, %c0_70, %c0_71], %198 {strides = array<i32>} : memref<1x2x128xf32, #tpu.memory_space<vmem>>, vector<1x2x128xf32>,
    } else {
    }
    return
  }
  func.func @transform_0(%arg0: i32, %arg1: i32) -> (i32, i32) {
    %c0_i32 = arith.constant 0 : i32
    %c0_i32_0 = arith.constant 0 : i32
    return %arg0, %c0_i32 : i32, i32
  }
  func.func @transform_1(%arg0: i32, %arg1: i32) -> (i32, i32, i32) {
    %c0_i32 = arith.constant 0 : i32
    %c0_i32_0 = arith.constant 0 : i32
    %c0_i32_1 = arith.constant 0 : i32
    return %arg0, %c0_i32, %c0_i32_0 : i32, i32, i32
  }
  func.func @transform_2(%arg0: i32, %arg1: i32) -> (i32, i32) {
    %c0_i32 = arith.constant 0 : i32
    %c0_i32_0 = arith.constant 0 : i32
    %c0_i32_1 = arith.constant 0 : i32
    return %c0_i32, %c0_i32_0 : i32, i32
  }
  func.func @transform_3(%arg0: i32, %arg1: i32) -> (i32, i32, i32) {
    %c0_i32 = arith.constant 0 : i32
    %c0_i32_0 = arith.constant 0 : i32
    %c0_i32_1 = arith.constant 0 : i32
    return %arg1, %c0_i32, %c0_i32_0 : i32, i32, i32
  }
  func.func @transform_4(%arg0: i32, %arg1: i32) -> (i32, i32, i32, i32) {
    %c0_i32 = arith.constant 0 : i32
    %c0_i32_0 = arith.constant 0 : i32
    %c0_i32_1 = arith.constant 0 : i32
    %c0_i32_2 = arith.constant 0 : i32
    return %arg1, %c0_i32, %c0_i32_0, %c0_i32_1 : i32, i32, i32, i32
  }
  func.func @transform_5(%arg0: i32, %arg1: i32) -> (i32, i32, i32) {
    %c0_i32 = arith.constant 0 : i32
    %c0_i32_0 = arith.constant 0 : i32
    %c0_i32_1 = arith.constant 0 : i32
    return %arg1, %c0_i32, %c0_i32_0 : i32, i32, i32
  }
  func.func @transform_6(%arg0: i32, %arg1: i32) -> (i32, i32, i32) {
    %c0_i32 = arith.constant 0 : i32
    %c0_i32_0 = arith.constant 0 : i32
    %c0_i32_1 = arith.constant 0 : i32
    return %arg1, %c0_i32, %c0_i32_0 : i32, i32, i32
  }
  func.func @transform_7(%arg0: i32, %arg1: i32) -> (i32, i32, i32) {
    %c0_i32 = arith.constant 0 : i32
    %c0_i32_0 = arith.constant 0 : i32
    %c0_i32_1 = arith.constant 0 : i32
    return %arg1, %c0_i32, %c0_i32_0 : i32, i32, i32
  }
  func.func @transform_8(%arg0: i32, %arg1: i32) -> (i32, i32) {
    %c0_i32 = arith.constant 0 : i32
    %c0_i32_0 = arith.constant 0 : i32
    %c0_i32_1 = arith.constant 0 : i32
    return %c0_i32, %c0_i32_0 : i32, i32
  }
  func.func @transform_9(%arg0: i32, %arg1: i32) -> (i32, i32) {
    %c0_i32 = arith.constant 0 : i32
    %c0_i32_0 = arith.constant 0 : i32
    %c0_i32_1 = arith.constant 0 : i32
    return %c0_i32, %c0_i32_0 : i32, i32
  }
  func.func @transform_10(%arg0: i32, %arg1: i32) -> (i32, i32) {
    %c0_i32 = arith.constant 0 : i32
    %c0_i32_0 = arith.constant 0 : i32
    %c0_i32_1 = arith.constant 0 : i32
    return %c0_i32, %c0_i32_0 : i32, i32
  }
  func.func @transform_11(%arg0: i32, %arg1: i32) -> (i32, i32, i32) {
    %c0_i32 = arith.constant 0 : i32
    %c0_i32_0 = arith.constant 0 : i32
    %c0_i32_1 = arith.constant 0 : i32
    return %arg0, %c0_i32, %c0_i32_0 : i32, i32, i32
  }
  func.func @transform_12(%arg0: i32, %arg1: i32) -> (i32, i32, i32) {
    %c0_i32 = arith.constant 0 : i32
    %c0_i32_0 = arith.constant 0 : i32
    %c0_i32_1 = arith.constant 0 : i32
    return %arg0, %c0_i32, %c0_i32_0 : i32, i32, i32
  }
}

</mosaic_0001>

<bundles_post_ra>
// kernel: tpu_custom_call.1
= control target key start
LH: loop header
LB: loop body
LE: loop exit
PB: predicated region body
PF: predicated region fallthrough
CT: control target
= control target key end

     0   :  { %s3391_s0 = inlined_call_operand.vmem [shape: f32[32,32], index: 0, kind: input, shape index: {}]   ;;  %s3392_s1 = inlined_call_operand.hbm [shape: f32[2,2,8], index: 1, kind: input, shape index: {}]   ;;  %s3393_s2 = inlined_call_operand.hbm [shape: f32[8,128], index: 2, kind: input, shape index: {}]   ;;  %s3394_s3 = inlined_call_operand.vmem [shape: bf16[2,32,96], index: 3, kind: input, shape index: {}]   ;;  %s3395_s4 = inlined_call_operand.vmem [shape: bf16[2,4,8,32], index: 4, kind: input, shape index: {}]   ;;  %s3396_s5 = inlined_call_operand.hbm [shape: bf16[2,32,64], index: 5, kind: input, shape index: {}]   ;;  %s3397_s6 = inlined_call_operand.vmem [shape: bf16[2,64,32], index: 6, kind: input, shape index: {}]   ;;  %s3398_s7 = inlined_call_operand.hbm [shape: f32[2,8,96], index: 7, kind: input, shape index: {}]   ;;  %s3399_s8 = inlined_call_operand.hbm [shape: bf16[32,32], index: 8, kind: input, shape index: {}]   ;;  %s3400_s9 = inlined_call_operand.hbm [shape: bf16[32,32], index: 9, kind: input, shape index: {}]   ;;  %s3401_s10 = inlined_call_operand.hbm [shape: bf16[32,128], index: 10, kind: input, shape index: {}]   ;;  %s3402_s11 = inlined_call_operand.hbm [shape: f32[2,2,32], index: 11, kind: output, shape index: {0}]   ;;  %s3403_s12 = inlined_call_operand.hbm [shape: f32[2,2,128], index: 12, kind: output, shape index: {1}]  }
   0x1   :  { %3421 = sst [smem:[#allocation38_spill]] %s3391_s0 }
   0x2   :  { %3422 = sst [smem:[#allocation39_spill]] %s3392_s1 }
   0x3   :  { %3423 = sst [smem:[#allocation40_spill]] %s3393_s2 }
   0x4   :  { %3424 = sst [smem:[#allocation41_spill]] %s3394_s3 }
   0x5   :  { %3425 = sst [smem:[#allocation42_spill]] %s3395_s4 }
   0x6   :  { %3426 = sst [smem:[#allocation43_spill]] %s3396_s5 }
   0x7   :  { %3427 = sst [smem:[#allocation44_spill]] %s3397_s6 }
   0x8   :  { %3428 = sst [smem:[#allocation45_spill]] %s3398_s7 }
   0x9   :  { %3429 = sst [smem:[#allocation46_spill]] %s3400_s9 }
   0xa   :  { %3430 = sst [smem:[#allocation47_spill]] %s3402_s11 }
   0xb   :  { %3431 = sst [smem:[#allocation48_spill]] %s3403_s12 }
   0xc   :  { %18 = vsyncpa [#allocation4], 0 }
   0xd   :  { %20 = vsyncpa [#allocation4 + $0x1], 0 }
   0xe   :  { %21 = vsyncpa [#allocation7], 0 }
   0xf   :  { %22 = vsyncpa [#allocation12], 0 }
  0x10   :  { %23 = vsyncpa [#allocation5], 0 }
  0x11   :  { %25 = vsyncpa [#allocation5 + $0x1], 0 }
  0x12   :  { %26 = vsyncpa [#allocation16], 0 }
  0x13   :  { %28 = vsyncpa [#allocation16 + $0x1], 0  ;;  %s2829_s21 = smov 0   ;;  %s2831_s22 = smov 0  }
  0x14   :  { %s2833_s23 = smov 0   ;;  %s2835_s24 = smov 0  }
  0x15   :  { %s2837_s25 = smov 0   ;;  %s2839_s26 = smov 0  }
  0x16   :  { %s2841_s27 = smov 0   ;;  %s2843_s28 = smov 0  }
  0x17   :  { %s2845_s29 = smov 0   ;;  %s2847_s30 = smov 0  }
  0x18   :  { %s2849_s13 = smov 0  }
  0x19 LB: > { %3432 = sst [smem:[#allocation24_spill]] %s2717_s23  ;;  %s2885_s14 = sadd.s32 4294967295, %s2749_s13   ;;  %s2749_s13 = sphi %s2849_s13, %s34_s13   ;;  %s2745_s30 = sphi %s2847_s30, %s3487_s30   ;;  %s2741_s29 = sphi %s2845_s29, %s3493_s29   ;;  %s2737_s28 = sphi %s2843_s28, %s3485_s28   ;;  %s2733_s27 = sphi %s2841_s27, %s3492_s27   ;;  %s2729_s26 = sphi %s2839_s26, %s3484_s26   ;;  %s2725_s25 = sphi %s2837_s25, %s3491_s25   ;;  %s2721_s24 = sphi %s2835_s24, %s3490_s24   ;;  %s2717_s23 = sphi %s2833_s23, %s3482_s23   ;;  %s2713_s22 = sphi %s2831_s22, %s3489_s22   ;;  %s2709_s21 = sphi %s2829_s21, %s3488_s21  }
  0x1a   : > { %3433 = sst [smem:[#allocation25_spill]] %s2721_s24  ;;  %s2008_s15 = sadd.s32 4294967294, %s2749_s13  }
  0x1b   : > { %3434 = sst [smem:[#allocation26_spill]] %s2729_s26  ;;  %s43_s16 = sadd.s32 1, %s2741_s29 }
  0x1c   : > { %3435 = sst [smem:[#allocation27_spill]] %s2733_s27  ;;  %s46_s17 = sadd.s32 1, %s2745_s30 }
  0x1d   : > { %3436 = sst [smem:[#allocation28_spill]] %s2737_s28  ;;  %p44_p0 = scmp.ge.s32.totalorder %s43_s16, 2 }
  0x1e   : > { %3437 = sst [smem:[#allocation29_spill]] %s2745_s30  ;;  %s79_s18 = sadd.s32 1, %s2729_s26 }
  0x1f   : > { %3438 = sst [smem:[#allocation30_spill]] %s2749_s13  ;;  %p86_p1 = scmp.ne.s32.totalorder %s2729_s26, %s2725_s25 }
  0x20   : > { %p87_p2 = scmp.eq.s32.totalorder %s2749_s13, 0  ;;  %s3495_s16 = smov (%p44_p0, %s43_s16), 0 }
  0x21   : > { %3439 = sst [smem:[#allocation31_spill]] %s3495_s16  ;;  %s3497_s17 = smov (!%p44_p0, %s46_s17), %s2745_s30 }
  0x22   : > { %p2902_p3 = por %p87_p2, %p86_p1  ;;  %p3407_p4 = scmp.ne.s32.totalorder %s2725_s25, %s2721_s24 }
  0x23   : > { %p48_p5 = scmp.ge.s32.totalorder %s3497_s17, 2  ;;  %p93_p6 = scmp.eq.s32.totalorder %s2885_s14, 0 }
  0x24   : > { %s175_s20 = ssub.s32 %s2741_s29, %s3495_s16  ;;  %s178_s12 = sadd.s32 1, %s2717_s23 }
  0x25   : > { %s3499_s17 = smov (%p48_p5, %s3497_s17), 0  ;;  %p2919_p7 = por %p93_p6, %p3407_p4 }
  0x26   : > { %3441 = sst [smem:[#allocation32_spill]] %s3499_s17  ;;  %p176_p8 = scmp.eq.s32.totalorder %s175_s20, 0 }
  0x27   : > { %s76_s6 = ssub.s32 %s2745_s30, %s3499_s17  ;;  %p185_p9 = scmp.ne.s32.totalorder %s2717_s23, %s2713_s22 }
  0x28   : > { %p77_p10 = scmp.eq.s32.totalorder %s76_s6, 0  ;;  %p191_p11 = scmp.ne.s32.totalorder %s2713_s22, %s2709_s21 }
  0x29   : > { %s2930_s16 = scalar_select %p176_p8, %s2717_s23, %s178_s12  }
  0x2a   : > { %s2933_s4 = scalar_select %p77_p10, %s2729_s26, %s79_s18  }
  0x2b   : > { %3443 = sst [smem:[#allocation33_spill]] %s2930_s16  ;;  %p2937_p12 = por %p185_p9, %p87_p2 }
  0x2c   : > { %3444 = sst [smem:[#allocation34_spill]] %s2933_s4  ;;  %p2943_p13 = por %p191_p11, %p93_p6 }
  0x2d   : > { %p330_p0 = scmp.eq.s32.totalorder %s2885_s14, 3  ;;  %p336_p5 = scmp.eq.s32.totalorder %s2008_s15, 3 }
  0x2e   : > { %s3446_s3 = scalar_select %p2943_p13, 1, 0 }
  0x2f   : > { %p2951_p4 = por %p330_p0, %p86_p1  ;;  %p3450_p8 = scmp.ne.s32.totalorder %s2725_s25, %s2721_s24 }
  0x30   : > { %3447 = sst [smem:[#allocation35_spill]] %s3446_s3  ;;  %p2208_p2 = scmp.lt.s32.totalorder %s2749_s13, 4 }
  0x31   : > { %s3448_s6 = scalar_select %p2951_p4, 1, 0 }
  0x32   : > { %p2958_p10 = por %p336_p5, %p3450_p8  ;;  %s445_s21 = sand.u32 1, %s2749_s13  }
  0x33   : > { %3449 = sst [smem:[#allocation36_spill]] %s3448_s6  ;;  %s447_s18 = sand.u32 1, %s2729_s26  }
  0x34   : > { %s3451_s12 = scalar_select %p2958_p10, 1, 0 }
  0x35   : > { %s2015_s20 = sshll.u32 %s447_s18, 1  ;;  %s2016_s17 = sshll.u32 %s2745_s30, 1 }
  0x36   : > { %3452 = sst [smem:[#allocation37_spill]] %s3451_s12  ;;  %s449_s28 = scalar_lea.vmem [#allocation3], %s2015_s20 }
  0x37   : > { %s3453_s1 = sld [smem:[#allocation39_spill]]  ;;  %s457_s3 = sshll.u32 %s449_s28, 4  ;;  %s458_s3 = int_to_ptr.vmem [resolvable:$true] %s457_s3 }
  0x38   : > { %p2188_p1 = pnand %p2208_p2, %p2902_p3  ;;  %p2973_p9 = pnand %p2208_p2, %p2937_p12 }
  0x39   : > { %s2977_s18 = scalar_lea.sflag [#allocation4], %s445_s21  ;;  %p2009_p11 = scmp.ge.s32.totalorder %s2749_s13, 1 }
  0x3a   : > { %p369_p0 = scmp.lt.s32.totalorder %s2749_s13, 5  ;;  %s3455_s2 = sld [smem:[#allocation40_spill]] }
  0x3b   : > { %s2751_s0 = smov [#allocation6]   ;;  %s3457_s9 = sld [smem:[#allocation46_spill]] }
  0x3c   : > { %p2985_p5 = pnand %p2009_p11, %p369_p0  ;;  %s383_s19 = sshll.u32 %s2751_s0, 4  ;;  %s384_s19 = int_to_ptr.vmem [resolvable:$true] %s383_s19 }
  0x3d   : > { %s453_s15 = scalar_lea.hbm %s3453_s1, %s2016_s17  ;;  %s2752_s4 = smov [#allocation11]  }
  0x3e   : > { %s455_s27 = sshll.u32 %s453_s15, 4  ;;  %p2174_p3 = pneg %p2985_p5  ;;  %s456_s27 = int_to_ptr.hbm [resolvable:$true] %s455_s27 }
  0x3f   : > { %2190 = dma.hbm_to_vmem [thread:$0]  (!%p2188_p1), %s456_s27, 32, %s458_s3, %s2977_s18  }
  0x40   : > { %s381_s28 = sshll.u32 %s3455_s2, 4  ;;  %p2996_p12 = pnand %p2174_p3, %p93_p6  ;;  %s382_s28 = int_to_ptr.hbm [resolvable:$true] %s381_s28 }
  0x41   : > { %s406_s27 = sshll.u32 %s3457_s9, 4  ;;  %s482_s15 = sand.u32 1, %s2717_s23   ;;  %s407_s27 = int_to_ptr.hbm [resolvable:$true] %s406_s27 }
  0x42   : > { %s408_s16 = sshll.u32 %s2752_s4, 4  ;;  %s2017_s0 = sshll.u32 %s482_s15, 4  ;;  %s409_s16 = int_to_ptr.vmem [resolvable:$true] %s408_s16 }
  0x43   : > { %2177 = dma.hbm_to_vmem [thread:$0]  (!%p2996_p12), %s382_s28, 128, %s384_s19, [#allocation7]  }
  0x44   : > { %s2753_s1 = smov 64   ;;  %s2754_s21 = smov 4  }
  0x45   : > { %2183 = dma.hbm_to_vmem [thread:$0]  (!%p2996_p12), %s407_s27, 256, %s409_s16, [#allocation12], %s2753_s1, %s2753_s1, %s2754_s21  }
  0x46   : > { %s2130_s3 = sshll.u32 %s2741_s29, 4  ;;  %s3459_s5 = sld [smem:[#allocation43_spill]] }
  0x47   : > { %s484_s26 = scalar_lea.vmem [#allocation8], %s2017_s0  ;;  %s392_s4 = sshll.u32 %s3399_s8, 4  ;;  %s393_s4 = int_to_ptr.hbm [resolvable:$true] %s392_s4 }
  0x48   : > { %s492_s23 = sshll.u32 %s484_s26, 4  ;;  %s2755_s27 = smov [#allocation10]   ;;  %s493_s23 = int_to_ptr.vmem [resolvable:$true] %s492_s23 }
  0x49   : > { %s394_s16 = sshll.u32 %s2755_s27, 4  ;;  %s420_s2 = sshll.u32 %s3401_s10, 4  ;;  %s395_s16 = int_to_ptr.vmem [resolvable:$true] %s394_s16  ;;  %s421_s2 = int_to_ptr.hbm [resolvable:$true] %s420_s2 }
  0x4a   : > { %2180 = dma.hbm_to_vmem [thread:$0]  (!%p2996_p12), %s393_s4, 256, %s395_s16, [#allocation7], %s2753_s1, %s2753_s1, %s2754_s21  }
  0x4b   : > { %s2020_s9 = sshll.u32 %s482_s15, 3  ;;  %s2756_s26 = smov [#allocation13]  }
  0x4c   : > { %s489_s30 = scalar_lea.hbm %s3459_s5, %s2130_s3  ;;  %s2021_s0 = sshll.u32 %s2741_s29, 3 }
  0x4d   : > { %s490_s24 = sshll.u32 %s489_s30, 4  ;;  %s422_s30 = sshll.u32 %s2756_s26, 4  ;;  %s491_s24 = int_to_ptr.hbm [resolvable:$true] %s490_s24  ;;  %s423_s30 = int_to_ptr.vmem [resolvable:$true] %s422_s30 }
  0x4e   : > { %2193 = dma.hbm_to_vmem [thread:$0]  (!%p2973_p9), %s491_s24, 256, %s493_s23, %s2977_s18, %s2753_s1, %s2753_s1, %s2754_s21  }
  0x4f   : > { %2186 = dma.hbm_to_vmem [thread:$0]  (!%p2996_p12), %s421_s2, 256, %s423_s30, [#allocation12], %s2753_s1, %s2753_s1, %s2754_s21  }
  0x50   : > { %s3460_s7 = sld [smem:[#allocation45_spill]]  ;;  %s514_s28 = scalar_lea.vmem [#allocation9], %s2020_s9 }
  0x51   : > { %s522_s13 = sshll.u32 %s514_s28, 4  ;;  %s533_s15 = sand.u32 (!%p2985_p5), 1, %s2885_s14   ;;  %s523_s13 = int_to_ptr.vmem [resolvable:$true] %s522_s13 }
  0x52   : > { %s3033_s20 = sand.u32 (!%p2985_p5), 1, %s2725_s25   ;;  %s534_s21 = scalar_lea.sflag (!%p2985_p5), [#allocation4], %s533_s15 }
  0x53   : > { %s3036_s1 = sshll.u32 (!%p2985_p5), %s3033_s20, 1 }
  0x54   : > { %531 = sbr.rel (%p2985_p5) target bundleno = 3184 (0xc70), region = 64 }
  0x56   : > { %s518_s3 = scalar_lea.hbm %s3460_s7, %s2021_s0 }
  0x57   : > { %s520_s6 = sshll.u32 %s518_s3, 4  ;;  %s521_s6 = int_to_ptr.hbm [resolvable:$true] %s520_s6 }
  0x58   : > { %2196 = dma.hbm_to_vmem [thread:$0]  (!%p2973_p9), %s521_s6, 128, %s523_s13, %s2977_s18  }
  0x59   : > { %2680 = dma.done.wait (%p2919_p7), %s534_s21, 32  }
  0x5a   : > { %2682 = vsyncadd (%p2919_p7), %s534_s21, 4294967264 }
  0x5b   : > { %2684 = dma.done.wait (%p93_p6), [#allocation7], 128  }
  0x5c   : > { %2686 = vsyncadd (%p93_p6), [#allocation7], 4294967168  ;;  %s550_s18 = sand.u32 1, %s2713_s22  }
  0x5d   : > { %s3048_s17 = sshll.u32 %s550_s18, 4 }
  0x5e   : > { %2688 = dma.done.wait (%p2943_p13), %s534_s21, 384  }
  0x5f   : > { %2690 = vsyncadd (%p2943_p13), %s534_s21, 4294966912  ;;  %s3055_s11 = sshll.u32 %s550_s18, 3 }
  0x60   : > { %2692 = dma.done.wait (%p93_p6), [#allocation7], 256  }
  0x61   : > { %2694 = vsyncadd (%p93_p6), [#allocation7], 4294967040 }
  0x62   : > { %2696 = dma.done.wait (%p93_p6), [#allocation12], 512  }
  0x63   : > { %2698 = vsyncadd (%p93_p6), [#allocation12], 4294966784  ;;  %s3462_s16 = sld [smem:[#allocation28_spill]]  ;;  %v3078_v0 = vld [vmem:[#allocation6] sm:$0xff]  ;;  %s646_s7 = scalar_lea.vmem [#allocation14], %s3036_s1 }
  0x64   : > { %s3463_s2 = sld [smem:[#allocation27_spill]]  ;;  %s653_s3 = scalar_lea.vmem [#allocation15], %s3036_s1 }
  0x65   : > { %s3464_s14 = sld [smem:[#allocation41_spill]] }
  0x66   : > { %s3465_s21 = sld [smem:[#allocation38_spill]] }
  0x67   : > { %s3466_s4 = sld [smem:[#allocation42_spill]] }
  0x69   : > { %s3067_s9 = sshll.u32 %s3462_s16, 1 }
  0x6a   : > { %p660_p7 = scmp.lt.s32.totalorder %s3463_s2, 1  ;;  %p655_p13 = scmp.lt.s32.totalorder %s3067_s9, 3 }
  0x6b   : > { %p2040_p6 = scmp.ne.s32.totalorder %s3463_s2, 0 }
  0x6c   : > { %s661_s26 = scalar_select %p660_p7, %s3463_s2, 1 }
  0x6d   : > { %s656_s30 = scalar_select %p655_p13, %s3067_s9, 3 }
  0x6e   : > { %s2131_s0 = sshll.u32 %s661_s26, 4  ;;  %s2133_s23 = sshll.u32 %s661_s26, 5 }
  0x6f   : > { %s2033_s24 = sshll.u32 %s656_s30, 3  ;;  %s3076_s13 = scalar_lea.vmem %s3464_s14, %s2131_s0 }
  0x70   : > { %s658_s12 = scalar_lea.vmem %s3465_s21, %s2033_s24  ;;  %s3086_s19 = scalar_lea.vmem %s3466_s4, %s2131_s0 }
  0x71   : > { %s3467_s26 = sld [smem:[#allocation44_spill]] }
  0x73   : > { %680 = sbr.rel (%p2040_p6) target bundleno = 398 (0x18e), region = 96 }
  0x77   : > { %s3091_s30 = scalar_lea.vmem %s3467_s26, %s2133_s23 }
  0x78   : > { %v681_v1 = vld [vmem:[%s658_s12] sm:$0xff]  ;;  %vm683_vm0 = vcmask 261120   ;;  %v682_v3 = vld [vmem:[%s658_s12 + $0x8] sm:$0xff]  ;;  %v2757_v5 = vmov 32.0   ;;  %v735_v36 = vperm.slane %v3078_v0, 0  ;;  %v738_v39 = vperm.slane %v3078_v0, 1 }
  0x79   : > { %v684_v2 = vsel %vm683_vm0, %v681_v1, 0.0  ;;  %v687_v4 = vsel %vm683_vm0, %v682_v3, 0.0  ;;  %2315 = vrcp.f32 %v2757_v5 }
  0x7a   : > { %685 = vadd.xlane.f32.xlu0 %v684_v2 }
  0x7f   : > { %v2316_v6 = vpop.eup %2315 }
  0x80   : > { %v691_v7 = vmul.f32 32.0, %v2316_v6  ;;  %vm695_vm1 = vweird.f32 %v2316_v6 }
  0x82   : > { %688 = vadd.xlane.f32.xlu0 %v687_v4  ;;  %v692_v8 = vsub.f32 1.0, %v691_v7 }
  0x84   : > { %v693_v9 = vmul.f32 %v2316_v6, %v692_v8 }
  0x86   : > { %v694_v10 = vadd.f32 %v2316_v6, %v693_v9 }
  0x88   : > { %v696_v11 = vsel %vm695_vm1, %v2316_v6, %v694_v10 }
  0xed   : > { %v686_v12 = vpop.xlane.xlu0 %685 }
  0xee   : > { %v697_v13 = vmul.f32 %v696_v11, %v686_v12 }
  0xf0   : > { %v699_v14 = vsub.f32 %v681_v1, %v697_v13 }
  0xf2   : > { %v701_v15 = vmul.f32 %v699_v14, %v699_v14 }
  0xf4   : > { %v703_v16 = vsel %vm683_vm0, %v701_v15, 0.0 }
  0xf5   : > { %704 = vadd.xlane.f32.xlu1 %v703_v16  ;;  %v689_v17 = vpop.xlane.xlu0 %688 }
  0xf6   : > { %v698_v18 = vmul.f32 %v696_v11, %v689_v17 }
  0xf8   : > { %v700_v19 = vsub.f32 %v682_v3, %v698_v18 }
  0xfa   : > { %v702_v20 = vmul.f32 %v700_v19, %v700_v19 }
  0xfc   : > { %v706_v21 = vsel %vm683_vm0, %v702_v20, 0.0 }
  0xfd   : > { %707 = vadd.xlane.f32.xlu1 %v706_v21 }
 0x168   : > { %v705_v22 = vpop.xlane.xlu1 %704 }
 0x169   : > { %v709_v23 = vmul.f32 %v705_v22, %v696_v11 }
 0x16b   : > { %v711_v24 = vadd.f32 1e-12, %v709_v23 }
 0x16d   : > { %2317 = vrsqrt.f32 %v711_v24  ;;  %vm719_vm3 = vweird.f32 %v711_v24 }
 0x170   : > { %v708_v25 = vpop.xlane.xlu1 %707 }
 0x171   : > { %v710_v26 = vmul.f32 %v708_v25, %v696_v11 }
 0x173   : > { %v2318_v27 = vpop.eup %2317  ;;  %v712_v28 = vadd.f32 1e-12, %v710_v26 }
 0x174   : > { %v714_v29 = vmul.f32 %v2318_v27, %v711_v24  ;;  %vm720_vm2 = vweird.f32 %v2318_v27 }
 0x175   : > { %2319 = vrsqrt.f32 %v712_v28  ;;  %vm721_vm4 = vmor %vm719_vm3, %vm720_vm2  ;;  %vm729_vm6 = vweird.f32 %v712_v28 }
 0x176   : > { %v715_v30 = vmul.f32 %v2318_v27, %v714_v29 }
 0x178   : > { %v716_v31 = vmul.f32 0.5, %v715_v30 }
 0x17a   : > { %v717_v32 = vsub.f32 1.5, %v716_v31 }
 0x17b   : > { %v2320_v33 = vpop.eup %2319 }
 0x17c   : > { %v718_v34 = vmul.f32 %v2318_v27, %v717_v32  ;;  %v724_v35 = vmul.f32 %v2320_v33, %v712_v28  ;;  %vm730_vm5 = vweird.f32 %v2320_v33 }
 0x17d   : > { %vm731_vm7 = vmor %vm729_vm6, %vm730_vm5 }
 0x17e   : > { %v722_v37 = vsel %vm721_vm4, %v2318_v27, %v718_v34  ;;  %v725_v38 = vmul.f32 %v2320_v33, %v724_v35 }
 0x17f   : > { %v733_v40 = vmul.f32 %v722_v37, %v699_v14 }
 0x180   : > { %v726_v41 = vmul.f32 0.5, %v725_v38 }
 0x181   : > { %v736_v42 = vmul.f32 %v735_v36, %v733_v40 }
 0x182   : > { %v727_v43 = vsub.f32 1.5, %v726_v41 }
 0x183   : > { %v739_v44 = vadd.f32 %v738_v39, %v736_v42 }
 0x184   : > { %v728_v45 = vmul.f32 %v2320_v33, %v727_v43 }
 0x185   : > { %741 = vst.msk [vmem:[#allocation2] sm:$0xff] %vm683_vm0, %v739_v44 }
 0x186   : > { %v732_v46 = vsel %vm731_vm7, %v2320_v33, %v728_v45 }
 0x187   : > { %v734_v47 = vmul.f32 %v732_v46, %v700_v19 }
 0x189   : > { %v737_v48 = vmul.f32 %v735_v36, %v734_v47 }
 0x18b   : > { %v740_v49 = vadd.f32 %v738_v39, %v737_v48 }
 0x18d   : > { %742 = vst.msk [vmem:[#allocation2 + $0x8] sm:$0xff] %vm683_vm0, %v740_v49 }
 0x18e PF: > { %v2135_v50 = vld [vmem:[%s3076_s13 + $0x8] sm:$0xff]  ;;  %v2134_v51 = vld [vmem:[%s3076_s13] sm:$0xff]  ;;  %vm764_vm8 = vcmask 261120   ;;  %s3468_s5 = scalar_lea.vmem [#allocation9], %s3055_s11  ;;  %s2758_s4 = smov 56   ;;  %vm805_vm9 = vcmask 64512  }
 0x18f   : > { %774 = vmatpush.bf16.msra.mxu0 %v2135_v50  ;;  %v3106_v52 = vld [vmem:[#allocation2] sm:$0xff]  ;;  %s2759_s27 = smov 104   ;;  %s2760_s2 = smov 80   ;;  %vm956_vm10 = vcmask 1043456   ;;  %vm1544_vm2 = vcmask 523264  }
 0x190   : > { %v3115_v55 = vld [vmem:[%s3468_s5] sm:$0xff]  ;;  %s2761_s11 = smov 120   ;;  %s2762_s0 = smov 112  }
 0x191   : > { %v751_v56 = vperm.slane %v3115_v55, 0  ;;  %s3469_s23 = scalar_lea.vmem [#allocation3], %s3036_s1 }
 0x192   : > { %v798_v22 = vld [vmem:[%s3469_s23] sm:$0x3] }
 0x193   : > { %775 = vmatpush.bf16.msra.mxu0 %v2134_v51  ;;  %v799_v23 = vsub.f32 1.0, %v798_v22 }
 0x194   : > { %v3108_v53 = vld [vmem:[#allocation2 + $0x8] sm:$0xff] }
 0x195   : > { %v746_v54 = vpack.c.bf16 %v3108_v53, %v3106_v52  ;;  %v3150_v24 = vmul.f32 -1e+09, %v799_v23 }
 0x197   : > { %2049 = vmatmul.msk.bf16.vlgmr.msra.gmra.mxu0 %vm764_vm8, %v746_v54  ;;  %v898_v28 = vperm.slane %v3150_v24, 0 }
 0x214   : > { %v777_v57 = vpop.f32.mrf.mxu0 }
 0x215   : > { %v778_v58 = vadd.f32 %v777_v57, %v751_v56 }
 0x217   : > { %v782_v59 = vpack.c.bf16 %v778_v58, %v778_v58 }
 0x219   : > { %794 = vrot.lane.b32.xlu1 %v782_v59, %s2758_s4  ;;  %786 = vrot.lane.b32.xlu0 %v782_v59, %s2759_s27  ;;  %v801_v9 = vunpack.c.l.b16 %v782_v59 }
 0x21b   : > { %v3131_v10 = vpack.c.b16 %v801_v9, %v801_v9 }
 0x21c   : > { %v779_v3 = vpop.f32.mrf.mxu0 }
 0x21d   : > { %v780_v4 = vadd.f32 %v779_v3, %v751_v56 }
 0x21f   : > { %v3123_v7 = vpack.c.bf16 %v780_v4, %v780_v4 }
 0x221   : > { %790 = vrot.lane.b32.xlu0 %v782_v59, %s2760_s2 }
 0x28b   : > { %v795_v60 = vpop.permute.xlu1 %794  ;;  %v787_v61 = vpop.permute.xlu0 %786 }
 0x28c   : > { %v871_v62 = vunpack.c.l.b16 %v795_v60  ;;  %v825_v63 = vunpack.c.l.b16 %v787_v61 }
 0x28e   : > { %v3118_v1 = vpack.c.b16 %v871_v62, %v871_v62  ;;  %v826_v2 = vpack.c.b16 %v825_v63, %v825_v63 }
 0x290   : > { %873 = vrot.lane.b32.xlu0 %v3118_v1, %s2761_s11  ;;  %827 = vrot.lane.b32.xlu1 %v826_v2, %s2761_s11 }
 0x293   : > { %v791_v5 = vpop.permute.xlu0 %790 }
 0x294   : > { %v848_v6 = vunpack.c.l.b16 %v791_v5 }
 0x296   : > { %v3125_v8 = vpack.c.b16 %v848_v6, %v848_v6 }
 0x298   : > { %796 = vrot.lane.b32.xlu0 %v3123_v7, %s2758_s4  ;;  %788 = vrot.lane.b32.xlu1 %v3123_v7, %s2759_s27 }
 0x299   : > { %850 = vrot.lane.b32.xlu2 %v3125_v8, %s2761_s11 }
 0x2a1   : > { %803 = vrot.lane.b32.xlu2 %v3131_v10, %s2761_s11 }
 0x2a9   : > { %792 = vrot.lane.b32.xlu2 %v3123_v7, %s2760_s2 }
 0x2b1   : > { %973 = vrot.lane.b32.xlu2 %v826_v2, %s2762_s0 }
 0x2f3   : > { %v851_v11 = vpop.permute.xlu2 %850 }
 0x2f4   : > { %v856_v12 = vsel %vm805_vm9, %v851_v11, 0 }
 0x2f5   : > { %865 = vmatpush.bf16.xpose.msra.mxu3 %v856_v12 }
 0x2fb   : > { %v804_v13 = vpop.permute.xlu2 %803 }
 0x2fc   : > { %2052 = vmatmul.msk.bf16.vlgmr.msra.gmra.mxu3 %vm805_vm9, %v791_v5  ;;  %v810_v14 = vsel %vm805_vm9, %v804_v13, 0 }
 0x2fd   : > { %819 = vmatpush.bf16.xpose.msra.mxu1 %v810_v14 }
 0x302   : > { %v828_v15 = vpop.permute.xlu1 %827  ;;  %v874_v16 = vpop.permute.xlu0 %873 }
 0x303   : > { %v3140_v17 = vpop.permute.xlu2 %792  ;;  %v833_v18 = vsel %vm805_vm9, %v828_v15, 0  ;;  %v879_v19 = vsel %vm805_vm9, %v874_v16, 0 }
 0x304   : > { %2050 = vmatmul.msk.bf16.vlgmr.msra.gmra.mxu1 %vm805_vm9, %v782_v59  ;;  %842 = vmatpush.bf16.xpose.msra.mxu2 %v833_v18  ;;  %v1082_v44 = vunpack.c.l.b16 %v3140_v17 }
 0x305   : > { %888 = vmatpush.bf16.xpose.msrb.mxu0 %v879_v19 }
 0x306   : > { %v3158_v47 = vpack.c.b16 %v1082_v44, %v1082_v44 }
 0x30a   : > { %v3162_v48 = vpop.permute.xlu1 %788  ;;  %v3173_v51 = vpop.permute.xlu0 %796 }
 0x30b   : > { %v974_v20 = vpop.permute.xlu2 %973  ;;  %2051 = vmatmul.msk.bf16.vlgmr.msra.gmra.mxu2 %vm805_vm9, %v787_v61  ;;  %v1059_v49 = vunpack.c.l.b16 %v3162_v48  ;;  %v1105_v22 = vunpack.c.l.b16 %v3173_v51 }
 0x30c   : > { %2053 = vmatmul.msk.bf16.vlgmr.msrb.gmra.mxu0 %vm805_vm9, %v795_v60  ;;  %v979_v21 = vsel %vm956_vm10, %v974_v20, 0 }
 0x30d   : > { %988 = vmatpush.bf16.msrb.mxu2 %v979_v21  ;;  %v3165_v50 = vpack.c.b16 %v1059_v49, %v1059_v49  ;;  %v1036_v21 = vunpack.c.l.b16 %v3123_v7 }
 0x37f   : > { %v867_v25 = vpop.f32.mrf.mxu3 }
 0x380   : > { %v896_v36 = vmul.f32 0.35355338, %v867_v25 }
 0x381   : > { %v821_v26 = vpop.f32.mrf.mxu1 }
 0x382   : > { %v894_v27 = vmul.f32 0.35355338, %v821_v26  ;;  %v901_v42 = vadd.f32 %v898_v28, %v896_v36  ;;  %v3187_v26 = vpack.c.b16 %v1036_v21, %v1036_v21 }
 0x384   : > { %v899_v29 = vadd.f32 %v898_v28, %v894_v27  ;;  %v909_v46 = vsel %vm805_vm9, %v901_v42, -inf  ;;  %v3189_v27 = vpack.c.b16 %v1105_v22, %v1105_v22 }
 0x386   : > { %v903_v30 = vsel %vm805_vm9, %v899_v29, -inf }
 0x387   : > { %v869_v31 = vpop.f32.mrf.mxu3  ;;  %904 = vmax.xlane.f32.xlu0 %v903_v30 }
 0x389   : > { %v823_v32 = vpop.f32.mrf.mxu1  ;;  %v890_v33 = vpop.f32.mrf.mxu0 }
 0x38a   : > { %v897_v34 = vmul.f32 0.35355338, %v890_v33 }
 0x38c   : > { %v902_v35 = vadd.f32 %v898_v28, %v897_v34 }
 0x38e   : > { %v844_v37 = vpop.f32.mrf.mxu2  ;;  %v912_v38 = vsel %vm805_vm9, %v902_v35, -inf }
 0x38f   : > { %v895_v39 = vmul.f32 0.35355338, %v844_v37  ;;  %913 = vmax.xlane.f32.xlu2 %v912_v38 }
 0x391   : > { %v892_v40 = vpop.f32.mrf.mxu0  ;;  %v900_v41 = vadd.f32 %v898_v28, %v895_v39 }
 0x393   : > { %v906_v43 = vsel %vm805_vm9, %v900_v41, -inf }
 0x394   : > { %907 = vmax.xlane.f32.xlu1 %v906_v43 }
 0x396   : > { %v846_v45 = vpop.f32.mrf.mxu2 }
 0x397   : > { %910 = vmax.xlane.f32.xlu2 %v909_v46 }
 0x39b   : > { %1084 = vrot.lane.b32.xlu0 %v3158_v47, %s2761_s11 }
 0x3ad   : > { %1061 = vrot.lane.b32.xlu1 %v3165_v50, %s2761_s11 }
 0x3af   : > { %994 = vrot.lane.b32.xlu2 %v3125_v8, %s2762_s0 }
 0x3b5   : > { %1015 = vrot.lane.b32.xlu1 %v3118_v1, %s2762_s0 }
 0x3fa   : > { %v905_v54 = vpop.xlane.xlu0 %904 }
 0x3fb   : > { %v915_v56 = vsub.f32 %v899_v29, %v905_v54 }
 0x3fd   : > { %v919_v57 = vmul.f32 1.442695, %v915_v56 }
 0x3ff   : > { %2321 = vpow2.f32 %v919_v57 }
 0x402   : > { %v914_v58 = vpop.xlane.xlu2 %913 }
 0x403   : > { %v918_v59 = vsub.f32 %v902_v35, %v914_v58 }
 0x405   : > { %v2322_v60 = vpop.eup %2321  ;;  %v925_v61 = vmul.f32 1.442695, %v918_v59 }
 0x406   : > { %v927_v62 = vsel %vm805_vm9, %v2322_v60, 0.0 }
 0x407   : > { %2323 = vpow2.f32 %v925_v61  ;;  %928 = vadd.xlane.f32.xlu2 %v927_v62  ;;  %v908_v63 = vpop.xlane.xlu1 %907 }
 0x408   : > { %v916_v2 = vsub.f32 %v900_v41, %v908_v63 }
 0x40a   : > { %v921_v3 = vmul.f32 1.442695, %v916_v2  ;;  %v911_v4 = vpop.xlane.xlu2 %910 }
 0x40b   : > { %v917_v5 = vsub.f32 %v901_v42, %v911_v4 }
 0x40c   : > { %2325 = vpow2.f32 %v921_v3 }
 0x40d   : > { %v2324_v1 = vpop.eup %2323  ;;  %v923_v6 = vmul.f32 1.442695, %v917_v5  ;;  %v1085_v9 = vpop.permute.xlu0 %1084 }
 0x40e   : > { %v936_v8 = vsel %vm805_vm9, %v2324_v1, 0.0  ;;  %v1090_v15 = vsel %vm805_vm9, %v1085_v9, 0 }
 0x40f   : > { %2327 = vpow2.f32 %v923_v6  ;;  %937 = vadd.xlane.f32.xlu0 %v936_v8 }
 0x412   : > { %v2326_v11 = vpop.eup %2325  ;;  %v995_v12 = vpop.permute.xlu2 %994 }
 0x413   : > { %v1000_v13 = vsel %vm956_vm10, %v995_v12, 0  ;;  %v930_v14 = vsel %vm805_vm9, %v2326_v11, 0.0 }
 0x414   : > { %1009 = vmatpush.bf16.msrb.mxu3 %v1000_v13  ;;  %931 = vadd.xlane.f32.xlu1 %v930_v14 }
 0x415   : > { %v2328_v16 = vpop.eup %2327 }
 0x416   : > { %v933_v18 = vsel %vm805_vm9, %v2328_v16, 0.0 }
 0x417   : > { %934 = vadd.xlane.f32.xlu0 %v933_v18 }
 0x418   : > { %1099 = vmatpush.bf16.xpose.msra.mxu3 %v1090_v15 }
 0x41f   : > { %951 = vrot.lane.b32.xlu2 %v3131_v10, %s2762_s0  ;;  %v1062_v19 = vpop.permute.xlu1 %1061 }
 0x420   : > { %v1067_v20 = vsel %vm805_vm9, %v1062_v19, 0 }
 0x421   : > { %1076 = vmatpush.bf16.xpose.msra.mxu2 %v1067_v20 }
 0x427   : > { %v1016_v23 = vpop.permute.xlu1 %1015 }
 0x428   : > { %v1021_v25 = vsel %vm956_vm10, %v1016_v23, 0 }
 0x429   : > { %1030 = vmatpush.bf16.msra.mxu0 %v1021_v25 }
 0x42b   : > { %1038 = vrot.lane.b32.xlu0 %v3187_v26, %s2761_s11 }
 0x42d   : > { %1107 = vrot.lane.b32.xlu1 %v3189_v27, %s2761_s11 }
 0x47a   : > { %v929_v10 = vpop.xlane.xlu2 %928 }
 0x47b   : > { %2329 = vrcp.f32 %v929_v10 }
 0x481   : > { %v2330_v28 = vpop.eup %2329 }
 0x482   : > { %v943_v29 = vmul.f32 %v2330_v28, %v2322_v60  ;;  %v938_v30 = vpop.xlane.xlu0 %937  ;;  %v952_v31 = vpop.permute.xlu2 %951 }
 0x483   : > { %2331 = vrcp.f32 %v938_v30  ;;  %v958_v32 = vsel %vm956_vm10, %v952_v31, 0 }
 0x484   : > { %967 = vmatpush.bf16.msrb.mxu1 %v958_v32  ;;  %v947_v33 = vpack.c.bf16 %v943_v29, %v943_v29 }
 0x487   : > { %2054 = vmatmul.msk.bf16.vlgmr.msrb.gmra.mxu1 %vm805_vm9, %v947_v33  ;;  %v932_v34 = vpop.xlane.xlu1 %931 }
 0x488   : > { %2333 = vrcp.f32 %v932_v34 }
 0x489   : > { %v2332_v35 = vpop.eup %2331 }
 0x48a   : > { %v946_v36 = vmul.f32 %v2332_v35, %v2324_v1  ;;  %v935_v37 = vpop.xlane.xlu0 %934 }
 0x48b   : > { %2335 = vrcp.f32 %v935_v37 }
 0x48c   : > { %v950_v38 = vpack.c.bf16 %v946_v36, %v946_v36 }
 0x48e   : > { %v2334_v39 = vpop.eup %2333  ;;  %2057 = vmatmul.msk.bf16.vlgmr.msra.gmra.mxu0 %vm805_vm9, %v950_v38 }
 0x48f   : > { %v944_v40 = vmul.f32 %v2334_v39, %v2326_v11 }
 0x491   : > { %v2336_v41 = vpop.eup %2335  ;;  %v948_v42 = vpack.c.bf16 %v944_v40, %v944_v40 }
 0x492   : > { %v945_v43 = vmul.f32 %v2336_v41, %v2328_v16 }
 0x493   : > { %2055 = vmatmul.msk.bf16.vlgmr.msrb.gmra.mxu2 %vm805_vm9, %v948_v42 }
 0x494   : > { %v949_v44 = vpack.c.bf16 %v945_v43, %v945_v43 }
 0x496   : > { %2056 = vmatmul.msk.bf16.vlgmr.msrb.gmra.mxu3 %vm805_vm9, %v949_v44 }
 0x49d   : > { %v1039_v45 = vpop.permute.xlu0 %1038 }
 0x49e   : > { %v1044_v46 = vsel %vm805_vm9, %v1039_v45, 0 }
 0x49f   : > { %1053 = vmatpush.bf16.xpose.msra.mxu1 %v1044_v46  ;;  %v1108_v49 = vpop.permute.xlu1 %1107 }
 0x4a0   : > { %v1113_v54 = vsel %vm805_vm9, %v1108_v49, 0 }
 0x4a1   : > { %1122 = vmatpush.bf16.xpose.msrb.mxu0 %v1113_v54 }
 0x4a3   : > { %2059 = vmatmul.msk.bf16.vlgmr.msra.gmra.mxu2 %vm805_vm9, %v3162_v48 }
 0x4a6   : > { %2058 = vmatmul.msk.bf16.vlgmr.msra.gmra.mxu1 %vm805_vm9, %v3123_v7  ;;  %2060 = vmatmul.msk.bf16.vlgmr.msra.gmra.mxu3 %vm805_vm9, %v3140_v17  ;;  %v1132_v7 = vperm.slane %v3150_v24, 1 }
 0x4a8   : > { %2061 = vmatmul.msk.bf16.vlgmr.msrb.gmra.mxu0 %vm805_vm9, %v3173_v51 }
 0x504   : > { %v3210_v56 = vpop.f32.mrf.mxu1 }
 0x50b   : > { %v3212_v57 = vpop.f32.mrf.mxu0 }
 0x50c   : > { %v971_v58 = vpop.f32.mrf.mxu1 }
 0x513   : > { %v1034_v59 = vpop.f32.mrf.mxu0 }
 0x516   : > { %v3214_v60 = vpop.f32.mrf.mxu2 }
 0x519   : > { %v3216_v61 = vpop.f32.mrf.mxu3 }
 0x51e   : > { %v992_v48 = vpop.f32.mrf.mxu2 }
 0x521   : > { %v1013_v62 = vpop.f32.mrf.mxu3 }
 0x523   : > { %v1055_v63 = vpop.f32.mrf.mxu1 }
 0x524   : > { %v1128_v2 = vmul.f32 0.35355338, %v1055_v63 }
 0x525   : > { %v1124_v17 = vpop.f32.mrf.mxu0 }
 0x526   : > { %v1078_v3 = vpop.f32.mrf.mxu2  ;;  %v1133_v4 = vadd.f32 %v1132_v7, %v1128_v2  ;;  %v1131_v9 = vmul.f32 0.35355338, %v1124_v17 }
 0x527   : > { %v1129_v51 = vmul.f32 0.35355338, %v1078_v3 }
 0x528   : > { %v1137_v5 = vsel %vm805_vm9, %v1133_v4, -inf  ;;  %v1136_v16 = vadd.f32 %v1132_v7, %v1131_v9  ;;  %v1278_v9 = vld [vmem:[%s3086_s19 + $0x4] sm:$0xf] }
 0x529   : > { %v1101_v1 = vpop.f32.mrf.mxu3  ;;  %1138 = vmax.xlane.f32.xlu2 %v1137_v5  ;;  %v1134_v6 = vadd.f32 %v1132_v7, %v1129_v51 }
 0x52a   : > { %v1130_v8 = vmul.f32 0.35355338, %v1101_v1  ;;  %v1146_v19 = vsel %vm805_vm9, %v1136_v16, -inf }
 0x52b   : > { %v1057_v11 = vpop.f32.mrf.mxu1  ;;  %v1140_v12 = vsel %vm805_vm9, %v1134_v6, -inf }
 0x52c   : > { %1141 = vmax.xlane.f32.xlu0 %v1140_v12  ;;  %v1135_v13 = vadd.f32 %v1132_v7, %v1130_v8  ;;  %v1315_v11 = vsel %vm956_vm10, %v1278_v9, 0  ;;  %v1280_v12 = vld [vmem:[%s3086_s19 + $0xc] sm:$0xf] }
 0x52d   : > { %v1126_v14 = vpop.f32.mrf.mxu0 }
 0x52e   : > { %v1080_v24 = vpop.f32.mrf.mxu2  ;;  %v1143_v15 = vsel %vm805_vm9, %v1135_v13, -inf  ;;  %v1279_v14 = vld [vmem:[%s3086_s19 + $0x8] sm:$0xf] }
 0x52f   : > { %1144 = vmax.xlane.f32.xlu1 %v1143_v15  ;;  %v1340_v24 = vsel %vm956_vm10, %v1279_v14, 0  ;;  %v1269_v15 = vpack.c.bf16 %v3210_v56, %v3210_v56 }
 0x531   : > { %v1103_v18 = vpop.f32.mrf.mxu3 }
 0x534   : > { %1147 = vmax.xlane.f32.xlu0 %v1146_v19  ;;  %v1283_v19 = vunpack.c.l.b16 %v1269_v15 }
 0x548   : > { %1206 = vrot.lane.b32.xlu0 %v3165_v50, %s2762_s0 }
 0x550   : > { %1185 = vrot.lane.b32.xlu0 %v3187_v26, %s2762_s0 }
 0x59c   : > { %v1139_v20 = vpop.xlane.xlu2 %1138 }
 0x59d   : > { %v1149_v21 = vsub.f32 %v1133_v4, %v1139_v20 }
 0x59f   : > { %v1153_v22 = vmul.f32 1.442695, %v1149_v21  ;;  %v1142_v23 = vpop.xlane.xlu0 %1141 }
 0x5a0   : > { %v1150_v25 = vsub.f32 %v1134_v6, %v1142_v23  ;;  %v1277_v6 = vld [vmem:[%s3086_s19] sm:$0xf]  ;;  %s3470_s19 = scalar_lea.vmem [#allocation8], %s3048_s17  ;;  %s3472_s17 = sld [smem:[#allocation27_spill]] }
 0x5a1   : > { %2337 = vpow2.f32 %v1153_v22  ;;  %v1290_v8 = vsel %vm956_vm10, %v1277_v6, 0  ;;  %v1271_v22 = vpack.c.bf16 %v3214_v60, %v3214_v60  ;;  %s3471_s24 = smov %s3470_s19 }
 0x5a2   : > { %v1155_v10 = vmul.f32 1.442695, %v1150_v25  ;;  %v1145_v29 = vpop.xlane.xlu1 %1144 }
 0x5a3   : > { %v1151_v50 = vsub.f32 %v1135_v13, %v1145_v29  ;;  %v1365_v13 = vsel %vm956_vm10, %v1280_v12, 0 }
 0x5a4   : > { %2339 = vpow2.f32 %v1155_v10 }
 0x5a5   : > { %v1157_v35 = vmul.f32 1.442695, %v1151_v50 }
 0x5a6   : > { %p2096_p8 = scmp.ne.s32.totalorder %s3472_s17, 1 }
 0x5a7   : > { %v2338_v28 = vpop.eup %2337  ;;  %v1148_v30 = vpop.xlane.xlu0 %1147 }
 0x5a8   : > { %v1152_v31 = vsub.f32 %v1136_v16, %v1148_v30  ;;  %v1161_v32 = vsel %vm805_vm9, %v2338_v28, 0.0 }
 0x5a9   : > { %1162 = vadd.xlane.f32.xlu2 %v1161_v32 }
 0x5aa   : > { %v2340_v33 = vpop.eup %2339  ;;  %v1159_v34 = vmul.f32 1.442695, %v1152_v31  ;;  %v1275_v31 = vpack.c.bf16 %v3212_v57, %v3212_v57 }
 0x5ab   : > { %v1164_v26 = vsel %vm805_vm9, %v2340_v33, 0.0 }
 0x5ac   : > { %2341 = vpow2.f32 %v1159_v34  ;;  %1165 = vadd.xlane.f32.xlu1 %v1164_v26  ;;  %v1358_v50 = vunpack.c.l.b16 %v1275_v31  ;;  %v1273_v26 = vpack.c.bf16 %v3216_v61, %v3216_v61 }
 0x5ad   : > { %2343 = vpow2.f32 %v1157_v35 }
 0x5b2   : > { %v2342_v36 = vpop.eup %2341 }
 0x5b3   : > { %v1170_v37 = vsel %vm805_vm9, %v2342_v36, 0.0  ;;  %v2344_v38 = vpop.eup %2343 }
 0x5b4   : > { %1171 = vadd.xlane.f32.xlu2 %v1170_v37  ;;  %v1167_v41 = vsel %vm805_vm9, %v2344_v38, 0.0 }
 0x5ba   : > { %v1207_v39 = vpop.permute.xlu0 %1206 }
 0x5bb   : > { %v1212_v40 = vsel %vm956_vm10, %v1207_v39, 0 }
 0x5bc   : > { %1221 = vmatpush.bf16.msrb.mxu2 %v1212_v40  ;;  %1168 = vadd.xlane.f32.xlu2 %v1167_v41 }
 0x5c0   : > { %1324 = vmatpush.bf16.msra.mxu2 %v1315_v11 }
 0x5c2   : > { %v1186_v42 = vpop.permute.xlu0 %1185 }
 0x5c3   : > { %v1191_v43 = vsel %vm956_vm10, %v1186_v42, 0 }
 0x5c4   : > { %1200 = vmatpush.bf16.msrb.mxu1 %v1191_v43 }
 0x5c5   : > { %1227 = vrot.lane.b32.xlu1 %v3158_v47, %s2762_s0 }
 0x5c8   : > { %1299 = vmatpush.bf16.msra.mxu1 %v1290_v8 }
 0x5d4   : > { %1248 = vrot.lane.b32.xlu2 %v3189_v27, %s2762_s0 }
 0x61c   : > { %v1163_v44 = vpop.xlane.xlu2 %1162 }
 0x61d   : > { %2345 = vrcp.f32 %v1163_v44 }
 0x61f   : > { %v1166_v45 = vpop.xlane.xlu1 %1165 }
 0x620   : > { %2347 = vrcp.f32 %v1166_v45 }
 0x623   : > { %v2346_v46 = vpop.eup %2345 }
 0x624   : > { %v1177_v49 = vmul.f32 %v2346_v46, %v2338_v28  ;;  %v1308_v28 = vunpack.c.l.b16 %v1271_v22 }
 0x626   : > { %v2348_v54 = vpop.eup %2347  ;;  %v1181_v58 = vpack.c.bf16 %v1177_v49, %v1177_v49 }
 0x627   : > { %v1178_v59 = vmul.f32 %v2348_v54, %v2340_v33  ;;  %v1172_v48 = vpop.xlane.xlu2 %1171 }
 0x628   : > { %2062 = vmatmul.msk.bf16.vlgmr.msrb.gmra.mxu1 %vm805_vm9, %v1181_v58  ;;  %2349 = vrcp.f32 %v1172_v48 }
 0x629   : > { %v1182_v62 = vpack.c.bf16 %v1178_v59, %v1178_v59  ;;  %v1395_v59 = vperm.slane %v3115_v55, 1 }
 0x62b   : > { %2063 = vmatmul.msk.bf16.vlgmr.msrb.gmra.mxu2 %vm805_vm9, %v1182_v62 }
 0x62e   : > { %v2350_v27 = vpop.eup %2349 }
 0x62f   : > { %v1169_v47 = vpop.xlane.xlu2 %1168  ;;  %v1180_v63 = vmul.f32 %v2350_v27, %v2342_v36 }
 0x630   : > { %2351 = vrcp.f32 %v1169_v47 }
 0x631   : > { %v1184_v1 = vpack.c.bf16 %v1180_v63, %v1180_v63 }
 0x636   : > { %v2352_v7 = vpop.eup %2351 }
 0x637   : > { %v1179_v2 = vmul.f32 %v2352_v7, %v2344_v38  ;;  %v1228_v17 = vpop.permute.xlu1 %1227  ;;  %v1249_v3 = vpop.permute.xlu2 %1248  ;;  %v1333_v38 = vunpack.c.l.b16 %v1273_v26 }
 0x638   : > { %v1233_v4 = vsel %vm956_vm10, %v1228_v17, 0  ;;  %v1254_v51 = vsel %vm956_vm10, %v1249_v3, 0 }
 0x639   : > { %v1183_v5 = vpack.c.bf16 %v1179_v2, %v1179_v2  ;;  %1242 = vmatpush.bf16.msrb.mxu3 %v1233_v4  ;;  %1263 = vmatpush.bf16.msra.mxu0 %v1254_v51 }
 0x63c   : > { %2064 = vmatmul.msk.bf16.vlgmr.msrb.gmra.mxu3 %vm805_vm9, %v1183_v5  ;;  %2065 = vmatmul.msk.bf16.vlgmr.msra.gmra.mxu0 %vm805_vm9, %v1184_v1 }
 0x63d   : > { %1374 = vmatpush.bf16.msrb.mxu0 %v1365_v13  ;;  %1349 = vmatpush.bf16.msra.mxu3 %v1340_v24  ;;  %v2763_v13 = vmov 32.0  }
 0x63e   : > { %2353 = vrcp.f32 %v2763_v13 }
 0x644   : > { %v2354_v14 = vpop.eup %2353 }
 0x645   : > { %v1407_v24 = vmul.f32 32.0, %v2354_v14  ;;  %vm1411_vm11 = vweird.f32 %v2354_v14 }
 0x6a5   : > { %v1202_v16 = vpop.f32.mrf.mxu1 }
 0x6a6   : > { %v1270_v18 = vpack.c.bf16 %v1202_v16, %v1202_v16 }
 0x6a8   : > { %v1284_v20 = vunpack.c.l.b16 %v1270_v18 }
 0x6aa   : > { %v1285_v21 = vpack.c.b16 %v1284_v20, %v1283_v19 }
 0x6ac   : > { %2066 = vmatmul.msk.bf16.vlgmr.msra.gmra.mxu1 %vm805_vm9, %v1285_v21 }
 0x6ad   : > { %v1204_v23 = vpop.f32.mrf.mxu1 }
 0x6ae   : > { %v1223_v25 = vpop.f32.mrf.mxu2 }
 0x6af   : > { %v1272_v10 = vpack.c.bf16 %v1223_v25, %v1223_v25 }
 0x6b1   : > { %v1309_v29 = vunpack.c.l.b16 %v1272_v10 }
 0x6b3   : > { %v1310_v30 = vpack.c.b16 %v1309_v29, %v1308_v28 }
 0x6b5   : > { %2067 = vmatmul.msk.bf16.vlgmr.msra.gmra.mxu2 %vm805_vm9, %v1310_v30  ;;  %v2137_v30 = vld [vmem:[%s3470_s19 + $0x8] sm:$0xff] }
 0x6b6   : > { %v1225_v56 = vpop.f32.mrf.mxu2  ;;  %1484 = vmatpush.bf16.msrb.mxu1 %v2137_v30 }
 0x6b9   : > { %v1265_v32 = vpop.f32.mrf.mxu0 }
 0x6ba   : > { %v1276_v33 = vpack.c.bf16 %v1265_v32, %v1265_v32 }
 0x6bc   : > { %v1359_v34 = vunpack.c.l.b16 %v1276_v33  ;;  %v2136_v33 = vld [vmem:[%s3471_s24] sm:$0xff] }
 0x6bd   : > { %1485 = vmatpush.bf16.msrb.mxu1 %v2136_v33 }
 0x6be   : > { %v1360_v60 = vpack.c.b16 %v1359_v34, %v1358_v50 }
 0x6bf   : > { %v1244_v35 = vpop.f32.mrf.mxu3 }
 0x6c0   : > { %v1274_v36 = vpack.c.bf16 %v1244_v35, %v1244_v35  ;;  %2069 = vmatmul.msk.bf16.vlgmr.msrb.gmra.mxu0 %vm805_vm9, %v1360_v60 }
 0x6c1   : > { %v1267_v37 = vpop.f32.mrf.mxu0 }
 0x6c2   : > { %v1334_v39 = vunpack.c.l.b16 %v1274_v36 }
 0x6c4   : > { %v1335_v40 = vpack.c.b16 %v1334_v39, %v1333_v38 }
 0x6c6   : > { %2068 = vmatmul.msk.bf16.vlgmr.msra.gmra.mxu3 %vm805_vm9, %v1335_v40 }
 0x6c7   : > { %v1246_v41 = vpop.f32.mrf.mxu3 }
 0x729   : > { %v1301_v42 = vpop.f32.mrf.mxu1 }
 0x72a   : > { %v1381_v45 = vsel %vm764_vm8, %v1301_v42, 0.0 }
 0x731   : > { %v1303_v62 = vpop.f32.mrf.mxu1 }
 0x732   : > { %v1388_v63 = vsel %vm764_vm8, %v1303_v62, 0.0 }
 0x738   : > { %v1326_v57 = vpop.f32.mrf.mxu2 }
 0x739   : > { %v1382_v43 = vsel %vm764_vm8, %v1326_v57, 0.0 }
 0x73a   : > { %v1383_v61 = vadd.f32 %v1382_v43, %v1381_v45  ;;  %v1451_v45 = vperm.slane %v3115_v55, 2 }
 0x73d   : > { %v1376_v44 = vpop.f32.mrf.mxu0 }
 0x73e   : > { %v1386_v48 = vsel %vm764_vm8, %v1376_v44, 0.0 }
 0x740   : > { %v1328_v54 = vpop.f32.mrf.mxu2 }
 0x741   : > { %v1389_v27 = vsel %vm764_vm8, %v1328_v54, 0.0  ;;  %v1454_v54 = vperm.slane %v3115_v55, 3 }
 0x742   : > { %v1390_v2 = vadd.f32 %v1389_v27, %v1388_v63  ;;  %v2140_v63 = vld [vmem:[%s3091_s30 + $0x10] sm:$0xff] }
 0x745   : > { %v1378_v17 = vpop.f32.mrf.mxu0 }
 0x746   : > { %v1393_v6 = vsel %vm764_vm8, %v1378_v17, 0.0  ;;  %v1462_v17 = vperm.slane %v3115_v55, 4 }
 0x749   : > { %v1351_v46 = vpop.f32.mrf.mxu3 }
 0x74a   : > { %v1384_v49 = vsel %vm764_vm8, %v1351_v46, 0.0 }
 0x74b   : > { %v1385_v58 = vadd.f32 %v1384_v49, %v1383_v61 }
 0x74d   : > { %v1387_v47 = vadd.f32 %v1386_v48, %v1385_v58 }
 0x74f   : > { %v1396_v7 = vadd.f32 %v1395_v59, %v1387_v47 }
 0x751   : > { %v1353_v3 = vpop.f32.mrf.mxu3  ;;  %v1398_v4 = vadd.f32 %v1396_v7, %v3106_v52  ;;  %v1408_v52 = vsub.f32 1.0, %v1407_v24  ;;  %v2141_v7 = vld [vmem:[%s3091_s30 + $0x18] sm:$0xff] }
 0x752   : > { %v1391_v51 = vsel %vm764_vm8, %v1353_v3, 0.0  ;;  %1552 = vmatpush.bf16.msrb.mxu2 %v2141_v7  ;;  %v1608_v7 = vperm.slane %v3115_v55, 6 }
 0x753   : > { %v1392_v5 = vadd.f32 %v1391_v51, %v1390_v2  ;;  %v1400_v1 = vsel %vm764_vm8, %v1398_v4, 0.0  ;;  %v1409_v15 = vmul.f32 %v2354_v14, %v1408_v52  ;;  %v2139_v2 = vld [vmem:[%s3091_s30 + $0x8] sm:$0xff] }
 0x754   : > { %1401 = vadd.xlane.f32.xlu1 %v1400_v1 }
 0x755   : > { %v1394_v8 = vadd.f32 %v1393_v6, %v1392_v5  ;;  %v1410_v16 = vadd.f32 %v2354_v14, %v1409_v15 }
 0x756   : > { %1553 = vmatpush.bf16.msrb.mxu2 %v2140_v63 }
 0x757   : > { %v1397_v9 = vadd.f32 %v1395_v59, %v1394_v8  ;;  %v3276_v18 = vsel %vm1411_vm11, %v2354_v14, %v1410_v16 }
 0x759   : > { %v1399_v11 = vadd.f32 %v1397_v9, %v3108_v53 }
 0x75a   : > { %1554 = vmatpush.bf16.msrb.mxu2 %v2139_v2 }
 0x75b   : > { %v1403_v12 = vsel %vm764_vm8, %v1399_v11, 0.0 }
 0x75c   : > { %1404 = vadd.xlane.f32.xlu0 %v1403_v12 }
 0x7c7   : > { %v1402_v19 = vpop.xlane.xlu1 %1401 }
 0x7c8   : > { %v1413_v20 = vmul.f32 %v3276_v18, %v1402_v19 }
 0x7ca   : > { %v1415_v21 = vsub.f32 %v1398_v4, %v1413_v20  ;;  %v2138_v4 = vld [vmem:[%s3091_s30] sm:$0xff] }
 0x7cb   : > { %1555 = vmatpush.bf16.msrb.mxu2 %v2138_v4 }
 0x7cc   : > { %v1417_v53 = vmul.f32 %v1415_v21, %v1415_v21 }
 0x7ce   : > { %v1419_v22 = vsel %vm764_vm8, %v1417_v53, 0.0 }
 0x7cf   : > { %1420 = vadd.xlane.f32.xlu2 %v1419_v22  ;;  %v1405_v23 = vpop.xlane.xlu0 %1404 }
 0x7d0   : > { %v1414_v25 = vmul.f32 %v3276_v18, %v1405_v23 }
 0x7d2   : > { %v1416_v10 = vsub.f32 %v1399_v11, %v1414_v25 }
 0x7d4   : > { %v1418_v28 = vmul.f32 %v1416_v10, %v1416_v10 }
 0x7d6   : > { %v1422_v29 = vsel %vm764_vm8, %v1418_v28, 0.0  ;;  %v1519_v28 = vperm.slane %v3115_v55, 5 }
 0x7d7   : > { %1423 = vadd.xlane.f32.xlu1 %v1422_v29 }
 0x842   : > { %v1421_v56 = vpop.xlane.xlu2 %1420 }
 0x843   : > { %v1425_v31 = vmul.f32 %v1421_v56, %v3276_v18 }
 0x845   : > { %v1427_v32 = vadd.f32 1e-12, %v1425_v31 }
 0x847   : > { %2355 = vrsqrt.f32 %v1427_v32  ;;  %vm1435_vm13 = vweird.f32 %v1427_v32 }
 0x84a   : > { %v1424_v50 = vpop.xlane.xlu1 %1423 }
 0x84b   : > { %v1426_v34 = vmul.f32 %v1424_v50, %v3276_v18 }
 0x84d   : > { %v2356_v26 = vpop.eup %2355  ;;  %v1428_v60 = vadd.f32 1e-12, %v1426_v34 }
 0x84e   : > { %v1430_v35 = vmul.f32 %v2356_v26, %v1427_v32  ;;  %vm1436_vm12 = vweird.f32 %v2356_v26 }
 0x84f   : > { %2357 = vrsqrt.f32 %v1428_v60  ;;  %vm1437_vm14 = vmor %vm1435_vm13, %vm1436_vm12  ;;  %vm1445_vm0 = vweird.f32 %v1428_v60 }
 0x850   : > { %v1431_v36 = vmul.f32 %v2356_v26, %v1430_v35 }
 0x852   : > { %v1432_v37 = vmul.f32 0.5, %v1431_v36 }
 0x854   : > { %v1433_v38 = vsub.f32 1.5, %v1432_v37 }
 0x855   : > { %v2358_v39 = vpop.eup %2357 }
 0x856   : > { %v1434_v40 = vmul.f32 %v2356_v26, %v1433_v38  ;;  %v1440_v41 = vmul.f32 %v2358_v39, %v1428_v60  ;;  %vm1446_vm15 = vweird.f32 %v2358_v39 }
 0x857   : > { %vm1447_vm1 = vmor %vm1445_vm0, %vm1446_vm15 }
 0x858   : > { %v1441_v57 = vmul.f32 %v2358_v39, %v1440_v41  ;;  %v1438_v42 = vsel %vm1437_vm14, %v2356_v26, %v1434_v40 }
 0x859   : > { %v1449_v61 = vmul.f32 %v1438_v42, %v1415_v21 }
 0x85a   : > { %v1442_v43 = vmul.f32 0.5, %v1441_v57 }
 0x85b   : > { %v1452_v58 = vmul.f32 %v1451_v45, %v1449_v61 }
 0x85c   : > { %v1443_v44 = vsub.f32 1.5, %v1442_v43 }
 0x85d   : > { %v1455_v62 = vadd.f32 %v1454_v54, %v1452_v58 }
 0x85e   : > { %v1444_v46 = vmul.f32 %v2358_v39, %v1443_v44 }
 0x860   : > { %v1448_v49 = vsel %vm1447_vm1, %v2358_v39, %v1444_v46 }
 0x861   : > { %v1450_v59 = vmul.f32 %v1448_v49, %v1416_v10 }
 0x863   : > { %v1453_v48 = vmul.f32 %v1451_v45, %v1450_v59 }
 0x865   : > { %v1456_v47 = vadd.f32 %v1454_v54, %v1453_v48 }
 0x867   : > { %v1457_v27 = vpack.c.bf16 %v1456_v47, %v1455_v62 }
 0x869   : > { %2078 = vmatmul.msk.bf16.vlgmr.msrb.gmra.mxu1 %vm764_vm8, %v1457_v27 }
 0x8e6   : > { %v1487_v3 = vpop.f32.mrf.mxu1 }
 0x8e7   : > { %v1488_v51 = vadd.f32 %v1487_v3, %v1462_v17 }
 0x8e9   : > { %v1492_v5 = vmul.f32 %v1488_v51, %v1488_v51 }
 0x8eb   : > { %v1494_v1 = vmul.f32 %v1492_v5, %v1488_v51 }
 0x8ed   : > { %v1496_v6 = vmul.f32 0.044715, %v1494_v1 }
 0x8ee   : > { %v1489_v8 = vpop.f32.mrf.mxu1 }
 0x8ef   : > { %v1498_v9 = vadd.f32 %v1496_v6, %v1488_v51  ;;  %v1490_v11 = vadd.f32 %v1489_v8, %v1462_v17  ;;  %v1611_v17 = vperm.slane %v3115_v55, 7 }
 0x8f1   : > { %v1500_v12 = vmul.f32 0.7978846, %v1498_v9  ;;  %v1493_v13 = vmul.f32 %v1490_v11, %v1490_v11 }
 0x8f3   : > { %v1495_v14 = vmul.f32 %v1493_v13, %v1490_v11  ;;  %2359 = vtanh.f32 %v1500_v12 }
 0x8f5   : > { %v1497_v24 = vmul.f32 0.044715, %v1495_v14 }
 0x8f7   : > { %v1499_v52 = vadd.f32 %v1497_v24, %v1490_v11 }
 0x8f9   : > { %v1501_v15 = vmul.f32 0.7978846, %v1499_v52  ;;  %v2360_v16 = vpop.eup %2359 }
 0x8fa   : > { %v1504_v19 = vadd.f32 1.0, %v2360_v16 }
 0x8fb   : > { %2361 = vtanh.f32 %v1501_v15 }
 0x8fc   : > { %v1506_v21 = vmul.f32 0.5, %v1504_v19 }
 0x8fe   : > { %v1508_v23 = vmul.f32 %v1506_v21, %v1488_v51 }
 0x901   : > { %v2362_v20 = vpop.eup %2361 }
 0x902   : > { %v1505_v53 = vadd.f32 1.0, %v2362_v20 }
 0x904   : > { %v1507_v22 = vmul.f32 0.5, %v1505_v53 }
 0x906   : > { %v1509_v25 = vmul.f32 %v1507_v22, %v1490_v11 }
 0x908   : > { %v1510_v10 = vpack.c.bf16 %v1509_v25, %v1508_v23 }
 0x90a   : > { %2095 = vmatmul.msk.bf16.vlgmr.msrb.gmra.mxu2 %vm1544_vm2, %v1510_v10 }
 0x98d   : > { %v1557_v29 = vpop.f32.mrf.mxu2 }
 0x98e   : > { %v1558_v30 = vadd.f32 %v1557_v29, %v1519_v28 }
 0x990   : > { %v1562_v56 = vadd.f32 %v1558_v30, %v1455_v62 }
 0x992   : > { %v1564_v31 = vsel %vm764_vm8, %v1562_v56, 0.0 }
 0x993   : > { %1565 = vadd.xlane.f32.xlu0 %v1564_v31 }
 0x995   : > { %v1559_v32 = vpop.f32.mrf.mxu2 }
 0x996   : > { %v1560_v33 = vadd.f32 %v1559_v32, %v1519_v28 }
 0x998   : > { %v1563_v50 = vadd.f32 %v1560_v33, %v1456_v47 }
 0x99a   : > { %v1567_v34 = vsel %vm764_vm8, %v1563_v50, 0.0 }
 0x99b   : > { %1568 = vadd.xlane.f32.xlu1 %v1567_v34 }
 0xa06   : > { %v1566_v26 = vpop.xlane.xlu0 %1565 }
 0xa07   : > { %v1570_v60 = vmul.f32 %v1566_v26, %v3276_v18 }
 0xa09   : > { %v1572_v35 = vsub.f32 %v1562_v56, %v1570_v60 }
 0xa0b   : > { %v1574_v36 = vmul.f32 %v1572_v35, %v1572_v35 }
 0xa0d   : > { %v1576_v37 = vsel %vm764_vm8, %v1574_v36, 0.0 }
 0xa0e   : > { %v1569_v38 = vpop.xlane.xlu1 %1568  ;;  %1577 = vadd.xlane.f32.xlu0 %v1576_v37 }
 0xa0f   : > { %v1571_v39 = vmul.f32 %v1569_v38, %v3276_v18 }
 0xa11   : > { %v1573_v40 = vsub.f32 %v1563_v50, %v1571_v39 }
 0xa13   : > { %v1575_v41 = vmul.f32 %v1573_v40, %v1573_v40 }
 0xa15   : > { %v1579_v57 = vsel %vm764_vm8, %v1575_v41, 0.0 }
 0xa16   : > { %1580 = vadd.xlane.f32.xlu1 %v1579_v57 }
 0xa81   : > { %v1578_v42 = vpop.xlane.xlu0 %1577 }
 0xa82   : > { %v1582_v43 = vmul.f32 %v1578_v42, %v3276_v18 }
 0xa84   : > { %v1584_v44 = vadd.f32 1e-12, %v1582_v43 }
 0xa86   : > { %2363 = vrsqrt.f32 %v1584_v44  ;;  %vm1592_vm4 = vweird.f32 %v1584_v44 }
 0xa89   : > { %v1581_v45 = vpop.xlane.xlu1 %1580 }
 0xa8a   : > { %v1583_v61 = vmul.f32 %v1581_v45, %v3276_v18 }
 0xa8c   : > { %v2364_v46 = vpop.eup %2363  ;;  %v1585_v49 = vadd.f32 1e-12, %v1583_v61 }
 0xa8d   : > { %v1587_v54 = vmul.f32 %v2364_v46, %v1584_v44  ;;  %vm1593_vm3 = vweird.f32 %v2364_v46 }
 0xa8e   : > { %2365 = vrsqrt.f32 %v1585_v49  ;;  %vm1594_vm5 = vmor %vm1592_vm4, %vm1593_vm3  ;;  %vm1602_vm7 = vweird.f32 %v1585_v49 }
 0xa8f   : > { %v1588_v58 = vmul.f32 %v2364_v46, %v1587_v54 }
 0xa91   : > { %v1589_v59 = vmul.f32 0.5, %v1588_v58 }
 0xa93   : > { %v1590_v48 = vsub.f32 1.5, %v1589_v59 }
 0xa94   : > { %v2366_v62 = vpop.eup %2365 }
 0xa95   : > { %v1591_v47 = vmul.f32 %v2364_v46, %v1590_v48  ;;  %v1597_v27 = vmul.f32 %v2366_v62, %v1585_v49  ;;  %vm1603_vm6 = vweird.f32 %v2366_v62 }
 0xa96   : > { %vm1604_vm9 = vmor %vm1602_vm7, %vm1603_vm6 }
 0xa97   : > { %v1595_v63 = vsel %vm1594_vm5, %v2364_v46, %v1591_v47  ;;  %v1598_v2 = vmul.f32 %v2366_v62, %v1597_v27 }
 0xa98   : > { %v1606_v18 = vmul.f32 %v1595_v63, %v1572_v35 }
 0xa99   : > { %v1599_v3 = vmul.f32 0.5, %v1598_v2 }
 0xa9a   : > { %v1609_v4 = vmul.f32 %v1608_v7, %v1606_v18 }
 0xa9b   : > { %v1600_v51 = vsub.f32 1.5, %v1599_v3 }
 0xa9c   : > { %v1612_v5 = vadd.f32 %v1611_v17, %v1609_v4 }
 0xa9d   : > { %v1601_v1 = vmul.f32 %v2366_v62, %v1600_v51 }
 0xa9e   : > { %1614 = vst.msk [vmem:[#allocation2] sm:$0xff] %vm764_vm8, %v1612_v5 }
 0xa9f   : > { %v1605_v6 = vsel %vm1604_vm9, %v2366_v62, %v1601_v1 }
 0xaa0   : > { %v1607_v8 = vmul.f32 %v1605_v6, %v1573_v40 }
 0xaa2   : > { %v1610_v9 = vmul.f32 %v1608_v7, %v1607_v8  ;;  %1619 = sbr.rel (%p2096_p8) target bundleno = 3144 (0xc48), region = 100 }
 0xaa4   : > { %v1613_v11 = vadd.f32 %v1611_v17, %v1610_v9 }
 0xaa6   : > { %1615 = vst.msk [vmem:[#allocation2 + $0x8] sm:$0xff] %vm764_vm8, %v1613_v11 }
 0xaa7   : > { %v2143_v55 = vld [vmem:[#allocation10 + $0x8] sm:$0xff]  ;;  %v1621_v12 = vrot.slane %v1613_v11, 7  ;;  %vm1623_vm10 = vcmask 1040384   ;;  %v2142_v13 = vld [vmem:[#allocation10] sm:$0xff]  ;;  %v2145_v52 = vld [vmem:[#allocation11 + $0x8] sm:$0xff]  ;;  %v1630_v16 = vperm.slane %v3078_v0, 2 }
 0xaa8   : > { %1652 = vmatpush.bf16.msra.mxu0 %v2143_v55  ;;  %1689 = vmatpush.bf16.msra.mxu1 %v2145_v52  ;;  %v2144_v15 = vld [vmem:[#allocation11] sm:$0xff]  ;;  %vm1660_vm11 = vcmask 254976   ;;  %v2147_v23 = vld [vmem:[#allocation13 + $0x8] sm:$0xff]  ;;  %v2146_v25 = vld [vmem:[#allocation13] sm:$0xff]  ;;  %v1667_v10 = vperm.slane %v3078_v0, 3  ;;  %v1702_v32 = vperm.slane %v3078_v0, 4 }
 0xaa9   : > { %v1624_v14 = vsel %vm1623_vm10, %v1612_v5, %v1621_v12  ;;  %1724 = vmatpush.bf16.msra.mxu2 %v2147_v23 }
 0xaaa   : > { %v1625_v24 = vpack.c.bf16 %v1624_v14, %v1624_v14 }
 0xaac   : > { %1653 = vmatpush.bf16.msra.mxu0 %v2142_v13  ;;  %1690 = vmatpush.bf16.msra.mxu1 %v2144_v15 }
 0xaad   : > { %1725 = vmatpush.bf16.msra.mxu2 %v2146_v25 }
 0xaaf   : > { %2105 = vmatmul.msk.bf16.vlgmr.msra.gmra.mxu0 %vm764_vm8, %v1625_v24 }
 0xb2c   : > { %v1655_v19 = vpop.f32.mrf.mxu0 }
 0xb2d   : > { %v1656_v20 = vadd.f32 %v1655_v19, %v1630_v16 }
 0xb2f   : > { %2367 = vtanh.f32 %v1656_v20 }
 0xb34   : > { %v1657_v21 = vpop.f32.mrf.mxu0 }
 0xb35   : > { %v2368_v53 = vpop.eup %2367 }
 0xb36   : > { %1661 = vst.msk [vmem:[%s646_s7] sm:$0x3] %vm1660_vm11, %v2368_v53  ;;  %v1662_v22 = vpack.c.bf16 %v2368_v53, %v2368_v53 }
 0xb38   : > { %2114 = vmatmul.msk.bf16.vlgmr.msra.gmra.mxu1 %vm764_vm8, %v1662_v22 }
 0xbb5   : > { %v1692_v28 = vpop.f32.mrf.mxu1 }
 0xbb6   : > { %v1693_v29 = vadd.f32 %v1692_v28, %v1667_v10 }
 0xbb8   : > { %v1696_v30 = vmax.f32 %v1693_v29, 0.0 }
 0xbba   : > { %v1697_v56 = vpack.c.bf16 %v1696_v30, %v1696_v30 }
 0xbbc   : > { %2123 = vmatmul.msk.bf16.vlgmr.msra.gmra.mxu2 %vm764_vm8, %v1697_v56 }
 0xbbd   : > { %v1694_v31 = vpop.f32.mrf.mxu1 }
 0xc3f   : > { %v1727_v33 = vpop.f32.mrf.mxu2 }
 0xc40   : > { %v1728_v50 = vadd.f32 %v1727_v33, %v1702_v32 }
 0xc42   : > { %1731 = vst [vmem:[%s653_s3] sm:$0x3] %v1728_v50 }
 0xc47   : > { %v1729_v34 = vpop.f32.mrf.mxu2 }
 0xc48 PF: > { %s3473_s13 = sld [smem:[#allocation47_spill]]  ;;  %s1750_s12 = sshll.u32 %s646_s7, 4  ;;  %s1751_s12 = int_to_ptr.vmem [resolvable:$true] %s1750_s12 }
 0xc49   : > { %s1733_s16 = scalar_lea.sflag [#allocation5], %s3033_s20 }
 0xc4e   : > { %s3474_s6 = smov %s3473_s13  ;;  %s1748_s21 = scalar_lea.hbm %s3473_s13, %s3067_s9 }
 0xc4f   : > { %s1752_s18 = sshll.u32 %s1748_s21, 4  ;;  %s2599_s27 = scalar_lea.hbm %s3474_s6, 4  ;;  %s1753_s18 = int_to_ptr.hbm [resolvable:$true] %s1752_s18 }
 0xc50   : > { %s2593_s26 = sshra.s32 %s1753_s18, 4  ;;  %s2594_s26 = int_to_ptr.hbm [resolvable:$true] %s2593_s26 }
 0xc51   : > { %s2595_s30 = scalar_lea.hbm %s2594_s26, 2  ;;  %p2600_p11 = scmp.lt.s32.totalorder %s2594_s26, %s3474_s6 }
 0xc52   : > { %p2596_p2 = scmp.ne.s32.totalorder %s2594_s26, %s2595_s30  ;;  %p2601_p0 = scmp.lt.s32.totalorder %s2599_s27, %s2595_s30 }
 0xc54   : > { %p2597_p1 = pnand %p2596_p2, %p2951_p4  ;;  %p2602_p5 = por %p2601_p0, %p2600_p11 }
 0xc56   : > { %p2598_p9 = pneg %p2597_p1 }
 0xc58   : > { %p2603_p3 = pnand %p2602_p5, %p2598_p9 }
 0xc5a   : > { %2606 = shalt.err (!%p2603_p3)
}
 0xc5b   : > { %2170 = dma.vmem_to_hbm [thread:$0]  (%p2951_p4), %s1751_s12, 32, %s1753_s18, %s1733_s16  }
 0xc5c   : > { %s3476_s23 = sld [smem:[#allocation48_spill]]  ;;  %s1764_s17 = sshll.u32 %s653_s3, 4  ;;  %s1765_s17 = int_to_ptr.vmem [resolvable:$true] %s1764_s17 }
 0xc5d   : > { %s1738_s14 = scalar_lea.sflag [#allocation16], %s3033_s20 }
 0xc62   : > { %s3477_s19 = smov %s3476_s23  ;;  %s1762_s24 = scalar_lea.hbm %s3476_s23, %s3067_s9 }
 0xc63   : > { %s1766_s28 = sshll.u32 %s1762_s24, 4  ;;  %s2627_s12 = scalar_lea.hbm %s3477_s19, 4  ;;  %s1767_s28 = int_to_ptr.hbm [resolvable:$true] %s1766_s28 }
 0xc64   : > { %s2621_s13 = sshra.s32 %s1767_s28, 4  ;;  %s2622_s13 = int_to_ptr.hbm [resolvable:$true] %s2621_s13 }
 0xc65   : > { %s2623_s21 = scalar_lea.hbm %s2622_s13, 2  ;;  %p2628_p6 = scmp.lt.s32.totalorder %s2622_s13, %s3477_s19 }
 0xc66   : > { %p2624_p12 = scmp.ne.s32.totalorder %s2622_s13, %s2623_s21  ;;  %p2629_p8 = scmp.lt.s32.totalorder %s2627_s12, %s2623_s21 }
 0xc68   : > { %p2625_p7 = pnand %p2624_p12, %p2951_p4  ;;  %p2630_p2 = por %p2629_p8, %p2628_p6 }
 0xc6a   : > { %p2626_p13 = pneg %p2625_p7 }
 0xc6c   : > { %p2631_p1 = pnand %p2630_p2, %p2626_p13 }
 0xc6e   : > { %2634 = shalt.err (!%p2631_p1)
}
 0xc6f   : > { %2171 = dma.vmem_to_hbm [thread:$0]  (%p2951_p4), %s1765_s17, 32, %s1767_s28, %s1738_s14  }
 0xc70 PF: > { %s3478_s20 = sld [smem:[#allocation30_spill]] }
 0xc71   : > { %s3479_s1 = sld [smem:[#allocation25_spill]] }
 0xc76   : > { %p2213_p9 = scmp.ge.s32.totalorder %s3478_s20, 2 }
 0xc77   : > { %s1778_s3 = sand.u32 1, %s3479_s1  }
 0xc78   : > { %p2198_p11 = pnand %p2213_p9, %p2958_p10  ;;  %s1779_s5 = scalar_lea.sflag [#allocation5], %s1778_s3 }
 0xc7a   : > { %p2199_p0 = pneg %p2198_p11 }
 0xc7c   : > { %2700 = dma.done.wait (%p2199_p0), %s1779_s5, 32  }
 0xc7d   : > { %2702 = vsyncadd (%p2199_p0), %s1779_s5, 4294967264  ;;  %s1789_s4 = scalar_lea.sflag [#allocation16], %s1778_s3 }
 0xc7e   : > { %2704 = dma.done.wait (%p2199_p0), %s1789_s4, 32  }
 0xc7f   : > { %2706 = vsyncadd (%p2199_p0), %s1789_s4, 4294967264  ;;  %s34_s13 = sadd.s32 1, %s3478_s20   ;;  %s3481_s15 = sld [smem:[#allocation24_spill]] }
 0xc80   : > { %p31_p5 = scmp.ge.s32.totalorder %s34_s13, 6   ;;  %s3482_s23 = sld [smem:[#allocation33_spill]] }
 0xc81   : > { %s3483_s27 = sld [smem:[#allocation26_spill]]  ;;  %s3488_s21 = smov %s2713_s22 }
 0xc82   : > { %s3484_s26 = sld [smem:[#allocation34_spill]]  ;;  %s3490_s24 = smov %s2725_s25 }
 0xc83   : > { %s3485_s28 = sld [smem:[#allocation29_spill]] }
 0xc84   : > { %s3486_s2 = sld [smem:[#allocation31_spill]] }
 0xc85   : > { %s3487_s30 = sld [smem:[#allocation32_spill]]  ;;  %s3489_s22 = smov %s3481_s15 }
 0xc86   :  { %33 = sbr.rel (!%p31_p5) target bundleno = 25 (0x19), region = 184 }
 0xc87   : > { %s3491_s25 = smov %s3483_s27  ;;  %s3492_s27 = smov %s2741_s29 }
 0xc8a   : > { %s3493_s29 = smov %s3486_s2 }
 0xc8b   :  { %1795 = vsyncpa [#allocation4], 1 }
 0xc8c   :  { %1797 = vsyncpa [#allocation4 + $0x1], 1 }
 0xc8d   :  { %1798 = vsyncpa [#allocation7], 1 }
 0xc8e   :  { %1799 = vsyncpa [#allocation12], 1 }
 0xc8f   :  { %1800 = vsyncpa [#allocation5], 1 }
 0xc90   :  { %1802 = vsyncpa [#allocation5 + $0x1], 1 }
 0xc91   :  { %1803 = vsyncpa [#allocation16], 1 }
 0xc92   :  { %1805 = vsyncpa [#allocation16 + $0x1], 1 }

// kernel: tpu_custom_call.1
= control target key start
LH: loop header
LB: loop body
LE: loop exit
PB: predicated region body
PF: predicated region fallthrough
CT: control target
= control target key end

     0   :  { %s3391_s0 = inlined_call_operand.vmem [shape: f32[32,32], index: 0, kind: input, shape index: {}]   ;;  %s3392_s1 = inlined_call_operand.hbm [shape: f32[2,2,8], index: 1, kind: input, shape index: {}]   ;;  %s3393_s2 = inlined_call_operand.hbm [shape: f32[8,128], index: 2, kind: input, shape index: {}]   ;;  %s3394_s3 = inlined_call_operand.vmem [shape: bf16[2,32,96], index: 3, kind: input, shape index: {}]   ;;  %s3395_s4 = inlined_call_operand.vmem [shape: bf16[2,4,8,32], index: 4, kind: input, shape index: {}]   ;;  %s3396_s5 = inlined_call_operand.hbm [shape: bf16[2,32,64], index: 5, kind: input, shape index: {}]   ;;  %s3397_s6 = inlined_call_operand.vmem [shape: bf16[2,64,32], index: 6, kind: input, shape index: {}]   ;;  %s3398_s7 = inlined_call_operand.hbm [shape: f32[2,8,96], index: 7, kind: input, shape index: {}]   ;;  %s3399_s8 = inlined_call_operand.hbm [shape: bf16[32,32], index: 8, kind: input, shape index: {}]   ;;  %s3400_s9 = inlined_call_operand.hbm [shape: bf16[32,32], index: 9, kind: input, shape index: {}]   ;;  %s3401_s10 = inlined_call_operand.hbm [shape: bf16[32,128], index: 10, kind: input, shape index: {}]   ;;  %s3402_s11 = inlined_call_operand.hbm [shape: f32[2,2,32], index: 11, kind: output, shape index: {0}]   ;;  %s3403_s12 = inlined_call_operand.hbm [shape: f32[2,2,128], index: 12, kind: output, shape index: {1}]  }
   0x1   :  { %3421 = sst [smem:[#allocation38_spill]] %s3391_s0 }
   0x2   :  { %3422 = sst [smem:[#allocation39_spill]] %s3392_s1 }
   0x3   :  { %3423 = sst [smem:[#allocation40_spill]] %s3393_s2 }
   0x4   :  { %3424 = sst [smem:[#allocation41_spill]] %s3394_s3 }
   0x5   :  { %3425 = sst [smem:[#allocation42_spill]] %s3395_s4 }
   0x6   :  { %3426 = sst [smem:[#allocation43_spill]] %s3396_s5 }
   0x7   :  { %3427 = sst [smem:[#allocation44_spill]] %s3397_s6 }
   0x8   :  { %3428 = sst [smem:[#allocation45_spill]] %s3398_s7 }
   0x9   :  { %3429 = sst [smem:[#allocation46_spill]] %s3400_s9 }
   0xa   :  { %3430 = sst [smem:[#allocation47_spill]] %s3402_s11 }
   0xb   :  { %3431 = sst [smem:[#allocation48_spill]] %s3403_s12 }
   0xc   :  { %18 = vsyncpa [#allocation4], 0 }
   0xd   :  { %20 = vsyncpa [#allocation4 + $0x1], 0 }
   0xe   :  { %21 = vsyncpa [#allocation7], 0 }
   0xf   :  { %22 = vsyncpa [#allocation12], 0 }
  0x10   :  { %23 = vsyncpa [#allocation5], 0 }
  0x11   :  { %25 = vsyncpa [#allocation5 + $0x1], 0 }
  0x12   :  { %26 = vsyncpa [#allocation16], 0 }
  0x13   :  { %28 = vsyncpa [#allocation16 + $0x1], 0  ;;  %s2829_s21 = smov 0   ;;  %s2831_s22 = smov 0  }
  0x14   :  { %s2833_s23 = smov 0   ;;  %s2835_s24 = smov 0  }
  0x15   :  { %s2837_s25 = smov 0   ;;  %s2839_s26 = smov 0  }
  0x16   :  { %s2841_s27 = smov 0   ;;  %s2843_s28 = smov 0  }
  0x17   :  { %s2845_s29 = smov 0   ;;  %s2847_s30 = smov 0  }
  0x18   :  { %s2849_s13 = smov 0  }
  0x19 LB: > { %3432 = sst [smem:[#allocation24_spill]] %s2717_s23  ;;  %s2885_s14 = sadd.s32 4294967295, %s2749_s13   ;;  %s2749_s13 = sphi %s2849_s13, %s34_s13   ;;  %s2745_s30 = sphi %s2847_s30, %s3487_s30   ;;  %s2741_s29 = sphi %s2845_s29, %s3493_s29   ;;  %s2737_s28 = sphi %s2843_s28, %s3485_s28   ;;  %s2733_s27 = sphi %s2841_s27, %s3492_s27   ;;  %s2729_s26 = sphi %s2839_s26, %s3484_s26   ;;  %s2725_s25 = sphi %s2837_s25, %s3491_s25   ;;  %s2721_s24 = sphi %s2835_s24, %s3490_s24   ;;  %s2717_s23 = sphi %s2833_s23, %s3482_s23   ;;  %s2713_s22 = sphi %s2831_s22, %s3489_s22   ;;  %s2709_s21 = sphi %s2829_s21, %s3488_s21  }
  0x1a   : > { %3433 = sst [smem:[#allocation25_spill]] %s2721_s24  ;;  %s2008_s15 = sadd.s32 4294967294, %s2749_s13  }
  0x1b   : > { %3434 = sst [smem:[#allocation26_spill]] %s2729_s26  ;;  %s43_s16 = sadd.s32 1, %s2741_s29 }
  0x1c   : > { %3435 = sst [smem:[#allocation27_spill]] %s2733_s27  ;;  %s46_s17 = sadd.s32 1, %s2745_s30 }
  0x1d   : > { %3436 = sst [smem:[#allocation28_spill]] %s2737_s28  ;;  %p44_p0 = scmp.ge.s32.totalorder %s43_s16, 2 }
  0x1e   : > { %3437 = sst [smem:[#allocation29_spill]] %s2745_s30  ;;  %s79_s18 = sadd.s32 1, %s2729_s26 }
  0x1f   : > { %3438 = sst [smem:[#allocation30_spill]] %s2749_s13  ;;  %p86_p1 = scmp.ne.s32.totalorder %s2729_s26, %s2725_s25 }
  0x20   : > { %p87_p2 = scmp.eq.s32.totalorder %s2749_s13, 0  ;;  %s3495_s16 = smov (%p44_p0, %s43_s16), 0 }
  0x21   : > { %3439 = sst [smem:[#allocation31_spill]] %s3495_s16  ;;  %s3497_s17 = smov (!%p44_p0, %s46_s17), %s2745_s30 }
  0x22   : > { %p2902_p3 = por %p87_p2, %p86_p1  ;;  %p3407_p4 = scmp.ne.s32.totalorder %s2725_s25, %s2721_s24 }
  0x23   : > { %p48_p5 = scmp.ge.s32.totalorder %s3497_s17, 2  ;;  %p93_p6 = scmp.eq.s32.totalorder %s2885_s14, 0 }
  0x24   : > { %s175_s20 = ssub.s32 %s2741_s29, %s3495_s16  ;;  %s178_s12 = sadd.s32 1, %s2717_s23 }
  0x25   : > { %s3499_s17 = smov (%p48_p5, %s3497_s17), 0  ;;  %p2919_p7 = por %p93_p6, %p3407_p4 }
  0x26   : > { %3441 = sst [smem:[#allocation32_spill]] %s3499_s17  ;;  %p176_p8 = scmp.eq.s32.totalorder %s175_s20, 0 }
  0x27   : > { %s76_s6 = ssub.s32 %s2745_s30, %s3499_s17  ;;  %p185_p9 = scmp.ne.s32.totalorder %s2717_s23, %s2713_s22 }
  0x28   : > { %p77_p10 = scmp.eq.s32.totalorder %s76_s6, 0  ;;  %p191_p11 = scmp.ne.s32.totalorder %s2713_s22, %s2709_s21 }
  0x29   : > { %s2930_s16 = scalar_select %p176_p8, %s2717_s23, %s178_s12  }
  0x2a   : > { %s2933_s4 = scalar_select %p77_p10, %s2729_s26, %s79_s18  }
  0x2b   : > { %3443 = sst [smem:[#allocation33_spill]] %s2930_s16  ;;  %p2937_p12 = por %p185_p9, %p87_p2 }
  0x2c   : > { %3444 = sst [smem:[#allocation34_spill]] %s2933_s4  ;;  %p2943_p13 = por %p191_p11, %p93_p6 }
  0x2d   : > { %p330_p0 = scmp.eq.s32.totalorder %s2885_s14, 3  ;;  %p336_p5 = scmp.eq.s32.totalorder %s2008_s15, 3 }
  0x2e   : > { %s3446_s3 = scalar_select %p2943_p13, 1, 0 }
  0x2f   : > { %p2951_p4 = por %p330_p0, %p86_p1  ;;  %p3450_p8 = scmp.ne.s32.totalorder %s2725_s25, %s2721_s24 }
  0x30   : > { %3447 = sst [smem:[#allocation35_spill]] %s3446_s3  ;;  %p2208_p2 = scmp.lt.s32.totalorder %s2749_s13, 4 }
  0x31   : > { %s3448_s6 = scalar_select %p2951_p4, 1, 0 }
  0x32   : > { %p2958_p10 = por %p336_p5, %p3450_p8  ;;  %s445_s21 = sand.u32 1, %s2749_s13  }
  0x33   : > { %3449 = sst [smem:[#allocation36_spill]] %s3448_s6  ;;  %s447_s18 = sand.u32 1, %s2729_s26  }
  0x34   : > { %s3451_s12 = scalar_select %p2958_p10, 1, 0 }
  0x35   : > { %s2015_s20 = sshll.u32 %s447_s18, 1  ;;  %s2016_s17 = sshll.u32 %s2745_s30, 1 }
  0x36   : > { %3452 = sst [smem:[#allocation37_spill]] %s3451_s12  ;;  %s449_s28 = scalar_lea.vmem [#allocation3], %s2015_s20 }
  0x37   : > { %s3453_s1 = sld [smem:[#allocation39_spill]]  ;;  %s457_s3 = sshll.u32 %s449_s28, 4  ;;  %s458_s3 = int_to_ptr.vmem [resolvable:$true] %s457_s3 }
  0x38   : > { %p2188_p1 = pnand %p2208_p2, %p2902_p3  ;;  %p2973_p9 = pnand %p2208_p2, %p2937_p12 }
  0x39   : > { %s2977_s18 = scalar_lea.sflag [#allocation4], %s445_s21  ;;  %p2009_p11 = scmp.ge.s32.totalorder %s2749_s13, 1 }
  0x3a   : > { %p369_p0 = scmp.lt.s32.totalorder %s2749_s13, 5  ;;  %s3455_s2 = sld [smem:[#allocation40_spill]] }
  0x3b   : > { %s2751_s0 = smov [#allocation6]   ;;  %s3457_s9 = sld [smem:[#allocation46_spill]] }
  0x3c   : > { %p2985_p5 = pnand %p2009_p11, %p369_p0  ;;  %s383_s19 = sshll.u32 %s2751_s0, 4  ;;  %s384_s19 = int_to_ptr.vmem [resolvable:$true] %s383_s19 }
  0x3d   : > { %s453_s15 = scalar_lea.hbm %s3453_s1, %s2016_s17  ;;  %s2752_s4 = smov [#allocation11]  }
  0x3e   : > { %s455_s27 = sshll.u32 %s453_s15, 4  ;;  %p2174_p3 = pneg %p2985_p5  ;;  %s456_s27 = int_to_ptr.hbm [resolvable:$true] %s455_s27 }
  0x3f   : > { %2190 = dma.hbm_to_vmem [thread:$0]  (!%p2188_p1), %s456_s27, 32, %s458_s3, %s2977_s18  }
  0x40   : > { %s381_s28 = sshll.u32 %s3455_s2, 4  ;;  %p2996_p12 = pnand %p2174_p3, %p93_p6  ;;  %s382_s28 = int_to_ptr.hbm [resolvable:$true] %s381_s28 }
  0x41   : > { %s406_s27 = sshll.u32 %s3457_s9, 4  ;;  %s482_s15 = sand.u32 1, %s2717_s23   ;;  %s407_s27 = int_to_ptr.hbm [resolvable:$true] %s406_s27 }
  0x42   : > { %s408_s16 = sshll.u32 %s2752_s4, 4  ;;  %s2017_s0 = sshll.u32 %s482_s15, 4  ;;  %s409_s16 = int_to_ptr.vmem [resolvable:$true] %s408_s16 }
  0x43   : > { %2177 = dma.hbm_to_vmem [thread:$0]  (!%p2996_p12), %s382_s28, 128, %s384_s19, [#allocation7]  }
  0x44   : > { %s2753_s1 = smov 64   ;;  %s2754_s21 = smov 4  }
  0x45   : > { %2183 = dma.hbm_to_vmem [thread:$0]  (!%p2996_p12), %s407_s27, 256, %s409_s16, [#allocation12], %s2753_s1, %s2753_s1, %s2754_s21  }
  0x46   : > { %s2130_s3 = sshll.u32 %s2741_s29, 4  ;;  %s3459_s5 = sld [smem:[#allocation43_spill]] }
  0x47   : > { %s484_s26 = scalar_lea.vmem [#allocation8], %s2017_s0  ;;  %s392_s4 = sshll.u32 %s3399_s8, 4  ;;  %s393_s4 = int_to_ptr.hbm [resolvable:$true] %s392_s4 }
  0x48   : > { %s492_s23 = sshll.u32 %s484_s26, 4  ;;  %s2755_s27 = smov [#allocation10]   ;;  %s493_s23 = int_to_ptr.vmem [resolvable:$true] %s492_s23 }
  0x49   : > { %s394_s16 = sshll.u32 %s2755_s27, 4  ;;  %s420_s2 = sshll.u32 %s3401_s10, 4  ;;  %s395_s16 = int_to_ptr.vmem [resolvable:$true] %s394_s16  ;;  %s421_s2 = int_to_ptr.hbm [resolvable:$true] %s420_s2 }
  0x4a   : > { %2180 = dma.hbm_to_vmem [thread:$0]  (!%p2996_p12), %s393_s4, 256, %s395_s16, [#allocation7], %s2753_s1, %s2753_s1, %s2754_s21  }
  0x4b   : > { %s2020_s9 = sshll.u32 %s482_s15, 3  ;;  %s2756_s26 = smov [#allocation13]  }
  0x4c   : > { %s489_s30 = scalar_lea.hbm %s3459_s5, %s2130_s3  ;;  %s2021_s0 = sshll.u32 %s2741_s29, 3 }
  0x4d   : > { %s490_s24 = sshll.u32 %s489_s30, 4  ;;  %s422_s30 = sshll.u32 %s2756_s26, 4  ;;  %s491_s24 = int_to_ptr.hbm [resolvable:$true] %s490_s24  ;;  %s423_s30 = int_to_ptr.vmem [resolvable:$true] %s422_s30 }
  0x4e   : > { %2193 = dma.hbm_to_vmem [thread:$0]  (!%p2973_p9), %s491_s24, 256, %s493_s23, %s2977_s18, %s2753_s1, %s2753_s1, %s2754_s21  }
  0x4f   : > { %2186 = dma.hbm_to_vmem [thread:$0]  (!%p2996_p12), %s421_s2, 256, %s423_s30, [#allocation12], %s2753_s1, %s2753_s1, %s2754_s21  }
  0x50   : > { %s3460_s7 = sld [smem:[#allocation45_spill]]  ;;  %s514_s28 = scalar_lea.vmem [#allocation9], %s2020_s9 }
  0x51   : > { %s522_s13 = sshll.u32 %s514_s28, 4  ;;  %s533_s15 = sand.u32 (!%p2985_p5), 1, %s2885_s14   ;;  %s523_s13 = int_to_ptr.vmem [resolvable:$true] %s522_s13 }
  0x52   : > { %s3033_s20 = sand.u32 (!%p2985_p5), 1, %s2725_s25   ;;  %s534_s21 = scalar_lea.sflag (!%p2985_p5), [#allocation4], %s533_s15 }
  0x53   : > { %s3036_s1 = sshll.u32 (!%p2985_p5), %s3033_s20, 1 }
  0x54   : > { %531 = sbr.rel (%p2985_p5) target bundleno = 3184 (0xc70), region = 64 }
  0x56   : > { %s518_s3 = scalar_lea.hbm %s3460_s7, %s2021_s0 }
  0x57   : > { %s520_s6 = sshll.u32 %s518_s3, 4  ;;  %s521_s6 = int_to_ptr.hbm [resolvable:$true] %s520_s6 }
  0x58   : > { %2196 = dma.hbm_to_vmem [thread:$0]  (!%p2973_p9), %s521_s6, 128, %s523_s13, %s2977_s18  }
  0x59   : > { %2680 = dma.done.wait (%p2919_p7), %s534_s21, 32  }
  0x5a   : > { %2682 = vsyncadd (%p2919_p7), %s534_s21, 4294967264 }
  0x5b   : > { %2684 = dma.done.wait (%p93_p6), [#allocation7], 128  }
  0x5c   : > { %2686 = vsyncadd (%p93_p6), [#allocation7], 4294967168  ;;  %s550_s18 = sand.u32 1, %s2713_s22  }
  0x5d   : > { %s3048_s17 = sshll.u32 %s550_s18, 4 }
  0x5e   : > { %2688 = dma.done.wait (%p2943_p13), %s534_s21, 384  }
  0x5f   : > { %2690 = vsyncadd (%p2943_p13), %s534_s21, 4294966912  ;;  %s3055_s11 = sshll.u32 %s550_s18, 3 }
  0x60   : > { %2692 = dma.done.wait (%p93_p6), [#allocation7], 256  }
  0x61   : > { %2694 = vsyncadd (%p93_p6), [#allocation7], 4294967040 }
  0x62   : > { %2696 = dma.done.wait (%p93_p6), [#allocation12], 512  }
  0x63   : > { %2698 = vsyncadd (%p93_p6), [#allocation12], 4294966784  ;;  %s3462_s16 = sld [smem:[#allocation28_spill]]  ;;  %v3078_v0 = vld [vmem:[#allocation6] sm:$0xff]  ;;  %s646_s7 = scalar_lea.vmem [#allocation14], %s3036_s1 }
  0x64   : > { %s3463_s2 = sld [smem:[#allocation27_spill]]  ;;  %s653_s3 = scalar_lea.vmem [#allocation15], %s3036_s1 }
  0x65   : > { %s3464_s14 = sld [smem:[#allocation41_spill]] }
  0x66   : > { %s3465_s21 = sld [smem:[#allocation38_spill]] }
  0x67   : > { %s3466_s4 = sld [smem:[#allocation42_spill]] }
  0x69   : > { %s3067_s9 = sshll.u32 %s3462_s16, 1 }
  0x6a   : > { %p660_p7 = scmp.lt.s32.totalorder %s3463_s2, 1  ;;  %p655_p13 = scmp.lt.s32.totalorder %s3067_s9, 3 }
  0x6b   : > { %p2040_p6 = scmp.ne.s32.totalorder %s3463_s2, 0 }
  0x6c   : > { %s661_s26 = scalar_select %p660_p7, %s3463_s2, 1 }
  0x6d   : > { %s656_s30 = scalar_select %p655_p13, %s3067_s9, 3 }
  0x6e   : > { %s2131_s0 = sshll.u32 %s661_s26, 4  ;;  %s2133_s23 = sshll.u32 %s661_s26, 5 }
  0x6f   : > { %s2033_s24 = sshll.u32 %s656_s30, 3  ;;  %s3076_s13 = scalar_lea.vmem %s3464_s14, %s2131_s0 }
  0x70   : > { %s658_s12 = scalar_lea.vmem %s3465_s21, %s2033_s24  ;;  %s3086_s19 = scalar_lea.vmem %s3466_s4, %s2131_s0 }
  0x71   : > { %s3467_s26 = sld [smem:[#allocation44_spill]] }
  0x73   : > { %680 = sbr.rel (%p2040_p6) target bundleno = 398 (0x18e), region = 96 }
  0x77   : > { %s3091_s30 = scalar_lea.vmem %s3467_s26, %s2133_s23 }
  0x78   : > { %v681_v1 = vld [vmem:[%s658_s12] sm:$0xff]  ;;  %vm683_vm0 = vcmask 261120   ;;  %v682_v3 = vld [vmem:[%s658_s12 + $0x8] sm:$0xff]  ;;  %v2757_v5 = vmov 32.0   ;;  %v735_v36 = vperm.slane %v3078_v0, 0  ;;  %v738_v39 = vperm.slane %v3078_v0, 1 }
  0x79   : > { %v684_v2 = vsel %vm683_vm0, %v681_v1, 0.0  ;;  %v687_v4 = vsel %vm683_vm0, %v682_v3, 0.0  ;;  %2315 = vrcp.f32 %v2757_v5 }
  0x7a   : > { %685 = vadd.xlane.f32.xlu0 %v684_v2 }
  0x7f   : > { %v2316_v6 = vpop.eup %2315 }
  0x80   : > { %v691_v7 = vmul.f32 32.0, %v2316_v6  ;;  %vm695_vm1 = vweird.f32 %v2316_v6 }
  0x82   : > { %688 = vadd.xlane.f32.xlu0 %v687_v4  ;;  %v692_v8 = vsub.f32 1.0, %v691_v7 }
  0x84   : > { %v693_v9 = vmul.f32 %v2316_v6, %v692_v8 }
  0x86   : > { %v694_v10 = vadd.f32 %v2316_v6, %v693_v9 }
  0x88   : > { %v696_v11 = vsel %vm695_vm1, %v2316_v6, %v694_v10 }
  0xed   : > { %v686_v12 = vpop.xlane.xlu0 %685 }
  0xee   : > { %v697_v13 = vmul.f32 %v696_v11, %v686_v12 }
  0xf0   : > { %v699_v14 = vsub.f32 %v681_v1, %v697_v13 }
  0xf2   : > { %v701_v15 = vmul.f32 %v699_v14, %v699_v14 }
  0xf4   : > { %v703_v16 = vsel %vm683_vm0, %v701_v15, 0.0 }
  0xf5   : > { %704 = vadd.xlane.f32.xlu1 %v703_v16  ;;  %v689_v17 = vpop.xlane.xlu0 %688 }
  0xf6   : > { %v698_v18 = vmul.f32 %v696_v11, %v689_v17 }
  0xf8   : > { %v700_v19 = vsub.f32 %v682_v3, %v698_v18 }
  0xfa   : > { %v702_v20 = vmul.f32 %v700_v19, %v700_v19 }
  0xfc   : > { %v706_v21 = vsel %vm683_vm0, %v702_v20, 0.0 }
  0xfd   : > { %707 = vadd.xlane.f32.xlu1 %v706_v21 }
 0x168   : > { %v705_v22 = vpop.xlane.xlu1 %704 }
 0x169   : > { %v709_v23 = vmul.f32 %v705_v22, %v696_v11 }
 0x16b   : > { %v711_v24 = vadd.f32 1e-12, %v709_v23 }
 0x16d   : > { %2317 = vrsqrt.f32 %v711_v24  ;;  %vm719_vm3 = vweird.f32 %v711_v24 }
 0x170   : > { %v708_v25 = vpop.xlane.xlu1 %707 }
 0x171   : > { %v710_v26 = vmul.f32 %v708_v25, %v696_v11 }
 0x173   : > { %v2318_v27 = vpop.eup %2317  ;;  %v712_v28 = vadd.f32 1e-12, %v710_v26 }
 0x174   : > { %v714_v29 = vmul.f32 %v2318_v27, %v711_v24  ;;  %vm720_vm2 = vweird.f32 %v2318_v27 }
 0x175   : > { %2319 = vrsqrt.f32 %v712_v28  ;;  %vm721_vm4 = vmor %vm719_vm3, %vm720_vm2  ;;  %vm729_vm6 = vweird.f32 %v712_v28 }
 0x176   : > { %v715_v30 = vmul.f32 %v2318_v27, %v714_v29 }
 0x178   : > { %v716_v31 = vmul.f32 0.5, %v715_v30 }
 0x17a   : > { %v717_v32 = vsub.f32 1.5, %v716_v31 }
 0x17b   : > { %v2320_v33 = vpop.eup %2319 }
 0x17c   : > { %v718_v34 = vmul.f32 %v2318_v27, %v717_v32  ;;  %v724_v35 = vmul.f32 %v2320_v33, %v712_v28  ;;  %vm730_vm5 = vweird.f32 %v2320_v33 }
 0x17d   : > { %vm731_vm7 = vmor %vm729_vm6, %vm730_vm5 }
 0x17e   : > { %v722_v37 = vsel %vm721_vm4, %v2318_v27, %v718_v34  ;;  %v725_v38 = vmul.f32 %v2320_v33, %v724_v35 }
 0x17f   : > { %v733_v40 = vmul.f32 %v722_v37, %v699_v14 }
 0x180   : > { %v726_v41 = vmul.f32 0.5, %v725_v38 }
 0x181   : > { %v736_v42 = vmul.f32 %v735_v36, %v733_v40 }
 0x182   : > { %v727_v43 = vsub.f32 1.5, %v726_v41 }
 0x183   : > { %v739_v44 = vadd.f32 %v738_v39, %v736_v42 }
 0x184   : > { %v728_v45 = vmul.f32 %v2320_v33, %v727_v43 }
 0x185   : > { %741 = vst.msk [vmem:[#allocation2] sm:$0xff] %vm683_vm0, %v739_v44 }
 0x186   : > { %v732_v46 = vsel %vm731_vm7, %v2320_v33, %v728_v45 }
 0x187   : > { %v734_v47 = vmul.f32 %v732_v46, %v700_v19 }
 0x189   : > { %v737_v48 = vmul.f32 %v735_v36, %v734_v47 }
 0x18b   : > { %v740_v49 = vadd.f32 %v738_v39, %v737_v48 }
 0x18d   : > { %742 = vst.msk [vmem:[#allocation2 + $0x8] sm:$0xff] %vm683_vm0, %v740_v49 }
 0x18e PF: > { %v2135_v50 = vld [vmem:[%s3076_s13 + $0x8] sm:$0xff]  ;;  %v2134_v51 = vld [vmem:[%s3076_s13] sm:$0xff]  ;;  %vm764_vm8 = vcmask 261120   ;;  %s3468_s5 = scalar_lea.vmem [#allocation9], %s3055_s11  ;;  %s2758_s4 = smov 56   ;;  %vm805_vm9 = vcmask 64512  }
 0x18f   : > { %774 = vmatpush.bf16.msra.mxu0 %v2135_v50  ;;  %v3106_v52 = vld [vmem:[#allocation2] sm:$0xff]  ;;  %s2759_s27 = smov 104   ;;  %s2760_s2 = smov 80   ;;  %vm956_vm10 = vcmask 1043456   ;;  %vm1544_vm2 = vcmask 523264  }
 0x190   : > { %v3115_v55 = vld [vmem:[%s3468_s5] sm:$0xff]  ;;  %s2761_s11 = smov 120   ;;  %s2762_s0 = smov 112  }
 0x191   : > { %v751_v56 = vperm.slane %v3115_v55, 0  ;;  %s3469_s23 = scalar_lea.vmem [#allocation3], %s3036_s1 }
 0x192   : > { %v798_v22 = vld [vmem:[%s3469_s23] sm:$0x3] }
 0x193   : > { %775 = vmatpush.bf16.msra.mxu0 %v2134_v51  ;;  %v799_v23 = vsub.f32 1.0, %v798_v22 }
 0x194   : > { %v3108_v53 = vld [vmem:[#allocation2 + $0x8] sm:$0xff] }
 0x195   : > { %v746_v54 = vpack.c.bf16 %v3108_v53, %v3106_v52  ;;  %v3150_v24 = vmul.f32 -1e+09, %v799_v23 }
 0x197   : > { %2049 = vmatmul.msk.bf16.vlgmr.msra.gmra.mxu0 %vm764_vm8, %v746_v54  ;;  %v898_v28 = vperm.slane %v3150_v24, 0 }
 0x214   : > { %v777_v57 = vpop.f32.mrf.mxu0 }
 0x215   : > { %v778_v58 = vadd.f32 %v777_v57, %v751_v56 }
 0x217   : > { %v782_v59 = vpack.c.bf16 %v778_v58, %v778_v58 }
 0x219   : > { %794 = vrot.lane.b32.xlu1 %v782_v59, %s2758_s4  ;;  %786 = vrot.lane.b32.xlu0 %v782_v59, %s2759_s27  ;;  %v801_v9 = vunpack.c.l.b16 %v782_v59 }
 0x21b   : > { %v3131_v10 = vpack.c.b16 %v801_v9, %v801_v9 }
 0x21c   : > { %v779_v3 = vpop.f32.mrf.mxu0 }
 0x21d   : > { %v780_v4 = vadd.f32 %v779_v3, %v751_v56 }
 0x21f   : > { %v3123_v7 = vpack.c.bf16 %v780_v4, %v780_v4 }
 0x221   : > { %790 = vrot.lane.b32.xlu0 %v782_v59, %s2760_s2 }
 0x28b   : > { %v795_v60 = vpop.permute.xlu1 %794  ;;  %v787_v61 = vpop.permute.xlu0 %786 }
 0x28c   : > { %v871_v62 = vunpack.c.l.b16 %v795_v60  ;;  %v825_v63 = vunpack.c.l.b16 %v787_v61 }
 0x28e   : > { %v3118_v1 = vpack.c.b16 %v871_v62, %v871_v62  ;;  %v826_v2 = vpack.c.b16 %v825_v63, %v825_v63 }
 0x290   : > { %873 = vrot.lane.b32.xlu0 %v3118_v1, %s2761_s11  ;;  %827 = vrot.lane.b32.xlu1 %v826_v2, %s2761_s11 }
 0x293   : > { %v791_v5 = vpop.permute.xlu0 %790 }
 0x294   : > { %v848_v6 = vunpack.c.l.b16 %v791_v5 }
 0x296   : > { %v3125_v8 = vpack.c.b16 %v848_v6, %v848_v6 }
 0x298   : > { %796 = vrot.lane.b32.xlu0 %v3123_v7, %s2758_s4  ;;  %788 = vrot.lane.b32.xlu1 %v3123_v7, %s2759_s27 }
 0x299   : > { %850 = vrot.lane.b32.xlu2 %v3125_v8, %s2761_s11 }
 0x2a1   : > { %803 = vrot.lane.b32.xlu2 %v3131_v10, %s2761_s11 }
 0x2a9   : > { %792 = vrot.lane.b32.xlu2 %v3123_v7, %s2760_s2 }
 0x2b1   : > { %973 = vrot.lane.b32.xlu2 %v826_v2, %s2762_s0 }
 0x2f3   : > { %v851_v11 = vpop.permute.xlu2 %850 }
 0x2f4   : > { %v856_v12 = vsel %vm805_vm9, %v851_v11, 0 }
 0x2f5   : > { %865 = vmatpush.bf16.xpose.msra.mxu3 %v856_v12 }
 0x2fb   : > { %v804_v13 = vpop.permute.xlu2 %803 }
 0x2fc   : > { %2052 = vmatmul.msk.bf16.vlgmr.msra.gmra.mxu3 %vm805_vm9, %v791_v5  ;;  %v810_v14 = vsel %vm805_vm9, %v804_v13, 0 }
 0x2fd   : > { %819 = vmatpush.bf16.xpose.msra.mxu1 %v810_v14 }
 0x302   : > { %v828_v15 = vpop.permute.xlu1 %827  ;;  %v874_v16 = vpop.permute.xlu0 %873 }
 0x303   : > { %v3140_v17 = vpop.permute.xlu2 %792  ;;  %v833_v18 = vsel %vm805_vm9, %v828_v15, 0  ;;  %v879_v19 = vsel %vm805_vm9, %v874_v16, 0 }
 0x304   : > { %2050 = vmatmul.msk.bf16.vlgmr.msra.gmra.mxu1 %vm805_vm9, %v782_v59  ;;  %842 = vmatpush.bf16.xpose.msra.mxu2 %v833_v18  ;;  %v1082_v44 = vunpack.c.l.b16 %v3140_v17 }
 0x305   : > { %888 = vmatpush.bf16.xpose.msrb.mxu0 %v879_v19 }
 0x306   : > { %v3158_v47 = vpack.c.b16 %v1082_v44, %v1082_v44 }
 0x30a   : > { %v3162_v48 = vpop.permute.xlu1 %788  ;;  %v3173_v51 = vpop.permute.xlu0 %796 }
 0x30b   : > { %v974_v20 = vpop.permute.xlu2 %973  ;;  %2051 = vmatmul.msk.bf16.vlgmr.msra.gmra.mxu2 %vm805_vm9, %v787_v61  ;;  %v1059_v49 = vunpack.c.l.b16 %v3162_v48  ;;  %v1105_v22 = vunpack.c.l.b16 %v3173_v51 }
 0x30c   : > { %2053 = vmatmul.msk.bf16.vlgmr.msrb.gmra.mxu0 %vm805_vm9, %v795_v60  ;;  %v979_v21 = vsel %vm956_vm10, %v974_v20, 0 }
 0x30d   : > { %988 = vmatpush.bf16.msrb.mxu2 %v979_v21  ;;  %v3165_v50 = vpack.c.b16 %v1059_v49, %v1059_v49  ;;  %v1036_v21 = vunpack.c.l.b16 %v3123_v7 }
 0x37f   : > { %v867_v25 = vpop.f32.mrf.mxu3 }
 0x380   : > { %v896_v36 = vmul.f32 0.35355338, %v867_v25 }
 0x381   : > { %v821_v26 = vpop.f32.mrf.mxu1 }
 0x382   : > { %v894_v27 = vmul.f32 0.35355338, %v821_v26  ;;  %v901_v42 = vadd.f32 %v898_v28, %v896_v36  ;;  %v3187_v26 = vpack.c.b16 %v1036_v21, %v1036_v21 }
 0x384   : > { %v899_v29 = vadd.f32 %v898_v28, %v894_v27  ;;  %v909_v46 = vsel %vm805_vm9, %v901_v42, -inf  ;;  %v3189_v27 = vpack.c.b16 %v1105_v22, %v1105_v22 }
 0x386   : > { %v903_v30 = vsel %vm805_vm9, %v899_v29, -inf }
 0x387   : > { %v869_v31 = vpop.f32.mrf.mxu3  ;;  %904 = vmax.xlane.f32.xlu0 %v903_v30 }
 0x389   : > { %v823_v32 = vpop.f32.mrf.mxu1  ;;  %v890_v33 = vpop.f32.mrf.mxu0 }
 0x38a   : > { %v897_v34 = vmul.f32 0.35355338, %v890_v33 }
 0x38c   : > { %v902_v35 = vadd.f32 %v898_v28, %v897_v34 }
 0x38e   : > { %v844_v37 = vpop.f32.mrf.mxu2  ;;  %v912_v38 = vsel %vm805_vm9, %v902_v35, -inf }
 0x38f   : > { %v895_v39 = vmul.f32 0.35355338, %v844_v37  ;;  %913 = vmax.xlane.f32.xlu2 %v912_v38 }
 0x391   : > { %v892_v40 = vpop.f32.mrf.mxu0  ;;  %v900_v41 = vadd.f32 %v898_v28, %v895_v39 }
 0x393   : > { %v906_v43 = vsel %vm805_vm9, %v900_v41, -inf }
 0x394   : > { %907 = vmax.xlane.f32.xlu1 %v906_v43 }
 0x396   : > { %v846_v45 = vpop.f32.mrf.mxu2 }
 0x397   : > { %910 = vmax.xlane.f32.xlu2 %v909_v46 }
 0x39b   : > { %1084 = vrot.lane.b32.xlu0 %v3158_v47, %s2761_s11 }
 0x3ad   : > { %1061 = vrot.lane.b32.xlu1 %v3165_v50, %s2761_s11 }
 0x3af   : > { %994 = vrot.lane.b32.xlu2 %v3125_v8, %s2762_s0 }
 0x3b5   : > { %1015 = vrot.lane.b32.xlu1 %v3118_v1, %s2762_s0 }
 0x3fa   : > { %v905_v54 = vpop.xlane.xlu0 %904 }
 0x3fb   : > { %v915_v56 = vsub.f32 %v899_v29, %v905_v54 }
 0x3fd   : > { %v919_v57 = vmul.f32 1.442695, %v915_v56 }
 0x3ff   : > { %2321 = vpow2.f32 %v919_v57 }
 0x402   : > { %v914_v58 = vpop.xlane.xlu2 %913 }
 0x403   : > { %v918_v59 = vsub.f32 %v902_v35, %v914_v58 }
 0x405   : > { %v2322_v60 = vpop.eup %2321  ;;  %v925_v61 = vmul.f32 1.442695, %v918_v59 }
 0x406   : > { %v927_v62 = vsel %vm805_vm9, %v2322_v60, 0.0 }
 0x407   : > { %2323 = vpow2.f32 %v925_v61  ;;  %928 = vadd.xlane.f32.xlu2 %v927_v62  ;;  %v908_v63 = vpop.xlane.xlu1 %907 }
 0x408   : > { %v916_v2 = vsub.f32 %v900_v41, %v908_v63 }
 0x40a   : > { %v921_v3 = vmul.f32 1.442695, %v916_v2  ;;  %v911_v4 = vpop.xlane.xlu2 %910 }
 0x40b   : > { %v917_v5 = vsub.f32 %v901_v42, %v911_v4 }
 0x40c   : > { %2325 = vpow2.f32 %v921_v3 }
 0x40d   : > { %v2324_v1 = vpop.eup %2323  ;;  %v923_v6 = vmul.f32 1.442695, %v917_v5  ;;  %v1085_v9 = vpop.permute.xlu0 %1084 }
 0x40e   : > { %v936_v8 = vsel %vm805_vm9, %v2324_v1, 0.0  ;;  %v1090_v15 = vsel %vm805_vm9, %v1085_v9, 0 }
 0x40f   : > { %2327 = vpow2.f32 %v923_v6  ;;  %937 = vadd.xlane.f32.xlu0 %v936_v8 }
 0x412   : > { %v2326_v11 = vpop.eup %2325  ;;  %v995_v12 = vpop.permute.xlu2 %994 }
 0x413   : > { %v1000_v13 = vsel %vm956_vm10, %v995_v12, 0  ;;  %v930_v14 = vsel %vm805_vm9, %v2326_v11, 0.0 }
 0x414   : > { %1009 = vmatpush.bf16.msrb.mxu3 %v1000_v13  ;;  %931 = vadd.xlane.f32.xlu1 %v930_v14 }
 0x415   : > { %v2328_v16 = vpop.eup %2327 }
 0x416   : > { %v933_v18 = vsel %vm805_vm9, %v2328_v16, 0.0 }
 0x417   : > { %934 = vadd.xlane.f32.xlu0 %v933_v18 }
 0x418   : > { %1099 = vmatpush.bf16.xpose.msra.mxu3 %v1090_v15 }
 0x41f   : > { %951 = vrot.lane.b32.xlu2 %v3131_v10, %s2762_s0  ;;  %v1062_v19 = vpop.permute.xlu1 %1061 }
 0x420   : > { %v1067_v20 = vsel %vm805_vm9, %v1062_v19, 0 }
 0x421   : > { %1076 = vmatpush.bf16.xpose.msra.mxu2 %v1067_v20 }
 0x427   : > { %v1016_v23 = vpop.permute.xlu1 %1015 }
 0x428   : > { %v1021_v25 = vsel %vm956_vm10, %v1016_v23, 0 }
 0x429   : > { %1030 = vmatpush.bf16.msra.mxu0 %v1021_v25 }
 0x42b   : > { %1038 = vrot.lane.b32.xlu0 %v3187_v26, %s2761_s11 }
 0x42d   : > { %1107 = vrot.lane.b32.xlu1 %v3189_v27, %s2761_s11 }
 0x47a   : > { %v929_v10 = vpop.xlane.xlu2 %928 }
 0x47b   : > { %2329 = vrcp.f32 %v929_v10 }
 0x481   : > { %v2330_v28 = vpop.eup %2329 }
 0x482   : > { %v943_v29 = vmul.f32 %v2330_v28, %v2322_v60  ;;  %v938_v30 = vpop.xlane.xlu0 %937  ;;  %v952_v31 = vpop.permute.xlu2 %951 }
 0x483   : > { %2331 = vrcp.f32 %v938_v30  ;;  %v958_v32 = vsel %vm956_vm10, %v952_v31, 0 }
 0x484   : > { %967 = vmatpush.bf16.msrb.mxu1 %v958_v32  ;;  %v947_v33 = vpack.c.bf16 %v943_v29, %v943_v29 }
 0x487   : > { %2054 = vmatmul.msk.bf16.vlgmr.msrb.gmra.mxu1 %vm805_vm9, %v947_v33  ;;  %v932_v34 = vpop.xlane.xlu1 %931 }
 0x488   : > { %2333 = vrcp.f32 %v932_v34 }
 0x489   : > { %v2332_v35 = vpop.eup %2331 }
 0x48a   : > { %v946_v36 = vmul.f32 %v2332_v35, %v2324_v1  ;;  %v935_v37 = vpop.xlane.xlu0 %934 }
 0x48b   : > { %2335 = vrcp.f32 %v935_v37 }
 0x48c   : > { %v950_v38 = vpack.c.bf16 %v946_v36, %v946_v36 }
 0x48e   : > { %v2334_v39 = vpop.eup %2333  ;;  %2057 = vmatmul.msk.bf16.vlgmr.msra.gmra.mxu0 %vm805_vm9, %v950_v38 }
 0x48f   : > { %v944_v40 = vmul.f32 %v2334_v39, %v2326_v11 }
 0x491   : > { %v2336_v41 = vpop.eup %2335  ;;  %v948_v42 = vpack.c.bf16 %v944_v40, %v944_v40 }
 0x492   : > { %v945_v43 = vmul.f32 %v2336_v41, %v2328_v16 }
 0x493   : > { %2055 = vmatmul.msk.bf16.vlgmr.msrb.gmra.mxu2 %vm805_vm9, %v948_v42 }
 0x494   : > { %v949_v44 = vpack.c.bf16 %v945_v43, %v945_v43 }
 0x496   : > { %2056 = vmatmul.msk.bf16.vlgmr.msrb.gmra.mxu3 %vm805_vm9, %v949_v44 }
 0x49d   : > { %v1039_v45 = vpop.permute.xlu0 %1038 }
 0x49e   : > { %v1044_v46 = vsel %vm805_vm9, %v1039_v45, 0 }
 0x49f   : > { %1053 = vmatpush.bf16.xpose.msra.mxu1 %v1044_v46  ;;  %v1108_v49 = vpop.permute.xlu1 %1107 }
 0x4a0   : > { %v1113_v54 = vsel %vm805_vm9, %v1108_v49, 0 }
 0x4a1   : > { %1122 = vmatpush.bf16.xpose.msrb.mxu0 %v1113_v54 }
 0x4a3   : > { %2059 = vmatmul.msk.bf16.vlgmr.msra.gmra.mxu2 %vm805_vm9, %v3162_v48 }
 0x4a6   : > { %2058 = vmatmul.msk.bf16.vlgmr.msra.gmra.mxu1 %vm805_vm9, %v3123_v7  ;;  %2060 = vmatmul.msk.bf16.vlgmr.msra.gmra.mxu3 %vm805_vm9, %v3140_v17  ;;  %v1132_v7 = vperm.slane %v3150_v24, 1 }
 0x4a8   : > { %2061 = vmatmul.msk.bf16.vlgmr.msrb.gmra.mxu0 %vm805_vm9, %v3173_v51 }
 0x504   : > { %v3210_v56 = vpop.f32.mrf.mxu1 }
 0x50b   : > { %v3212_v57 = vpop.f32.mrf.mxu0 }
 0x50c   : > { %v971_v58 = vpop.f32.mrf.mxu1 }
 0x513   : > { %v1034_v59 = vpop.f32.mrf.mxu0 }
 0x516   : > { %v3214_v60 = vpop.f32.mrf.mxu2 }
 0x519   : > { %v3216_v61 = vpop.f32.mrf.mxu3 }
 0x51e   : > { %v992_v48 = vpop.f32.mrf.mxu2 }
 0x521   : > { %v1013_v62 = vpop.f32.mrf.mxu3 }
 0x523   : > { %v1055_v63 = vpop.f32.mrf.mxu1 }
 0x524   : > { %v1128_v2 = vmul.f32 0.35355338, %v1055_v63 }
 0x525   : > { %v1124_v17 = vpop.f32.mrf.mxu0 }
 0x526   : > { %v1078_v3 = vpop.f32.mrf.mxu2  ;;  %v1133_v4 = vadd.f32 %v1132_v7, %v1128_v2  ;;  %v1131_v9 = vmul.f32 0.35355338, %v1124_v17 }
 0x527   : > { %v1129_v51 = vmul.f32 0.35355338, %v1078_v3 }
 0x528   : > { %v1137_v5 = vsel %vm805_vm9, %v1133_v4, -inf  ;;  %v1136_v16 = vadd.f32 %v1132_v7, %v1131_v9  ;;  %v1278_v9 = vld [vmem:[%s3086_s19 + $0x4] sm:$0xf] }
 0x529   : > { %v1101_v1 = vpop.f32.mrf.mxu3  ;;  %1138 = vmax.xlane.f32.xlu2 %v1137_v5  ;;  %v1134_v6 = vadd.f32 %v1132_v7, %v1129_v51 }
 0x52a   : > { %v1130_v8 = vmul.f32 0.35355338, %v1101_v1  ;;  %v1146_v19 = vsel %vm805_vm9, %v1136_v16, -inf }
 0x52b   : > { %v1057_v11 = vpop.f32.mrf.mxu1  ;;  %v1140_v12 = vsel %vm805_vm9, %v1134_v6, -inf }
 0x52c   : > { %1141 = vmax.xlane.f32.xlu0 %v1140_v12  ;;  %v1135_v13 = vadd.f32 %v1132_v7, %v1130_v8  ;;  %v1315_v11 = vsel %vm956_vm10, %v1278_v9, 0  ;;  %v1280_v12 = vld [vmem:[%s3086_s19 + $0xc] sm:$0xf] }
 0x52d   : > { %v1126_v14 = vpop.f32.mrf.mxu0 }
 0x52e   : > { %v1080_v24 = vpop.f32.mrf.mxu2  ;;  %v1143_v15 = vsel %vm805_vm9, %v1135_v13, -inf  ;;  %v1279_v14 = vld [vmem:[%s3086_s19 + $0x8] sm:$0xf] }
 0x52f   : > { %1144 = vmax.xlane.f32.xlu1 %v1143_v15  ;;  %v1340_v24 = vsel %vm956_vm10, %v1279_v14, 0  ;;  %v1269_v15 = vpack.c.bf16 %v3210_v56, %v3210_v56 }
 0x531   : > { %v1103_v18 = vpop.f32.mrf.mxu3 }
 0x534   : > { %1147 = vmax.xlane.f32.xlu0 %v1146_v19  ;;  %v1283_v19 = vunpack.c.l.b16 %v1269_v15 }
 0x548   : > { %1206 = vrot.lane.b32.xlu0 %v3165_v50, %s2762_s0 }
 0x550   : > { %1185 = vrot.lane.b32.xlu0 %v3187_v26, %s2762_s0 }
 0x59c   : > { %v1139_v20 = vpop.xlane.xlu2 %1138 }
 0x59d   : > { %v1149_v21 = vsub.f32 %v1133_v4, %v1139_v20 }
 0x59f   : > { %v1153_v22 = vmul.f32 1.442695, %v1149_v21  ;;  %v1142_v23 = vpop.xlane.xlu0 %1141 }
 0x5a0   : > { %v1150_v25 = vsub.f32 %v1134_v6, %v1142_v23  ;;  %v1277_v6 = vld [vmem:[%s3086_s19] sm:$0xf]  ;;  %s3470_s19 = scalar_lea.vmem [#allocation8], %s3048_s17  ;;  %s3472_s17 = sld [smem:[#allocation27_spill]] }
 0x5a1   : > { %2337 = vpow2.f32 %v1153_v22  ;;  %v1290_v8 = vsel %vm956_vm10, %v1277_v6, 0  ;;  %v1271_v22 = vpack.c.bf16 %v3214_v60, %v3214_v60  ;;  %s3471_s24 = smov %s3470_s19 }
 0x5a2   : > { %v1155_v10 = vmul.f32 1.442695, %v1150_v25  ;;  %v1145_v29 = vpop.xlane.xlu1 %1144 }
 0x5a3   : > { %v1151_v50 = vsub.f32 %v1135_v13, %v1145_v29  ;;  %v1365_v13 = vsel %vm956_vm10, %v1280_v12, 0 }
 0x5a4   : > { %2339 = vpow2.f32 %v1155_v10 }
 0x5a5   : > { %v1157_v35 = vmul.f32 1.442695, %v1151_v50 }
 0x5a6   : > { %p2096_p8 = scmp.ne.s32.totalorder %s3472_s17, 1 }
 0x5a7   : > { %v2338_v28 = vpop.eup %2337  ;;  %v1148_v30 = vpop.xlane.xlu0 %1147 }
 0x5a8   : > { %v1152_v31 = vsub.f32 %v1136_v16, %v1148_v30  ;;  %v1161_v32 = vsel %vm805_vm9, %v2338_v28, 0.0 }
 0x5a9   : > { %1162 = vadd.xlane.f32.xlu2 %v1161_v32 }
 0x5aa   : > { %v2340_v33 = vpop.eup %2339  ;;  %v1159_v34 = vmul.f32 1.442695, %v1152_v31  ;;  %v1275_v31 = vpack.c.bf16 %v3212_v57, %v3212_v57 }
 0x5ab   : > { %v1164_v26 = vsel %vm805_vm9, %v2340_v33, 0.0 }
 0x5ac   : > { %2341 = vpow2.f32 %v1159_v34  ;;  %1165 = vadd.xlane.f32.xlu1 %v1164_v26  ;;  %v1358_v50 = vunpack.c.l.b16 %v1275_v31  ;;  %v1273_v26 = vpack.c.bf16 %v3216_v61, %v3216_v61 }
 0x5ad   : > { %2343 = vpow2.f32 %v1157_v35 }
 0x5b2   : > { %v2342_v36 = vpop.eup %2341 }
 0x5b3   : > { %v1170_v37 = vsel %vm805_vm9, %v2342_v36, 0.0  ;;  %v2344_v38 = vpop.eup %2343 }
 0x5b4   : > { %1171 = vadd.xlane.f32.xlu2 %v1170_v37  ;;  %v1167_v41 = vsel %vm805_vm9, %v2344_v38, 0.0 }
 0x5ba   : > { %v1207_v39 = vpop.permute.xlu0 %1206 }
 0x5bb   : > { %v1212_v40 = vsel %vm956_vm10, %v1207_v39, 0 }
 0x5bc   : > { %1221 = vmatpush.bf16.msrb.mxu2 %v1212_v40  ;;  %1168 = vadd.xlane.f32.xlu2 %v1167_v41 }
 0x5c0   : > { %1324 = vmatpush.bf16.msra.mxu2 %v1315_v11 }
 0x5c2   : > { %v1186_v42 = vpop.permute.xlu0 %1185 }
 0x5c3   : > { %v1191_v43 = vsel %vm956_vm10, %v1186_v42, 0 }
 0x5c4   : > { %1200 = vmatpush.bf16.msrb.mxu1 %v1191_v43 }
 0x5c5   : > { %1227 = vrot.lane.b32.xlu1 %v3158_v47, %s2762_s0 }
 0x5c8   : > { %1299 = vmatpush.bf16.msra.mxu1 %v1290_v8 }
 0x5d4   : > { %1248 = vrot.lane.b32.xlu2 %v3189_v27, %s2762_s0 }
 0x61c   : > { %v1163_v44 = vpop.xlane.xlu2 %1162 }
 0x61d   : > { %2345 = vrcp.f32 %v1163_v44 }
 0x61f   : > { %v1166_v45 = vpop.xlane.xlu1 %1165 }
 0x620   : > { %2347 = vrcp.f32 %v1166_v45 }
 0x623   : > { %v2346_v46 = vpop.eup %2345 }
 0x624   : > { %v1177_v49 = vmul.f32 %v2346_v46, %v2338_v28  ;;  %v1308_v28 = vunpack.c.l.b16 %v1271_v22 }
 0x626   : > { %v2348_v54 = vpop.eup %2347  ;;  %v1181_v58 = vpack.c.bf16 %v1177_v49, %v1177_v49 }
 0x627   : > { %v1178_v59 = vmul.f32 %v2348_v54, %v2340_v33  ;;  %v1172_v48 = vpop.xlane.xlu2 %1171 }
 0x628   : > { %2062 = vmatmul.msk.bf16.vlgmr.msrb.gmra.mxu1 %vm805_vm9, %v1181_v58  ;;  %2349 = vrcp.f32 %v1172_v48 }
 0x629   : > { %v1182_v62 = vpack.c.bf16 %v1178_v59, %v1178_v59  ;;  %v1395_v59 = vperm.slane %v3115_v55, 1 }
 0x62b   : > { %2063 = vmatmul.msk.bf16.vlgmr.msrb.gmra.mxu2 %vm805_vm9, %v1182_v62 }
 0x62e   : > { %v2350_v27 = vpop.eup %2349 }
 0x62f   : > { %v1169_v47 = vpop.xlane.xlu2 %1168  ;;  %v1180_v63 = vmul.f32 %v2350_v27, %v2342_v36 }
 0x630   : > { %2351 = vrcp.f32 %v1169_v47 }
 0x631   : > { %v1184_v1 = vpack.c.bf16 %v1180_v63, %v1180_v63 }
 0x636   : > { %v2352_v7 = vpop.eup %2351 }
 0x637   : > { %v1179_v2 = vmul.f32 %v2352_v7, %v2344_v38  ;;  %v1228_v17 = vpop.permute.xlu1 %1227  ;;  %v1249_v3 = vpop.permute.xlu2 %1248  ;;  %v1333_v38 = vunpack.c.l.b16 %v1273_v26 }
 0x638   : > { %v1233_v4 = vsel %vm956_vm10, %v1228_v17, 0  ;;  %v1254_v51 = vsel %vm956_vm10, %v1249_v3, 0 }
 0x639   : > { %v1183_v5 = vpack.c.bf16 %v1179_v2, %v1179_v2  ;;  %1242 = vmatpush.bf16.msrb.mxu3 %v1233_v4  ;;  %1263 = vmatpush.bf16.msra.mxu0 %v1254_v51 }
 0x63c   : > { %2064 = vmatmul.msk.bf16.vlgmr.msrb.gmra.mxu3 %vm805_vm9, %v1183_v5  ;;  %2065 = vmatmul.msk.bf16.vlgmr.msra.gmra.mxu0 %vm805_vm9, %v1184_v1 }
 0x63d   : > { %1374 = vmatpush.bf16.msrb.mxu0 %v1365_v13  ;;  %1349 = vmatpush.bf16.msra.mxu3 %v1340_v24  ;;  %v2763_v13 = vmov 32.0  }
 0x63e   : > { %2353 = vrcp.f32 %v2763_v13 }
 0x644   : > { %v2354_v14 = vpop.eup %2353 }
 0x645   : > { %v1407_v24 = vmul.f32 32.0, %v2354_v14  ;;  %vm1411_vm11 = vweird.f32 %v2354_v14 }
 0x6a5   : > { %v1202_v16 = vpop.f32.mrf.mxu1 }
 0x6a6   : > { %v1270_v18 = vpack.c.bf16 %v1202_v16, %v1202_v16 }
 0x6a8   : > { %v1284_v20 = vunpack.c.l.b16 %v1270_v18 }
 0x6aa   : > { %v1285_v21 = vpack.c.b16 %v1284_v20, %v1283_v19 }
 0x6ac   : > { %2066 = vmatmul.msk.bf16.vlgmr.msra.gmra.mxu1 %vm805_vm9, %v1285_v21 }
 0x6ad   : > { %v1204_v23 = vpop.f32.mrf.mxu1 }
 0x6ae   : > { %v1223_v25 = vpop.f32.mrf.mxu2 }
 0x6af   : > { %v1272_v10 = vpack.c.bf16 %v1223_v25, %v1223_v25 }
 0x6b1   : > { %v1309_v29 = vunpack.c.l.b16 %v1272_v10 }
 0x6b3   : > { %v1310_v30 = vpack.c.b16 %v1309_v29, %v1308_v28 }
 0x6b5   : > { %2067 = vmatmul.msk.bf16.vlgmr.msra.gmra.mxu2 %vm805_vm9, %v1310_v30  ;;  %v2137_v30 = vld [vmem:[%s3470_s19 + $0x8] sm:$0xff] }
 0x6b6   : > { %v1225_v56 = vpop.f32.mrf.mxu2  ;;  %1484 = vmatpush.bf16.msrb.mxu1 %v2137_v30 }
 0x6b9   : > { %v1265_v32 = vpop.f32.mrf.mxu0 }
 0x6ba   : > { %v1276_v33 = vpack.c.bf16 %v1265_v32, %v1265_v32 }
 0x6bc   : > { %v1359_v34 = vunpack.c.l.b16 %v1276_v33  ;;  %v2136_v33 = vld [vmem:[%s3471_s24] sm:$0xff] }
 0x6bd   : > { %1485 = vmatpush.bf16.msrb.mxu1 %v2136_v33 }
 0x6be   : > { %v1360_v60 = vpack.c.b16 %v1359_v34, %v1358_v50 }
 0x6bf   : > { %v1244_v35 = vpop.f32.mrf.mxu3 }
 0x6c0   : > { %v1274_v36 = vpack.c.bf16 %v1244_v35, %v1244_v35  ;;  %2069 = vmatmul.msk.bf16.vlgmr.msrb.gmra.mxu0 %vm805_vm9, %v1360_v60 }
 0x6c1   : > { %v1267_v37 = vpop.f32.mrf.mxu0 }
 0x6c2   : > { %v1334_v39 = vunpack.c.l.b16 %v1274_v36 }
 0x6c4   : > { %v1335_v40 = vpack.c.b16 %v1334_v39, %v1333_v38 }
 0x6c6   : > { %2068 = vmatmul.msk.bf16.vlgmr.msra.gmra.mxu3 %vm805_vm9, %v1335_v40 }
 0x6c7   : > { %v1246_v41 = vpop.f32.mrf.mxu3 }
 0x729   : > { %v1301_v42 = vpop.f32.mrf.mxu1 }
 0x72a   : > { %v1381_v45 = vsel %vm764_vm8, %v1301_v42, 0.0 }
 0x731   : > { %v1303_v62 = vpop.f32.mrf.mxu1 }
 0x732   : > { %v1388_v63 = vsel %vm764_vm8, %v1303_v62, 0.0 }
 0x738   : > { %v1326_v57 = vpop.f32.mrf.mxu2 }
 0x739   : > { %v1382_v43 = vsel %vm764_vm8, %v1326_v57, 0.0 }
 0x73a   : > { %v1383_v61 = vadd.f32 %v1382_v43, %v1381_v45  ;;  %v1451_v45 = vperm.slane %v3115_v55, 2 }
 0x73d   : > { %v1376_v44 = vpop.f32.mrf.mxu0 }
 0x73e   : > { %v1386_v48 = vsel %vm764_vm8, %v1376_v44, 0.0 }
 0x740   : > { %v1328_v54 = vpop.f32.mrf.mxu2 }
 0x741   : > { %v1389_v27 = vsel %vm764_vm8, %v1328_v54, 0.0  ;;  %v1454_v54 = vperm.slane %v3115_v55, 3 }
 0x742   : > { %v1390_v2 = vadd.f32 %v1389_v27, %v1388_v63  ;;  %v2140_v63 = vld [vmem:[%s3091_s30 + $0x10] sm:$0xff] }
 0x745   : > { %v1378_v17 = vpop.f32.mrf.mxu0 }
 0x746   : > { %v1393_v6 = vsel %vm764_vm8, %v1378_v17, 0.0  ;;  %v1462_v17 = vperm.slane %v3115_v55, 4 }
 0x749   : > { %v1351_v46 = vpop.f32.mrf.mxu3 }
 0x74a   : > { %v1384_v49 = vsel %vm764_vm8, %v1351_v46, 0.0 }
 0x74b   : > { %v1385_v58 = vadd.f32 %v1384_v49, %v1383_v61 }
 0x74d   : > { %v1387_v47 = vadd.f32 %v1386_v48, %v1385_v58 }
 0x74f   : > { %v1396_v7 = vadd.f32 %v1395_v59, %v1387_v47 }
 0x751   : > { %v1353_v3 = vpop.f32.mrf.mxu3  ;;  %v1398_v4 = vadd.f32 %v1396_v7, %v3106_v52  ;;  %v1408_v52 = vsub.f32 1.0, %v1407_v24  ;;  %v2141_v7 = vld [vmem:[%s3091_s30 + $0x18] sm:$0xff] }
 0x752   : > { %v1391_v51 = vsel %vm764_vm8, %v1353_v3, 0.0  ;;  %1552 = vmatpush.bf16.msrb.mxu2 %v2141_v7  ;;  %v1608_v7 = vperm.slane %v3115_v55, 6 }
 0x753   : > { %v1392_v5 = vadd.f32 %v1391_v51, %v1390_v2  ;;  %v1400_v1 = vsel %vm764_vm8, %v1398_v4, 0.0  ;;  %v1409_v15 = vmul.f32 %v2354_v14, %v1408_v52  ;;  %v2139_v2 = vld [vmem:[%s3091_s30 + $0x8] sm:$0xff] }
 0x754   : > { %1401 = vadd.xlane.f32.xlu1 %v1400_v1 }
 0x755   : > { %v1394_v8 = vadd.f32 %v1393_v6, %v1392_v5  ;;  %v1410_v16 = vadd.f32 %v2354_v14, %v1409_v15 }
 0x756   : > { %1553 = vmatpush.bf16.msrb.mxu2 %v2140_v63 }
 0x757   : > { %v1397_v9 = vadd.f32 %v1395_v59, %v1394_v8  ;;  %v3276_v18 = vsel %vm1411_vm11, %v2354_v14, %v1410_v16 }
 0x759   : > { %v1399_v11 = vadd.f32 %v1397_v9, %v3108_v53 }
 0x75a   : > { %1554 = vmatpush.bf16.msrb.mxu2 %v2139_v2 }
 0x75b   : > { %v1403_v12 = vsel %vm764_vm8, %v1399_v11, 0.0 }
 0x75c   : > { %1404 = vadd.xlane.f32.xlu0 %v1403_v12 }
 0x7c7   : > { %v1402_v19 = vpop.xlane.xlu1 %1401 }
 0x7c8   : > { %v1413_v20 = vmul.f32 %v3276_v18, %v1402_v19 }
 0x7ca   : > { %v1415_v21 = vsub.f32 %v1398_v4, %v1413_v20  ;;  %v2138_v4 = vld [vmem:[%s3091_s30] sm:$0xff] }
 0x7cb   : > { %1555 = vmatpush.bf16.msrb.mxu2 %v2138_v4 }
 0x7cc   : > { %v1417_v53 = vmul.f32 %v1415_v21, %v1415_v21 }
 0x7ce   : > { %v1419_v22 = vsel %vm764_vm8, %v1417_v53, 0.0 }
 0x7cf   : > { %1420 = vadd.xlane.f32.xlu2 %v1419_v22  ;;  %v1405_v23 = vpop.xlane.xlu0 %1404 }
 0x7d0   : > { %v1414_v25 = vmul.f32 %v3276_v18, %v1405_v23 }
 0x7d2   : > { %v1416_v10 = vsub.f32 %v1399_v11, %v1414_v25 }
 0x7d4   : > { %v1418_v28 = vmul.f32 %v1416_v10, %v1416_v10 }
 0x7d6   : > { %v1422_v29 = vsel %vm764_vm8, %v1418_v28, 0.0  ;;  %v1519_v28 = vperm.slane %v3115_v55, 5 }
 0x7d7   : > { %1423 = vadd.xlane.f32.xlu1 %v1422_v29 }
 0x842   : > { %v1421_v56 = vpop.xlane.xlu2 %1420 }
 0x843   : > { %v1425_v31 = vmul.f32 %v1421_v56, %v3276_v18 }
 0x845   : > { %v1427_v32 = vadd.f32 1e-12, %v1425_v31 }
 0x847   : > { %2355 = vrsqrt.f32 %v1427_v32  ;;  %vm1435_vm13 = vweird.f32 %v1427_v32 }
 0x84a   : > { %v1424_v50 = vpop.xlane.xlu1 %1423 }
 0x84b   : > { %v1426_v34 = vmul.f32 %v1424_v50, %v3276_v18 }
 0x84d   : > { %v2356_v26 = vpop.eup %2355  ;;  %v1428_v60 = vadd.f32 1e-12, %v1426_v34 }
 0x84e   : > { %v1430_v35 = vmul.f32 %v2356_v26, %v1427_v32  ;;  %vm1436_vm12 = vweird.f32 %v2356_v26 }
 0x84f   : > { %2357 = vrsqrt.f32 %v1428_v60  ;;  %vm1437_vm14 = vmor %vm1435_vm13, %vm1436_vm12  ;;  %vm1445_vm0 = vweird.f32 %v1428_v60 }
 0x850   : > { %v1431_v36 = vmul.f32 %v2356_v26, %v1430_v35 }
 0x852   : > { %v1432_v37 = vmul.f32 0.5, %v1431_v36 }
 0x854   : > { %v1433_v38 = vsub.f32 1.5, %v1432_v37 }
 0x855   : > { %v2358_v39 = vpop.eup %2357 }
 0x856   : > { %v1434_v40 = vmul.f32 %v2356_v26, %v1433_v38  ;;  %v1440_v41 = vmul.f32 %v2358_v39, %v1428_v60  ;;  %vm1446_vm15 = vweird.f32 %v2358_v39 }
 0x857   : > { %vm1447_vm1 = vmor %vm1445_vm0, %vm1446_vm15 }
 0x858   : > { %v1441_v57 = vmul.f32 %v2358_v39, %v1440_v41  ;;  %v1438_v42 = vsel %vm1437_vm14, %v2356_v26, %v1434_v40 }
 0x859   : > { %v1449_v61 = vmul.f32 %v1438_v42, %v1415_v21 }
 0x85a   : > { %v1442_v43 = vmul.f32 0.5, %v1441_v57 }
 0x85b   : > { %v1452_v58 = vmul.f32 %v1451_v45, %v1449_v61 }
 0x85c   : > { %v1443_v44 = vsub.f32 1.5, %v1442_v43 }
 0x85d   : > { %v1455_v62 = vadd.f32 %v1454_v54, %v1452_v58 }
 0x85e   : > { %v1444_v46 = vmul.f32 %v2358_v39, %v1443_v44 }
 0x860   : > { %v1448_v49 = vsel %vm1447_vm1, %v2358_v39, %v1444_v46 }
 0x861   : > { %v1450_v59 = vmul.f32 %v1448_v49, %v1416_v10 }
 0x863   : > { %v1453_v48 = vmul.f32 %v1451_v45, %v1450_v59 }
 0x865   : > { %v1456_v47 = vadd.f32 %v1454_v54, %v1453_v48 }
 0x867   : > { %v1457_v27 = vpack.c.bf16 %v1456_v47, %v1455_v62 }
 0x869   : > { %2078 = vmatmul.msk.bf16.vlgmr.msrb.gmra.mxu1 %vm764_vm8, %v1457_v27 }
 0x8e6   : > { %v1487_v3 = vpop.f32.mrf.mxu1 }
 0x8e7   : > { %v1488_v51 = vadd.f32 %v1487_v3, %v1462_v17 }
 0x8e9   : > { %v1492_v5 = vmul.f32 %v1488_v51, %v1488_v51 }
 0x8eb   : > { %v1494_v1 = vmul.f32 %v1492_v5, %v1488_v51 }
 0x8ed   : > { %v1496_v6 = vmul.f32 0.044715, %v1494_v1 }
 0x8ee   : > { %v1489_v8 = vpop.f32.mrf.mxu1 }
 0x8ef   : > { %v1498_v9 = vadd.f32 %v1496_v6, %v1488_v51  ;;  %v1490_v11 = vadd.f32 %v1489_v8, %v1462_v17  ;;  %v1611_v17 = vperm.slane %v3115_v55, 7 }
 0x8f1   : > { %v1500_v12 = vmul.f32 0.7978846, %v1498_v9  ;;  %v1493_v13 = vmul.f32 %v1490_v11, %v1490_v11 }
 0x8f3   : > { %v1495_v14 = vmul.f32 %v1493_v13, %v1490_v11  ;;  %2359 = vtanh.f32 %v1500_v12 }
 0x8f5   : > { %v1497_v24 = vmul.f32 0.044715, %v1495_v14 }
 0x8f7   : > { %v1499_v52 = vadd.f32 %v1497_v24, %v1490_v11 }
 0x8f9   : > { %v1501_v15 = vmul.f32 0.7978846, %v1499_v52  ;;  %v2360_v16 = vpop.eup %2359 }
 0x8fa   : > { %v1504_v19 = vadd.f32 1.0, %v2360_v16 }
 0x8fb   : > { %2361 = vtanh.f32 %v1501_v15 }
 0x8fc   : > { %v1506_v21 = vmul.f32 0.5, %v1504_v19 }
 0x8fe   : > { %v1508_v23 = vmul.f32 %v1506_v21, %v1488_v51 }
 0x901   : > { %v2362_v20 = vpop.eup %2361 }
 0x902   : > { %v1505_v53 = vadd.f32 1.0, %v2362_v20 }
 0x904   : > { %v1507_v22 = vmul.f32 0.5, %v1505_v53 }
 0x906   : > { %v1509_v25 = vmul.f32 %v1507_v22, %v1490_v11 }
 0x908   : > { %v1510_v10 = vpack.c.bf16 %v1509_v25, %v1508_v23 }
 0x90a   : > { %2095 = vmatmul.msk.bf16.vlgmr.msrb.gmra.mxu2 %vm1544_vm2, %v1510_v10 }
 0x98d   : > { %v1557_v29 = vpop.f32.mrf.mxu2 }
 0x98e   : > { %v1558_v30 = vadd.f32 %v1557_v29, %v1519_v28 }
 0x990   : > { %v1562_v56 = vadd.f32 %v1558_v30, %v1455_v62 }
 0x992   : > { %v1564_v31 = vsel %vm764_vm8, %v1562_v56, 0.0 }
 0x993   : > { %1565 = vadd.xlane.f32.xlu0 %v1564_v31 }
 0x995   : > { %v1559_v32 = vpop.f32.mrf.mxu2 }
 0x996   : > { %v1560_v33 = vadd.f32 %v1559_v32, %v1519_v28 }
 0x998   : > { %v1563_v50 = vadd.f32 %v1560_v33, %v1456_v47 }
 0x99a   : > { %v1567_v34 = vsel %vm764_vm8, %v1563_v50, 0.0 }
 0x99b   : > { %1568 = vadd.xlane.f32.xlu1 %v1567_v34 }
 0xa06   : > { %v1566_v26 = vpop.xlane.xlu0 %1565 }
 0xa07   : > { %v1570_v60 = vmul.f32 %v1566_v26, %v3276_v18 }
 0xa09   : > { %v1572_v35 = vsub.f32 %v1562_v56, %v1570_v60 }
 0xa0b   : > { %v1574_v36 = vmul.f32 %v1572_v35, %v1572_v35 }
 0xa0d   : > { %v1576_v37 = vsel %vm764_vm8, %v1574_v36, 0.0 }
 0xa0e   : > { %v1569_v38 = vpop.xlane.xlu1 %1568  ;;  %1577 = vadd.xlane.f32.xlu0 %v1576_v37 }
 0xa0f   : > { %v1571_v39 = vmul.f32 %v1569_v38, %v3276_v18 }
 0xa11   : > { %v1573_v40 = vsub.f32 %v1563_v50, %v1571_v39 }
 0xa13   : > { %v1575_v41 = vmul.f32 %v1573_v40, %v1573_v40 }
 0xa15   : > { %v1579_v57 = vsel %vm764_vm8, %v1575_v41, 0.0 }
 0xa16   : > { %1580 = vadd.xlane.f32.xlu1 %v1579_v57 }
 0xa81   : > { %v1578_v42 = vpop.xlane.xlu0 %1577 }
 0xa82   : > { %v1582_v43 = vmul.f32 %v1578_v42, %v3276_v18 }
 0xa84   : > { %v1584_v44 = vadd.f32 1e-12, %v1582_v43 }
 0xa86   : > { %2363 = vrsqrt.f32 %v1584_v44  ;;  %vm1592_vm4 = vweird.f32 %v1584_v44 }
 0xa89   : > { %v1581_v45 = vpop.xlane.xlu1 %1580 }
 0xa8a   : > { %v1583_v61 = vmul.f32 %v1581_v45, %v3276_v18 }
 0xa8c   : > { %v2364_v46 = vpop.eup %2363  ;;  %v1585_v49 = vadd.f32 1e-12, %v1583_v61 }
 0xa8d   : > { %v1587_v54 = vmul.f32 %v2364_v46, %v1584_v44  ;;  %vm1593_vm3 = vweird.f32 %v2364_v46 }
 0xa8e   : > { %2365 = vrsqrt.f32 %v1585_v49  ;;  %vm1594_vm5 = vmor %vm1592_vm4, %vm1593_vm3  ;;  %vm1602_vm7 = vweird.f32 %v1585_v49 }
 0xa8f   : > { %v1588_v58 = vmul.f32 %v2364_v46, %v1587_v54 }
 0xa91   : > { %v1589_v59 = vmul.f32 0.5, %v1588_v58 }
 0xa93   : > { %v1590_v48 = vsub.f32 1.5, %v1589_v59 }
 0xa94   : > { %v2366_v62 = vpop.eup %2365 }
 0xa95   : > { %v1591_v47 = vmul.f32 %v2364_v46, %v1590_v48  ;;  %v1597_v27 = vmul.f32 %v2366_v62, %v1585_v49  ;;  %vm1603_vm6 = vweird.f32 %v2366_v62 }
 0xa96   : > { %vm1604_vm9 = vmor %vm1602_vm7, %vm1603_vm6 }
 0xa97   : > { %v1595_v63 = vsel %vm1594_vm5, %v2364_v46, %v1591_v47  ;;  %v1598_v2 = vmul.f32 %v2366_v62, %v1597_v27 }
 0xa98   : > { %v1606_v18 = vmul.f32 %v1595_v63, %v1572_v35 }
 0xa99   : > { %v1599_v3 = vmul.f32 0.5, %v1598_v2 }
 0xa9a   : > { %v1609_v4 = vmul.f32 %v1608_v7, %v1606_v18 }
 0xa9b   : > { %v1600_v51 = vsub.f32 1.5, %v1599_v3 }
 0xa9c   : > { %v1612_v5 = vadd.f32 %v1611_v17, %v1609_v4 }
 0xa9d   : > { %v1601_v1 = vmul.f32 %v2366_v62, %v1600_v51 }
 0xa9e   : > { %1614 = vst.msk [vmem:[#allocation2] sm:$0xff] %vm764_vm8, %v1612_v5 }
 0xa9f   : > { %v1605_v6 = vsel %vm1604_vm9, %v2366_v62, %v1601_v1 }
 0xaa0   : > { %v1607_v8 = vmul.f32 %v1605_v6, %v1573_v40 }
 0xaa2   : > { %v1610_v9 = vmul.f32 %v1608_v7, %v1607_v8  ;;  %1619 = sbr.rel (%p2096_p8) target bundleno = 3144 (0xc48), region = 100 }
 0xaa4   : > { %v1613_v11 = vadd.f32 %v1611_v17, %v1610_v9 }
 0xaa6   : > { %1615 = vst.msk [vmem:[#allocation2 + $0x8] sm:$0xff] %vm764_vm8, %v1613_v11 }
 0xaa7   : > { %v2143_v55 = vld [vmem:[#allocation10 + $0x8] sm:$0xff]  ;;  %v1621_v12 = vrot.slane %v1613_v11, 7  ;;  %vm1623_vm10 = vcmask 1040384   ;;  %v2142_v13 = vld [vmem:[#allocation10] sm:$0xff]  ;;  %v2145_v52 = vld [vmem:[#allocation11 + $0x8] sm:$0xff]  ;;  %v1630_v16 = vperm.slane %v3078_v0, 2 }
 0xaa8   : > { %1652 = vmatpush.bf16.msra.mxu0 %v2143_v55  ;;  %1689 = vmatpush.bf16.msra.mxu1 %v2145_v52  ;;  %v2144_v15 = vld [vmem:[#allocation11] sm:$0xff]  ;;  %vm1660_vm11 = vcmask 254976   ;;  %v2147_v23 = vld [vmem:[#allocation13 + $0x8] sm:$0xff]  ;;  %v2146_v25 = vld [vmem:[#allocation13] sm:$0xff]  ;;  %v1667_v10 = vperm.slane %v3078_v0, 3  ;;  %v1702_v32 = vperm.slane %v3078_v0, 4 }
 0xaa9   : > { %v1624_v14 = vsel %vm1623_vm10, %v1612_v5, %v1621_v12  ;;  %1724 = vmatpush.bf16.msra.mxu2 %v2147_v23 }
 0xaaa   : > { %v1625_v24 = vpack.c.bf16 %v1624_v14, %v1624_v14 }
 0xaac   : > { %1653 = vmatpush.bf16.msra.mxu0 %v2142_v13  ;;  %1690 = vmatpush.bf16.msra.mxu1 %v2144_v15 }
 0xaad   : > { %1725 = vmatpush.bf16.msra.mxu2 %v2146_v25 }
 0xaaf   : > { %2105 = vmatmul.msk.bf16.vlgmr.msra.gmra.mxu0 %vm764_vm8, %v1625_v24 }
 0xb2c   : > { %v1655_v19 = vpop.f32.mrf.mxu0 }
 0xb2d   : > { %v1656_v20 = vadd.f32 %v1655_v19, %v1630_v16 }
 0xb2f   : > { %2367 = vtanh.f32 %v1656_v20 }
 0xb34   : > { %v1657_v21 = vpop.f32.mrf.mxu0 }
 0xb35   : > { %v2368_v53 = vpop.eup %2367 }
 0xb36   : > { %1661 = vst.msk [vmem:[%s646_s7] sm:$0x3] %vm1660_vm11, %v2368_v53  ;;  %v1662_v22 = vpack.c.bf16 %v2368_v53, %v2368_v53 }
 0xb38   : > { %2114 = vmatmul.msk.bf16.vlgmr.msra.gmra.mxu1 %vm764_vm8, %v1662_v22 }
 0xbb5   : > { %v1692_v28 = vpop.f32.mrf.mxu1 }
 0xbb6   : > { %v1693_v29 = vadd.f32 %v1692_v28, %v1667_v10 }
 0xbb8   : > { %v1696_v30 = vmax.f32 %v1693_v29, 0.0 }
 0xbba   : > { %v1697_v56 = vpack.c.bf16 %v1696_v30, %v1696_v30 }
 0xbbc   : > { %2123 = vmatmul.msk.bf16.vlgmr.msra.gmra.mxu2 %vm764_vm8, %v1697_v56 }
 0xbbd   : > { %v1694_v31 = vpop.f32.mrf.mxu1 }
 0xc3f   : > { %v1727_v33 = vpop.f32.mrf.mxu2 }
 0xc40   : > { %v1728_v50 = vadd.f32 %v1727_v33, %v1702_v32 }
 0xc42   : > { %1731 = vst [vmem:[%s653_s3] sm:$0x3] %v1728_v50 }
 0xc47   : > { %v1729_v34 = vpop.f32.mrf.mxu2 }
 0xc48 PF: > { %s3473_s13 = sld [smem:[#allocation47_spill]]  ;;  %s1750_s12 = sshll.u32 %s646_s7, 4  ;;  %s1751_s12 = int_to_ptr.vmem [resolvable:$true] %s1750_s12 }
 0xc49   : > { %s1733_s16 = scalar_lea.sflag [#allocation5], %s3033_s20 }
 0xc4e   : > { %s3474_s6 = smov %s3473_s13  ;;  %s1748_s21 = scalar_lea.hbm %s3473_s13, %s3067_s9 }
 0xc4f   : > { %s1752_s18 = sshll.u32 %s1748_s21, 4  ;;  %s2599_s27 = scalar_lea.hbm %s3474_s6, 4  ;;  %s1753_s18 = int_to_ptr.hbm [resolvable:$true] %s1752_s18 }
 0xc50   : > { %s2593_s26 = sshra.s32 %s1753_s18, 4  ;;  %s2594_s26 = int_to_ptr.hbm [resolvable:$true] %s2593_s26 }
 0xc51   : > { %s2595_s30 = scalar_lea.hbm %s2594_s26, 2  ;;  %p2600_p11 = scmp.lt.s32.totalorder %s2594_s26, %s3474_s6 }
 0xc52   : > { %p2596_p2 = scmp.ne.s32.totalorder %s2594_s26, %s2595_s30  ;;  %p2601_p0 = scmp.lt.s32.totalorder %s2599_s27, %s2595_s30 }
 0xc54   : > { %p2597_p1 = pnand %p2596_p2, %p2951_p4  ;;  %p2602_p5 = por %p2601_p0, %p2600_p11 }
 0xc56   : > { %p2598_p9 = pneg %p2597_p1 }
 0xc58   : > { %p2603_p3 = pnand %p2602_p5, %p2598_p9 }
 0xc5a   : > { %2606 = shalt.err (!%p2603_p3)
}
 0xc5b   : > { %2170 = dma.vmem_to_hbm [thread:$0]  (%p2951_p4), %s1751_s12, 32, %s1753_s18, %s1733_s16  }
 0xc5c   : > { %s3476_s23 = sld [smem:[#allocation48_spill]]  ;;  %s1764_s17 = sshll.u32 %s653_s3, 4  ;;  %s1765_s17 = int_to_ptr.vmem [resolvable:$true] %s1764_s17 }
 0xc5d   : > { %s1738_s14 = scalar_lea.sflag [#allocation16], %s3033_s20 }
 0xc62   : > { %s3477_s19 = smov %s3476_s23  ;;  %s1762_s24 = scalar_lea.hbm %s3476_s23, %s3067_s9 }
 0xc63   : > { %s1766_s28 = sshll.u32 %s1762_s24, 4  ;;  %s2627_s12 = scalar_lea.hbm %s3477_s19, 4  ;;  %s1767_s28 = int_to_ptr.hbm [resolvable:$true] %s1766_s28 }
 0xc64   : > { %s2621_s13 = sshra.s32 %s1767_s28, 4  ;;  %s2622_s13 = int_to_ptr.hbm [resolvable:$true] %s2621_s13 }
 0xc65   : > { %s2623_s21 = scalar_lea.hbm %s2622_s13, 2  ;;  %p2628_p6 = scmp.lt.s32.totalorder %s2622_s13, %s3477_s19 }
 0xc66   : > { %p2624_p12 = scmp.ne.s32.totalorder %s2622_s13, %s2623_s21  ;;  %p2629_p8 = scmp.lt.s32.totalorder %s2627_s12, %s2623_s21 }
 0xc68   : > { %p2625_p7 = pnand %p2624_p12, %p2951_p4  ;;  %p2630_p2 = por %p2629_p8, %p2628_p6 }
 0xc6a   : > { %p2626_p13 = pneg %p2625_p7 }
 0xc6c   : > { %p2631_p1 = pnand %p2630_p2, %p2626_p13 }
 0xc6e   : > { %2634 = shalt.err (!%p2631_p1)
}
 0xc6f   : > { %2171 = dma.vmem_to_hbm [thread:$0]  (%p2951_p4), %s1765_s17, 32, %s1767_s28, %s1738_s14  }
 0xc70 PF: > { %s3478_s20 = sld [smem:[#allocation30_spill]] }
 0xc71   : > { %s3479_s1 = sld [smem:[#allocation25_spill]] }
 0xc76   : > { %p2213_p9 = scmp.ge.s32.totalorder %s3478_s20, 2 }
 0xc77   : > { %s1778_s3 = sand.u32 1, %s3479_s1  }
 0xc78   : > { %p2198_p11 = pnand %p2213_p9, %p2958_p10  ;;  %s1779_s5 = scalar_lea.sflag [#allocation5], %s1778_s3 }
 0xc7a   : > { %p2199_p0 = pneg %p2198_p11 }
 0xc7c   : > { %2700 = dma.done.wait (%p2199_p0), %s1779_s5, 32  }
 0xc7d   : > { %2702 = vsyncadd (%p2199_p0), %s1779_s5, 4294967264  ;;  %s1789_s4 = scalar_lea.sflag [#allocation16], %s1778_s3 }
 0xc7e   : > { %2704 = dma.done.wait (%p2199_p0), %s1789_s4, 32  }
 0xc7f   : > { %2706 = vsyncadd (%p2199_p0), %s1789_s4, 4294967264  ;;  %s34_s13 = sadd.s32 1, %s3478_s20   ;;  %s3481_s15 = sld [smem:[#allocation24_spill]] }
 0xc80   : > { %p31_p5 = scmp.ge.s32.totalorder %s34_s13, 6   ;;  %s3482_s23 = sld [smem:[#allocation33_spill]] }
 0xc81   : > { %s3483_s27 = sld [smem:[#allocation26_spill]]  ;;  %s3488_s21 = smov %s2713_s22 }
 0xc82   : > { %s3484_s26 = sld [smem:[#allocation34_spill]]  ;;  %s3490_s24 = smov %s2725_s25 }
 0xc83   : > { %s3485_s28 = sld [smem:[#allocation29_spill]] }
 0xc84   : > { %s3486_s2 = sld [smem:[#allocation31_spill]] }
 0xc85   : > { %s3487_s30 = sld [smem:[#allocation32_spill]]  ;;  %s3489_s22 = smov %s3481_s15 }
 0xc86   :  { %33 = sbr.rel (!%p31_p5) target bundleno = 25 (0x19), region = 184 }
 0xc87   : > { %s3491_s25 = smov %s3483_s27  ;;  %s3492_s27 = smov %s2741_s29 }
 0xc8a   : > { %s3493_s29 = smov %s3486_s2 }
 0xc8b   :  { %1795 = vsyncpa [#allocation4], 1 }
 0xc8c   :  { %1797 = vsyncpa [#allocation4 + $0x1], 1 }
 0xc8d   :  { %1798 = vsyncpa [#allocation7], 1 }
 0xc8e   :  { %1799 = vsyncpa [#allocation12], 1 }
 0xc8f   :  { %1800 = vsyncpa [#allocation5], 1 }
 0xc90   :  { %1802 = vsyncpa [#allocation5 + $0x1], 1 }
 0xc91   :  { %1803 = vsyncpa [#allocation16], 1 }
 0xc92   :  { %1805 = vsyncpa [#allocation16 + $0x1], 1 }

</bundles_post_ra>
